<compile_context>
chip_gen: v5e
topology: v5e:2x2
jax: 0.10.0
libtpu: 0.0.40
codegen_flags: <defaults>
</compile_context>

<pallas_src>
import functools

import numpy as np
import jax
import jax.numpy as jnp
from jax import lax
from jax.experimental import pallas as pl
from jax.experimental.pallas import tpu as pltpu

BN_EPS = 1e-5
NUM_OPS = 5
_NEG_BIG = 1e30


@functools.lru_cache(maxsize=None)
def _vmem_limit_bytes():
    try:
        cap = int(pltpu.get_tpu_info().vmem_capacity_bytes)
    except Exception:
        cap = 64 * 1024 * 1024
    return int(min(max(cap * 3 // 4, 16 * 1024 * 1024), 100 * 1024 * 1024))


def _cparams(sem):
    return pltpu.CompilerParams(dimension_semantics=sem,
                                vmem_limit_bytes=_vmem_limit_bytes())


# ---------------------------------------------------------------------------
# Pass 1 (per edge): raw op outputs + per-image BN partial sums
# ---------------------------------------------------------------------------
def _edge_pass1_kernel(*refs, reduction, ho, wo, cc):
    """One image per grid step.  Builds the 3x3 window taps from the column-shifted slab(s),
    computes the 4 non-zero candidate ops (max-pool, avg-pool, conv3x3, identity/FR) and
    writes them packed along lanes as (P, 4C) bf16 plus (8, C) per-image BN partial sums."""
    if reduction:
        xwe_ref, xwo_ref, mpad_ref, cw_ref, frw_ref, inter_ref, stats_ref = refs
    else:
        xw_ref, mpad_ref, cw_ref, inter_ref, stats_ref = refs
    p = ho * wo

    def slab(kh):  # (P, 3C) f32: row-tap kh with the 3 column taps packed along lanes
        if reduction:
            if kh == 0:
                return xwe_ref[0, 0:p, :]
            if kh == 1:
                return xwo_ref[0, 0:p, :]
            return xwe_ref[0, wo:wo + p, :]
        return xw_ref[0, kh * wo:kh * wo + p, :]

    slabs = [slab(kh) for kh in range(3)]

    # 3x3 conv as 3 im2col matmuls (K = 3*C), bf16 operands, f32 accumulation.
    cv = None
    for kh in range(3):
        d = jnp.dot(slabs[kh].astype(jnp.bfloat16), cw_ref[kh],
                    preferred_element_type=jnp.float32)
        cv = d if cv is None else cv + d

    # Pooling on the VPU in f32.  Padded positions: -1e30 for max-pool (PyTorch semantics),
    # included as zeros for avg-pool (count_include_pad=True, nn.AvgPool2d default).
    mx = None
    for kh in range(3):
        for kw in range(3):
            t = slabs[kh][:, kw * cc:(kw + 1) * cc] + mpad_ref[kh * 3 + kw]
            mx = t if mx is None else jnp.maximum(mx, t)
    ssum = slabs[0] + slabs[1] + slabs[2]
    av = (ssum[:, 0:cc] + ssum[:, cc:2 * cc] + ssum[:, 2 * cc:3 * cc]) * jnp.float32(1.0 / 9.0)

    if reduction:
        # FactorizedReduce: relu -> two stride-2 1x1 convs -> channel concat (BN in pass 2).
        t4 = jnp.maximum(slabs[1][:, cc:2 * cc], 0.0).astype(jnp.bfloat16)      # relu(x[2r, 2q])
        t8 = jnp.maximum(slabs[2][:, 2 * cc:3 * cc], 0.0).astype(jnp.bfloat16)  # relu(x[2r+1, 2q+1])
        op4 = (jnp.dot(t4, frw_ref[0], preferred_element_type=jnp.float32)
               + jnp.dot(t8, frw_ref[1], preferred_element_type=jnp.float32))
    else:
        op4 = slabs[1][:, cc:2 * cc]                                            # identity (exact f32)

    rows = []
    for y in (mx, av, cv, op4):
        rows.append(jnp.sum(y, axis=0, keepdims=True))
        rows.append(jnp.sum(y * y, axis=0, keepdims=True))
    stats_ref[0] = jnp.concatenate(rows, axis=0)                 # (8, C) per-image partials
    inter_ref[0] = jnp.concatenate(
        [mx.astype(jnp.bfloat16), av.astype(jnp.bfloat16),
         cv.astype(jnp.bfloat16), op4.astype(jnp.bfloat16)], axis=-1)  # (P, 4C) bf16


# ---------------------------------------------------------------------------
# Pass 2 (per node): BN + softmax(alpha) weighting, fused edge-sum / channel concat
# ---------------------------------------------------------------------------
def _node_apply_kernel(*refs, num_edges, cc, concat):
    inters = refs[:num_edges]
    sbs = refs[num_edges:2 * num_edges]
    o_ref = refs[2 * num_edges]
    pieces = []
    total = None
    for e in range(num_edges):
        inter = inters[e][0]            # (P, 4C) bf16
        sb = sbs[e][...]                # (5, C) f32: rows 0..3 per-op scale (alpha folded), row 4 bias
        val = None
        for k in range(4):
            contrib = inter[:, k * cc:(k + 1) * cc].astype(jnp.float32) * sb[k:k + 1, :]
            val = contrib if val is None else val + contrib
        val = val + sb[4:5, :]
        if concat:
            pieces.append(val)
        else:
            total = val if total is None else total + val
    o_ref[0] = jnp.concatenate(pieces, axis=-1) if concat else total


# ---------------------------------------------------------------------------
# Wrapper-side helpers (tiny / layout-only XLA work between the two passes)
# ---------------------------------------------------------------------------
def _make_mpad(h_in, w_in, ho, wo, stride):
    """(9, P, 1) additive mask: 0 at valid window taps, -1e30 at padded ones (max-pool)."""
    r = np.arange(ho).reshape(ho, 1)
    q = np.arange(wo).reshape(1, wo)
    masks = []
    for kh in range(3):
        for kw in range(3):
            rr = stride * r + kh - 1
            qq = stride * q + kw - 1
            valid = (rr >= 0) & (rr < h_in) & (qq >= 0) & (qq < w_in)
            masks.append(np.where(valid, 0.0, -_NEG_BIG).astype(np.float32))
    return jnp.asarray(np.stack(masks).reshape(9, ho * wo, 1))


def _prep_stride1(x):
    """Column-shifted, row-flattened slab (N, (h+2)*w, 3C) for stride-1 3x3 windows."""
    n, h, w, c = x.shape
    xp = jnp.pad(x, ((0, 0), (1, 1), (1, 1), (0, 0)))
    xw = jnp.concatenate([xp[:, :, kw:kw + w, :] for kw in range(3)], axis=-1)
    return (xw.reshape(n, (h + 2) * w, 3 * c), _make_mpad(h, w, h, w, 1))


def _prep_stride2(x):
    """Even/odd row-parity slabs (column taps packed along lanes) for stride-2 3x3 windows."""
    n, h, w, c = x.shape
    ho, wo = h // 2, w // 2
    xp = jnp.pad(x, ((0, 0), (1, 1), (1, 1), (0, 0)))
    xw = jnp.concatenate([xp[:, :, kw::2, :][:, :, :wo, :] for kw in range(3)], axis=-1)
    xwe = xw[:, 0::2][:, :ho + 1].reshape(n, (ho + 1) * wo, 3 * c)
    xwo = xw[:, 1::2][:, :ho + 1].reshape(n, (ho + 1) * wo, 3 * c)
    return (xwe, xwo, _make_mpad(h, w, ho, wo, 2))


def _edge_pass1(prep, p_edge, reduction, cc, n, ho, wo):
    P = ho * wo
    cw = jnp.transpose(p_edge["conv"], (2, 3, 1, 0)).reshape(3, 3 * cc, cc).astype(jnp.bfloat16)
    if reduction:
        xwe, xwo, mpad = prep
        ch = cc // 2
        w1 = jnp.zeros((cc, cc), jnp.float32).at[:, :ch].set(
            jnp.transpose(p_edge["fr1"][:, :, 0, 0], (1, 0)))
        w2 = jnp.zeros((cc, cc), jnp.float32).at[:, ch:].set(
            jnp.transpose(p_edge["fr2"][:, :, 0, 0], (1, 0)))
        frw = jnp.stack([w1, w2]).astype(jnp.bfloat16)
        args = (xwe, xwo, mpad, cw, frw)
        in_specs = [
            pl.BlockSpec((1, xwe.shape[1], 3 * cc), lambda i: (i, 0, 0)),
            pl.BlockSpec((1, xwo.shape[1], 3 * cc), lambda i: (i, 0, 0)),
            pl.BlockSpec((9, P, 1), lambda i: (0, 0, 0)),
            pl.BlockSpec((3, 3 * cc, cc), lambda i: (0, 0, 0)),
            pl.BlockSpec((2, cc, cc), lambda i: (0, 0, 0)),
        ]
    else:
        xw, mpad = prep
        args = (xw, mpad, cw)
        in_specs = [
            pl.BlockSpec((1, xw.shape[1], 3 * cc), lambda i: (i, 0, 0)),
            pl.BlockSpec((9, P, 1), lambda i: (0, 0, 0)),
            pl.BlockSpec((3, 3 * cc, cc), lambda i: (0, 0, 0)),
        ]
    inter, stats = pl.pallas_call(
        functools.partial(_edge_pass1_kernel, reduction=reduction, ho=ho, wo=wo, cc=cc),
        grid=(n,),
        in_specs=in_specs,
        out_specs=[pl.BlockSpec((1, P, 4 * cc), lambda i: (i, 0, 0)),
                   pl.BlockSpec((1, 8, cc), lambda i: (i, 0, 0))],
        out_shape=[jax.ShapeDtypeStruct((n, P, 4 * cc), jnp.bfloat16),
                   jax.ShapeDtypeStruct((n, 8, cc), jnp.float32)],
        compiler_params=_cparams(("parallel",)),
    )(*args)
    return inter, stats


def _edge_scale_bias(stats, alpha5, m_count, reduction):
    """Fold global BN (batch stats) and softmax(alpha) into a (5, C) scale/bias table."""
    s = jnp.sum(stats, axis=0)                                   # fold per-image partials -> (8, C)
    w = jax.nn.softmax(alpha5.astype(jnp.float32))
    mean = s[0::2] * (1.0 / m_count)                             # (4, C)
    var = jnp.maximum(s[1::2] * (1.0 / m_count) - mean * mean, 0.0)
    g = lax.rsqrt(var + BN_EPS)
    b = -mean * g
    if not reduction:                                            # identity op has no BatchNorm
        g = g.at[3].set(1.0)
        b = b.at[3].set(0.0)
    aw = w[1:5].reshape(4, 1)                                    # ZeroOp (index 0) contributes 0
    return jnp.concatenate([aw * g, jnp.sum(aw * b, axis=0, keepdims=True)], axis=0)


def _node_apply(inters, sbs, concat, cc, n, P):
    num_edges = len(inters)
    out_c = num_edges * cc if concat else cc
    in_specs = ([pl.BlockSpec((1, P, 4 * cc), lambda i: (i, 0, 0)) for _ in inters]
                + [pl.BlockSpec((5, cc), lambda i: (0, 0)) for _ in sbs])
    return pl.pallas_call(
        functools.partial(_node_apply_kernel, num_edges=num_edges, cc=cc, concat=concat),
        grid=(n,),
        in_specs=in_specs,
        out_specs=pl.BlockSpec((1, P, out_c), lambda i: (i, 0, 0)),
        out_shape=jax.ShapeDtypeStruct((n, P, out_c), jnp.float32),
        compiler_params=_cparams(("parallel",)),
    )(*inters, *sbs)


# ---------------------------------------------------------------------------
# ChannelFixer: 1x1 conv + BatchNorm(affine=False), left to XLA (tiny; per perf review)
# ---------------------------------------------------------------------------
def channel_fixer(x, w):
    y = jnp.einsum("nhwc,oc->nhwo", x, w[:, :, 0, 0])
    mean = jnp.mean(y, axis=(0, 1, 2), keepdims=True)
    var = jnp.maximum(jnp.mean(y * y, axis=(0, 1, 2), keepdims=True) - mean * mean, 0.0)
    return (y - mean) * lax.rsqrt(var + BN_EPS)


# ---------------------------------------------------------------------------
# Cell graph + forward
# ---------------------------------------------------------------------------
def generate_nodes(cell_nodes):
    starts, ends = [], []
    for s in range(cell_nodes):
        for e in range(s + 1, cell_nodes):
            starts.append(s)
            ends.append(e)
    return starts, ends


def search_reduction_cell_forward(batched_images, alphas, params, cell_nodes):
    """batched_images: NCHW float32; alphas: (num_edges, NUM_OPS). Returns NCHW."""
    starts, ends = generate_nodes(cell_nodes)
    x = jnp.transpose(batched_images, (0, 2, 3, 1)).astype(jnp.float32)   # NCHW -> NHWC
    n, h, w, _ = x.shape
    cc = params["chn_fix"].shape[0]
    ho, wo = h // 2, w // 2
    P = ho * wo

    feats = {0: channel_fixer(x, params["chn_fix"])}
    prep_cache = {}

    def prep(src, reduction):
        key = (src, reduction)
        if key not in prep_cache:
            prep_cache[key] = (_prep_stride2(feats[src]) if reduction
                               else _prep_stride1(feats[src]))
        return prep_cache[key]

    out = None
    for node in range(1, cell_nodes):
        eidxs = [i for i, e in enumerate(ends) if e == node]
        inters, sbs = [], []
        for e in eidxs:
            reduction = e < cell_nodes - 1      # first (num_nodes - 1) edges are ReductionMixedOp
            inter, stats = _edge_pass1(prep(starts[e], reduction), params["edges"][e],
                                       reduction, cc, n, ho, wo)
            inters.append(inter)
            sbs.append(_edge_scale_bias(stats, alphas[e], float(n * P), reduction))
        concat = node == cell_nodes - 1
        y = _node_apply(inters, sbs, concat, cc, n, P)
        if concat:                              # torch.cat(dim=1) == channel concat
            out = jnp.transpose(y.reshape(n, ho, wo, len(eidxs) * cc), (0, 3, 1, 2))
        else:                                   # intermediate node: fused edge sum
            feats[node] = y.reshape(n, ho, wo, cc)
    return out


# ---------------------------------------------------------------------------
# Deterministic parameter init
# ---------------------------------------------------------------------------
def init_params(key, in_channels, channels, cell_nodes):
    c = 2 * channels  # self.channels = channels * 2
    starts, _ = generate_nodes(cell_nodes)
    num_edges = len(starts)
    kit = iter(jax.random.split(key, 4 * num_edges + 2))
    params = {
        "chn_fix": 0.1 * jax.random.normal(next(kit), (c, in_channels, 1, 1), jnp.float32),
        "edges": [],
    }
    for e in range(num_edges):
        p = {"conv": 0.1 * jax.random.normal(next(kit), (c, c, 3, 3), jnp.float32)}
        if e < cell_nodes - 1:  # reduction edges also own FactorizedReduce convs
            p["fr1"] = 0.1 * jax.random.normal(next(kit), (c // 2, c, 1, 1), jnp.float32)
            p["fr2"] = 0.1 * jax.random.normal(next(kit), (c // 2, c, 1, 1), jnp.float32)
        params["edges"].append(p)
    alphas = 0.01 * jax.random.normal(next(kit), (num_edges, NUM_OPS), jnp.float32)
    return params, alphas


if __name__ == "__main__":
    key = jax.random.PRNGKey(0)
    k_in, k_par = jax.random.split(key)

    batch, in_channels, input_dim = 2, 4, 16
    channels, cell_nodes = 8, 4  # cell channels = 16, nodes = 4, edges = 6

    x = jax.random.normal(k_in, (batch, in_channels, input_dim, input_dim), jnp.float32)
    params, alphas = init_params(k_par, in_channels, channels, cell_nodes)

    fwd = jax.jit(functools.partial(search_reduction_cell_forward, cell_nodes=cell_nodes))
    out = fwd(x, alphas, params)
    out = jax.block_until_ready(out)

    # 3 edges feed the last node -> concat gives 3 * (2*channels) channels at half spatial res.
    expected = (batch, 3 * 2 * channels, input_dim // 2, input_dim // 2)
    assert out.shape == expected, (out.shape, expected)
    assert bool(jnp.all(jnp.isfinite(out)))
    print("KERNEL_OK")
</pallas_src>

<mosaic_0001>
module attributes {stable_mosaic.version = 11 : i64} {
  func.func @_edge_pass1_kernel(%arg0: i32, %arg1: memref<1x72x48xf32, #tpu.memory_space<vmem>>, %arg2: memref<1x72x48xf32, #tpu.memory_space<vmem>>, %arg3: memref<9x64x1xf32, #tpu.memory_space<vmem>>, %arg4: memref<3x48x16xbf16, #tpu.memory_space<vmem>>, %arg5: memref<2x16x16xbf16, #tpu.memory_space<vmem>>, %arg6: memref<1x64x64xbf16, #tpu.memory_space<vmem>>, %arg7: memref<1x8x16xf32, #tpu.memory_space<vmem>>) attributes {dimension_semantics = [#tpu.dimension_semantics<parallel>], iteration_bounds = array<i64: 2>, scalar_prefetch = 0 : i64, scratch_operands = 0 : i64, tpu.core_type = #tpu.core_type<tc>, window_params = [{transform_indices = @transform_0, window_bounds = array<i64: 1, 72, 48>}, {transform_indices = @transform_1, window_bounds = array<i64: 1, 72, 48>}, {pipeline_mode = #tpu.pipeline_mode<synchronous>, transform_indices = @transform_2, window_bounds = array<i64: 9, 64, 1>}, {pipeline_mode = #tpu.pipeline_mode<synchronous>, transform_indices = @transform_3, window_bounds = array<i64: 3, 48, 16>}, {pipeline_mode = #tpu.pipeline_mode<synchronous>, transform_indices = @transform_4, window_bounds = array<i64: 2, 16, 16>}, {transform_indices = @transform_5, window_bounds = array<i64: 1, 64, 64>}, {transform_indices = @transform_6, window_bounds = array<i64: 1, 8, 16>}]} {
    %c0 = arith.constant 0 : index
    %c0_0 = arith.constant 0 : index
    %c0_1 = arith.constant 0 : index
    %0 = vector.load %arg1[%c0, %c0_0, %c0_1] : memref<1x72x48xf32, #tpu.memory_space<vmem>>, vector<1x64x48xf32>
    %1 = vector.shape_cast %0 : vector<1x64x48xf32> to vector<64x48xf32>
    %c0_2 = arith.constant 0 : index
    %c0_3 = arith.constant 0 : index
    %c0_4 = arith.constant 0 : index
    %2 = vector.load %arg2[%c0_2, %c0_3, %c0_4] : memref<1x72x48xf32, #tpu.memory_space<vmem>>, vector<1x64x48xf32>
    %3 = vector.shape_cast %2 : vector<1x64x48xf32> to vector<64x48xf32>
    %c0_5 = arith.constant 0 : index
    %c8 = arith.constant 8 : index
    %c0_6 = arith.constant 0 : index
    %4 = vector.load %arg1[%c0_5, %c8, %c0_6] : memref<1x72x48xf32, #tpu.memory_space<vmem>>, vector<1x64x48xf32>
    %5 = vector.shape_cast %4 : vector<1x64x48xf32> to vector<64x48xf32>
    %6 = arith.truncf %1 : vector<64x48xf32> to vector<64x48xbf16>
    %c0_7 = arith.constant 0 : index
    %c0_8 = arith.constant 0 : index
    %c0_9 = arith.constant 0 : index
    %7 = vector.load %arg4[%c0_7, %c0_8, %c0_9] : memref<3x48x16xbf16, #tpu.memory_space<vmem>>, vector<1x48x16xbf16>
    %8 = vector.shape_cast %7 : vector<1x48x16xbf16> to vector<48x16xbf16>
    %cst = arith.constant dense<0.000000e+00> : vector<64x16xf32>
    %9 = tpu.matmul %6, %8, %cst {dimension_numbers = #tpu.dot_dimension_numbers<[1], [0], [0], [1], [0, 0, 1, 1], [], []>} : vector<64x48xbf16>, vector<48x16xbf16>, vector<64x16xf32> -> vector<64x16xf32>
    %10 = arith.truncf %3 : vector<64x48xf32> to vector<64x48xbf16>
    %c1 = arith.constant 1 : index
    %c0_10 = arith.constant 0 : index
    %c0_11 = arith.constant 0 : index
    %11 = vector.load %arg4[%c1, %c0_10, %c0_11] : memref<3x48x16xbf16, #tpu.memory_space<vmem>>, vector<1x48x16xbf16>
    %12 = vector.shape_cast %11 : vector<1x48x16xbf16> to vector<48x16xbf16>
    %cst_12 = arith.constant dense<0.000000e+00> : vector<64x16xf32>
    %13 = tpu.matmul %10, %12, %cst_12 {dimension_numbers = #tpu.dot_dimension_numbers<[1], [0], [0], [1], [0, 0, 1, 1], [], []>} : vector<64x48xbf16>, vector<48x16xbf16>, vector<64x16xf32> -> vector<64x16xf32>
    %14 = arith.addf %9, %13 : vector<64x16xf32>
    %15 = arith.truncf %5 : vector<64x48xf32> to vector<64x48xbf16>
    %c2 = arith.constant 2 : index
    %c0_13 = arith.constant 0 : index
    %c0_14 = arith.constant 0 : index
    %16 = vector.load %arg4[%c2, %c0_13, %c0_14] : memref<3x48x16xbf16, #tpu.memory_space<vmem>>, vector<1x48x16xbf16>
    %17 = vector.shape_cast %16 : vector<1x48x16xbf16> to vector<48x16xbf16>
    %cst_15 = arith.constant dense<0.000000e+00> : vector<64x16xf32>
    %18 = tpu.matmul %15, %17, %cst_15 {dimension_numbers = #tpu.dot_dimension_numbers<[1], [0], [0], [1], [0, 0, 1, 1], [], []>} : vector<64x48xbf16>, vector<48x16xbf16>, vector<64x16xf32> -> vector<64x16xf32>
    %19 = arith.addf %14, %18 : vector<64x16xf32>
    %20 = vector.extract_strided_slice %1 {offsets = [0, 0], sizes = [64, 16], strides = [1, 1]} : vector<64x48xf32> to vector<64x16xf32>
    %c0_16 = arith.constant 0 : index
    %c0_17 = arith.constant 0 : index
    %c0_18 = arith.constant 0 : index
    %21 = vector.load %arg3[%c0_16, %c0_17, %c0_18] : memref<9x64x1xf32, #tpu.memory_space<vmem>>, vector<1x64x1xf32>
    %22 = vector.shape_cast %21 : vector<1x64x1xf32> to vector<64x1xf32>
    %23 = vector.broadcast %22 : vector<64x1xf32> to vector<64x16xf32>
    %24 = arith.addf %20, %23 : vector<64x16xf32>
    %25 = vector.extract_strided_slice %1 {offsets = [0, 16], sizes = [64, 16], strides = [1, 1]} : vector<64x48xf32> to vector<64x16xf32>
    %c1_19 = arith.constant 1 : index
    %c0_20 = arith.constant 0 : index
    %c0_21 = arith.constant 0 : index
    %26 = vector.load %arg3[%c1_19, %c0_20, %c0_21] : memref<9x64x1xf32, #tpu.memory_space<vmem>>, vector<1x64x1xf32>
    %27 = vector.shape_cast %26 : vector<1x64x1xf32> to vector<64x1xf32>
    %28 = vector.broadcast %27 : vector<64x1xf32> to vector<64x16xf32>
    %29 = arith.addf %25, %28 : vector<64x16xf32>
    %30 = arith.maximumf %24, %29 : vector<64x16xf32>
    %31 = vector.extract_strided_slice %1 {offsets = [0, 32], sizes = [64, 16], strides = [1, 1]} : vector<64x48xf32> to vector<64x16xf32>
    %c2_22 = arith.constant 2 : index
    %c0_23 = arith.constant 0 : index
    %c0_24 = arith.constant 0 : index
    %32 = vector.load %arg3[%c2_22, %c0_23, %c0_24] : memref<9x64x1xf32, #tpu.memory_space<vmem>>, vector<1x64x1xf32>
    %33 = vector.shape_cast %32 : vector<1x64x1xf32> to vector<64x1xf32>
    %34 = vector.broadcast %33 : vector<64x1xf32> to vector<64x16xf32>
    %35 = arith.addf %31, %34 : vector<64x16xf32>
    %36 = arith.maximumf %30, %35 : vector<64x16xf32>
    %37 = vector.extract_strided_slice %3 {offsets = [0, 0], sizes = [64, 16], strides = [1, 1]} : vector<64x48xf32> to vector<64x16xf32>
    %c3 = arith.constant 3 : index
    %c0_25 = arith.constant 0 : index
    %c0_26 = arith.constant 0 : index
    %38 = vector.load %arg3[%c3, %c0_25, %c0_26] : memref<9x64x1xf32, #tpu.memory_space<vmem>>, vector<1x64x1xf32>
    %39 = vector.shape_cast %38 : vector<1x64x1xf32> to vector<64x1xf32>
    %40 = vector.broadcast %39 : vector<64x1xf32> to vector<64x16xf32>
    %41 = arith.addf %37, %40 : vector<64x16xf32>
    %42 = arith.maximumf %36, %41 : vector<64x16xf32>
    %43 = vector.extract_strided_slice %3 {offsets = [0, 16], sizes = [64, 16], strides = [1, 1]} : vector<64x48xf32> to vector<64x16xf32>
    %c4 = arith.constant 4 : index
    %c0_27 = arith.constant 0 : index
    %c0_28 = arith.constant 0 : index
    %44 = vector.load %arg3[%c4, %c0_27, %c0_28] : memref<9x64x1xf32, #tpu.memory_space<vmem>>, vector<1x64x1xf32>
    %45 = vector.shape_cast %44 : vector<1x64x1xf32> to vector<64x1xf32>
    %46 = vector.broadcast %45 : vector<64x1xf32> to vector<64x16xf32>
    %47 = arith.addf %43, %46 : vector<64x16xf32>
    %48 = arith.maximumf %42, %47 : vector<64x16xf32>
    %49 = vector.extract_strided_slice %3 {offsets = [0, 32], sizes = [64, 16], strides = [1, 1]} : vector<64x48xf32> to vector<64x16xf32>
    %c5 = arith.constant 5 : index
    %c0_29 = arith.constant 0 : index
    %c0_30 = arith.constant 0 : index
    %50 = vector.load %arg3[%c5, %c0_29, %c0_30] : memref<9x64x1xf32, #tpu.memory_space<vmem>>, vector<1x64x1xf32>
    %51 = vector.shape_cast %50 : vector<1x64x1xf32> to vector<64x1xf32>
    %52 = vector.broadcast %51 : vector<64x1xf32> to vector<64x16xf32>
    %53 = arith.addf %49, %52 : vector<64x16xf32>
    %54 = arith.maximumf %48, %53 : vector<64x16xf32>
    %55 = vector.extract_strided_slice %5 {offsets = [0, 0], sizes = [64, 16], strides = [1, 1]} : vector<64x48xf32> to vector<64x16xf32>
    %c6 = arith.constant 6 : index
    %c0_31 = arith.constant 0 : index
    %c0_32 = arith.constant 0 : index
    %56 = vector.load %arg3[%c6, %c0_31, %c0_32] : memref<9x64x1xf32, #tpu.memory_space<vmem>>, vector<1x64x1xf32>
    %57 = vector.shape_cast %56 : vector<1x64x1xf32> to vector<64x1xf32>
    %58 = vector.broadcast %57 : vector<64x1xf32> to vector<64x16xf32>
    %59 = arith.addf %55, %58 : vector<64x16xf32>
    %60 = arith.maximumf %54, %59 : vector<64x16xf32>
    %61 = vector.extract_strided_slice %5 {offsets = [0, 16], sizes = [64, 16], strides = [1, 1]} : vector<64x48xf32> to vector<64x16xf32>
    %c7 = arith.constant 7 : index
    %c0_33 = arith.constant 0 : index
    %c0_34 = arith.constant 0 : index
    %62 = vector.load %arg3[%c7, %c0_33, %c0_34] : memref<9x64x1xf32, #tpu.memory_space<vmem>>, vector<1x64x1xf32>
    %63 = vector.shape_cast %62 : vector<1x64x1xf32> to vector<64x1xf32>
    %64 = vector.broadcast %63 : vector<64x1xf32> to vector<64x16xf32>
    %65 = arith.addf %61, %64 : vector<64x16xf32>
    %66 = arith.maximumf %60, %65 : vector<64x16xf32>
    %67 = vector.extract_strided_slice %5 {offsets = [0, 32], sizes = [64, 16], strides = [1, 1]} : vector<64x48xf32> to vector<64x16xf32>
    %c8_35 = arith.constant 8 : index
    %c0_36 = arith.constant 0 : index
    %c0_37 = arith.constant 0 : index
    %68 = vector.load %arg3[%c8_35, %c0_36, %c0_37] : memref<9x64x1xf32, #tpu.memory_space<vmem>>, vector<1x64x1xf32>
    %69 = vector.shape_cast %68 : vector<1x64x1xf32> to vector<64x1xf32>
    %70 = vector.broadcast %69 : vector<64x1xf32> to vector<64x16xf32>
    %71 = arith.addf %67, %70 : vector<64x16xf32>
    %72 = arith.maximumf %66, %71 : vector<64x16xf32>
    %73 = arith.addf %1, %3 : vector<64x48xf32>
    %74 = arith.addf %73, %5 : vector<64x48xf32>
    %75 = vector.extract_strided_slice %74 {offsets = [0, 0], sizes = [64, 16], strides = [1, 1]} : vector<64x48xf32> to vector<64x16xf32>
    %76 = vector.extract_strided_slice %74 {offsets = [0, 16], sizes = [64, 16], strides = [1, 1]} : vector<64x48xf32> to vector<64x16xf32>
    %77 = arith.addf %75, %76 : vector<64x16xf32>
    %78 = vector.extract_strided_slice %74 {offsets = [0, 32], sizes = [64, 16], strides = [1, 1]} : vector<64x48xf32> to vector<64x16xf32>
    %79 = arith.addf %77, %78 : vector<64x16xf32>
    %cst_38 = arith.constant 0.111111112 : f32
    %80 = vector.broadcast %cst_38 : f32 to vector<64x16xf32>
    %81 = arith.mulf %79, %80 : vector<64x16xf32>
    %82 = vector.extract_strided_slice %3 {offsets = [0, 16], sizes = [64, 16], strides = [1, 1]} : vector<64x48xf32> to vector<64x16xf32>
    %cst_39 = arith.constant 0.000000e+00 : f32
    %83 = vector.broadcast %cst_39 : f32 to vector<64x16xf32>
    %84 = arith.maximumf %82, %83 : vector<64x16xf32>
    %85 = arith.truncf %84 : vector<64x16xf32> to vector<64x16xbf16>
    %86 = vector.extract_strided_slice %5 {offsets = [0, 32], sizes = [64, 16], strides = [1, 1]} : vector<64x48xf32> to vector<64x16xf32>
    %cst_40 = arith.constant 0.000000e+00 : f32
    %87 = vector.broadcast %cst_40 : f32 to vector<64x16xf32>
    %88 = arith.maximumf %86, %87 : vector<64x16xf32>
    %89 = arith.truncf %88 : vector<64x16xf32> to vector<64x16xbf16>
    %c0_41 = arith.constant 0 : index
    %c0_42 = arith.constant 0 : index
    %c0_43 = arith.constant 0 : index
    %90 = vector.load %arg5[%c0_41, %c0_42, %c0_43] : memref<2x16x16xbf16, #tpu.memory_space<vmem>>, vector<1x16x16xbf16>
    %91 = vector.shape_cast %90 : vector<1x16x16xbf16> to vector<16x16xbf16>
    %cst_44 = arith.constant dense<0.000000e+00> : vector<64x16xf32>
    %92 = tpu.matmul %85, %91, %cst_44 {dimension_numbers = #tpu.dot_dimension_numbers<[1], [0], [0], [1], [0, 0, 1, 1], [], []>} : vector<64x16xbf16>, vector<16x16xbf16>, vector<64x16xf32> -> vector<64x16xf32>
    %c1_45 = arith.constant 1 : index
    %c0_46 = arith.constant 0 : index
    %c0_47 = arith.constant 0 : index
    %93 = vector.load %arg5[%c1_45, %c0_46, %c0_47] : memref<2x16x16xbf16, #tpu.memory_space<vmem>>, vector<1x16x16xbf16>
    %94 = vector.shape_cast %93 : vector<1x16x16xbf16> to vector<16x16xbf16>
    %cst_48 = arith.constant dense<0.000000e+00> : vector<64x16xf32>
    %95 = tpu.matmul %89, %94, %cst_48 {dimension_numbers = #tpu.dot_dimension_numbers<[1], [0], [0], [1], [0, 0, 1, 1], [], []>} : vector<64x16xbf16>, vector<16x16xbf16>, vector<64x16xf32> -> vector<64x16xf32>
    %96 = arith.addf %92, %95 : vector<64x16xf32>
    %cst_49 = arith.constant dense<0.000000e+00> : vector<16xf32>
    %97 = vector.multi_reduction <add>, %72, %cst_49 [0] : vector<64x16xf32> to vector<16xf32>
    %98 = vector.shape_cast %97 : vector<16xf32> to vector<1x16xf32>
    %99 = arith.mulf %72, %72 : vector<64x16xf32>
    %cst_50 = arith.constant dense<0.000000e+00> : vector<16xf32>
    %100 = vector.multi_reduction <add>, %99, %cst_50 [0] : vector<64x16xf32> to vector<16xf32>
    %101 = vector.shape_cast %100 : vector<16xf32> to vector<1x16xf32>
    %cst_51 = arith.constant dense<0.000000e+00> : vector<16xf32>
    %102 = vector.multi_reduction <add>, %81, %cst_51 [0] : vector<64x16xf32> to vector<16xf32>
    %103 = vector.shape_cast %102 : vector<16xf32> to vector<1x16xf32>
    %104 = arith.mulf %81, %81 : vector<64x16xf32>
    %cst_52 = arith.constant dense<0.000000e+00> : vector<16xf32>
    %105 = vector.multi_reduction <add>, %104, %cst_52 [0] : vector<64x16xf32> to vector<16xf32>
    %106 = vector.shape_cast %105 : vector<16xf32> to vector<1x16xf32>
    %cst_53 = arith.constant dense<0.000000e+00> : vector<16xf32>
    %107 = vector.multi_reduction <add>, %19, %cst_53 [0] : vector<64x16xf32> to vector<16xf32>
    %108 = vector.shape_cast %107 : vector<16xf32> to vector<1x16xf32>
    %109 = arith.mulf %19, %19 : vector<64x16xf32>
    %cst_54 = arith.constant dense<0.000000e+00> : vector<16xf32>
    %110 = vector.multi_reduction <add>, %109, %cst_54 [0] : vector<64x16xf32> to vector<16xf32>
    %111 = vector.shape_cast %110 : vector<16xf32> to vector<1x16xf32>
    %cst_55 = arith.constant dense<0.000000e+00> : vector<16xf32>
    %112 = vector.multi_reduction <add>, %96, %cst_55 [0] : vector<64x16xf32> to vector<16xf32>
    %113 = vector.shape_cast %112 : vector<16xf32> to vector<1x16xf32>
    %114 = arith.mulf %96, %96 : vector<64x16xf32>
    %cst_56 = arith.constant dense<0.000000e+00> : vector<16xf32>
    %115 = vector.multi_reduction <add>, %114, %cst_56 [0] : vector<64x16xf32> to vector<16xf32>
    %116 = vector.shape_cast %115 : vector<16xf32> to vector<1x16xf32>
    %117 = tpu.concatenate %98, %101, %103, %106, %108, %111, %113, %116 in 0 : vector<1x16xf32>, vector<1x16xf32>, vector<1x16xf32>, vector<1x16xf32>, vector<1x16xf32>, vector<1x16xf32>, vector<1x16xf32>, vector<1x16xf32> -> vector<8x16xf32>
    %c0_57 = arith.constant 0 : index
    %c0_58 = arith.constant 0 : index
    %c0_59 = arith.constant 0 : index
    %118 = vector.load %arg7[%c0_57, %c0_58, %c0_59] : memref<1x8x16xf32, #tpu.memory_space<vmem>>, vector<1x8x16xf32>
    %119 = vector.shape_cast %118 : vector<1x8x16xf32> to vector<8x16xf32>
    %120 = vector.shape_cast %117 : vector<8x16xf32> to vector<1x8x16xf32>
    tpu.vector_store %arg7[%c0_57, %c0_58, %c0_59], %120 {strides = array<i32>} : memref<1x8x16xf32, #tpu.memory_space<vmem>>, vector<1x8x16xf32>,
    %121 = arith.truncf %72 : vector<64x16xf32> to vector<64x16xbf16>
    %122 = arith.truncf %81 : vector<64x16xf32> to vector<64x16xbf16>
    %123 = arith.truncf %19 : vector<64x16xf32> to vector<64x16xbf16>
    %124 = arith.truncf %96 : vector<64x16xf32> to vector<64x16xbf16>
    %125 = tpu.concatenate %121, %122, %123, %124 in 1 : vector<64x16xbf16>, vector<64x16xbf16>, vector<64x16xbf16>, vector<64x16xbf16> -> vector<64x64xbf16>
    %c0_60 = arith.constant 0 : index
    %c0_61 = arith.constant 0 : index
    %c0_62 = arith.constant 0 : index
    %126 = vector.load %arg6[%c0_60, %c0_61, %c0_62] : memref<1x64x64xbf16, #tpu.memory_space<vmem>>, vector<1x64x64xbf16>
    %127 = vector.shape_cast %126 : vector<1x64x64xbf16> to vector<64x64xbf16>
    %128 = vector.shape_cast %125 : vector<64x64xbf16> to vector<1x64x64xbf16>
    tpu.vector_store %arg6[%c0_60, %c0_61, %c0_62], %128 {strides = array<i32>} : memref<1x64x64xbf16, #tpu.memory_space<vmem>>, vector<1x64x64xbf16>,
    return
  }
  func.func @transform_0(%arg0: i32) -> (i32, i32, i32) {
    %c0_i32 = arith.constant 0 : i32
    %c0_i32_0 = arith.constant 0 : i32
    %c0_i32_1 = arith.constant 0 : i32
    return %arg0, %c0_i32, %c0_i32_0 : i32, i32, i32
  }
  func.func @transform_1(%arg0: i32) -> (i32, i32, i32) {
    %c0_i32 = arith.constant 0 : i32
    %c0_i32_0 = arith.constant 0 : i32
    %c0_i32_1 = arith.constant 0 : i32
    return %arg0, %c0_i32, %c0_i32_0 : i32, i32, i32
  }
  func.func @transform_2(%arg0: i32) -> (i32, i32, i32) {
    %c0_i32 = arith.constant 0 : i32
    %c0_i32_0 = arith.constant 0 : i32
    %c0_i32_1 = arith.constant 0 : i32
    %c0_i32_2 = arith.constant 0 : i32
    return %c0_i32, %c0_i32_0, %c0_i32_1 : i32, i32, i32
  }
  func.func @transform_3(%arg0: i32) -> (i32, i32, i32) {
    %c0_i32 = arith.constant 0 : i32
    %c0_i32_0 = arith.constant 0 : i32
    %c0_i32_1 = arith.constant 0 : i32
    %c0_i32_2 = arith.constant 0 : i32
    return %c0_i32, %c0_i32_0, %c0_i32_1 : i32, i32, i32
  }
  func.func @transform_4(%arg0: i32) -> (i32, i32, i32) {
    %c0_i32 = arith.constant 0 : i32
    %c0_i32_0 = arith.constant 0 : i32
    %c0_i32_1 = arith.constant 0 : i32
    %c0_i32_2 = arith.constant 0 : i32
    return %c0_i32, %c0_i32_0, %c0_i32_1 : i32, i32, i32
  }
  func.func @transform_5(%arg0: i32) -> (i32, i32, i32) {
    %c0_i32 = arith.constant 0 : i32
    %c0_i32_0 = arith.constant 0 : i32
    %c0_i32_1 = arith.constant 0 : i32
    return %arg0, %c0_i32, %c0_i32_0 : i32, i32, i32
  }
  func.func @transform_6(%arg0: i32) -> (i32, i32, i32) {
    %c0_i32 = arith.constant 0 : i32
    %c0_i32_0 = arith.constant 0 : i32
    %c0_i32_1 = arith.constant 0 : i32
    return %arg0, %c0_i32, %c0_i32_0 : i32, i32, i32
  }
}

module attributes {stable_mosaic.version = 11 : i64} {
  func.func @_node_apply_kernel(%arg0: i32, %arg1: memref<1x64x64xbf16, #tpu.memory_space<vmem>>, %arg2: memref<5x16xf32, #tpu.memory_space<vmem>>, %arg3: memref<1x64x16xf32, #tpu.memory_space<vmem>>) attributes {dimension_semantics = [#tpu.dimension_semantics<parallel>], iteration_bounds = array<i64: 2>, scalar_prefetch = 0 : i64, scratch_operands = 0 : i64, tpu.core_type = #tpu.core_type<tc>, window_params = [{transform_indices = @transform_0, window_bounds = array<i64: 1, 64, 64>}, {pipeline_mode = #tpu.pipeline_mode<synchronous>, transform_indices = @transform_1, window_bounds = array<i64: 5, 16>}, {transform_indices = @transform_2, window_bounds = array<i64: 1, 64, 16>}]} {
    %c0 = arith.constant 0 : index
    %c0_0 = arith.constant 0 : index
    %c0_1 = arith.constant 0 : index
    %0 = vector.load %arg1[%c0, %c0_0, %c0_1] : memref<1x64x64xbf16, #tpu.memory_space<vmem>>, vector<1x64x64xbf16>
    %1 = vector.shape_cast %0 : vector<1x64x64xbf16> to vector<64x64xbf16>
    %c0_2 = arith.constant 0 : index
    %c0_3 = arith.constant 0 : index
    %2 = vector.load %arg2[%c0_2, %c0_3] : memref<5x16xf32, #tpu.memory_space<vmem>>, vector<5x16xf32>
    %3 = vector.extract_strided_slice %1 {offsets = [0, 0], sizes = [64, 16], strides = [1, 1]} : vector<64x64xbf16> to vector<64x16xbf16>
    %4 = arith.extf %3 : vector<64x16xbf16> to vector<64x16xf32>
    %5 = vector.extract_strided_slice %2 {offsets = [0, 0], sizes = [1, 16], strides = [1, 1]} : vector<5x16xf32> to vector<1x16xf32>
    %6 = vector.broadcast %5 : vector<1x16xf32> to vector<64x16xf32>
    %7 = arith.mulf %4, %6 : vector<64x16xf32>
    %8 = vector.extract_strided_slice %1 {offsets = [0, 16], sizes = [64, 16], strides = [1, 1]} : vector<64x64xbf16> to vector<64x16xbf16>
    %9 = arith.extf %8 : vector<64x16xbf16> to vector<64x16xf32>
    %10 = vector.extract_strided_slice %2 {offsets = [1, 0], sizes = [1, 16], strides = [1, 1]} : vector<5x16xf32> to vector<1x16xf32>
    %11 = vector.broadcast %10 : vector<1x16xf32> to vector<64x16xf32>
    %12 = arith.mulf %9, %11 : vector<64x16xf32>
    %13 = arith.addf %7, %12 : vector<64x16xf32>
    %14 = vector.extract_strided_slice %1 {offsets = [0, 32], sizes = [64, 16], strides = [1, 1]} : vector<64x64xbf16> to vector<64x16xbf16>
    %15 = arith.extf %14 : vector<64x16xbf16> to vector<64x16xf32>
    %16 = vector.extract_strided_slice %2 {offsets = [2, 0], sizes = [1, 16], strides = [1, 1]} : vector<5x16xf32> to vector<1x16xf32>
    %17 = vector.broadcast %16 : vector<1x16xf32> to vector<64x16xf32>
    %18 = arith.mulf %15, %17 : vector<64x16xf32>
    %19 = arith.addf %13, %18 : vector<64x16xf32>
    %20 = vector.extract_strided_slice %1 {offsets = [0, 48], sizes = [64, 16], strides = [1, 1]} : vector<64x64xbf16> to vector<64x16xbf16>
    %21 = arith.extf %20 : vector<64x16xbf16> to vector<64x16xf32>
    %22 = vector.extract_strided_slice %2 {offsets = [3, 0], sizes = [1, 16], strides = [1, 1]} : vector<5x16xf32> to vector<1x16xf32>
    %23 = vector.broadcast %22 : vector<1x16xf32> to vector<64x16xf32>
    %24 = arith.mulf %21, %23 : vector<64x16xf32>
    %25 = arith.addf %19, %24 : vector<64x16xf32>
    %26 = vector.extract_strided_slice %2 {offsets = [4, 0], sizes = [1, 16], strides = [1, 1]} : vector<5x16xf32> to vector<1x16xf32>
    %27 = vector.broadcast %26 : vector<1x16xf32> to vector<64x16xf32>
    %28 = arith.addf %25, %27 : vector<64x16xf32>
    %c0_4 = arith.constant 0 : index
    %c0_5 = arith.constant 0 : index
    %c0_6 = arith.constant 0 : index
    %29 = vector.load %arg3[%c0_4, %c0_5, %c0_6] : memref<1x64x16xf32, #tpu.memory_space<vmem>>, vector<1x64x16xf32>
    %30 = vector.shape_cast %29 : vector<1x64x16xf32> to vector<64x16xf32>
    %31 = vector.shape_cast %28 : vector<64x16xf32> to vector<1x64x16xf32>
    tpu.vector_store %arg3[%c0_4, %c0_5, %c0_6], %31 {strides = array<i32>} : memref<1x64x16xf32, #tpu.memory_space<vmem>>, vector<1x64x16xf32>,
    return
  }
  func.func @transform_0(%arg0: i32) -> (i32, i32, i32) {
    %c0_i32 = arith.constant 0 : i32
    %c0_i32_0 = arith.constant 0 : i32
    %c0_i32_1 = arith.constant 0 : i32
    return %arg0, %c0_i32, %c0_i32_0 : i32, i32, i32
  }
  func.func @transform_1(%arg0: i32) -> (i32, i32) {
    %c0_i32 = arith.constant 0 : i32
    %c0_i32_0 = arith.constant 0 : i32
    %c0_i32_1 = arith.constant 0 : i32
    return %c0_i32, %c0_i32_0 : i32, i32
  }
  func.func @transform_2(%arg0: i32) -> (i32, i32, i32) {
    %c0_i32 = arith.constant 0 : i32
    %c0_i32_0 = arith.constant 0 : i32
    %c0_i32_1 = arith.constant 0 : i32
    return %arg0, %c0_i32, %c0_i32_0 : i32, i32, i32
  }
}

module attributes {stable_mosaic.version = 11 : i64} {
  func.func @_edge_pass1_kernel(%arg0: i32, %arg1: memref<1x80x48xf32, #tpu.memory_space<vmem>>, %arg2: memref<9x64x1xf32, #tpu.memory_space<vmem>>, %arg3: memref<3x48x16xbf16, #tpu.memory_space<vmem>>, %arg4: memref<1x64x64xbf16, #tpu.memory_space<vmem>>, %arg5: memref<1x8x16xf32, #tpu.memory_space<vmem>>) attributes {dimension_semantics = [#tpu.dimension_semantics<parallel>], iteration_bounds = array<i64: 2>, scalar_prefetch = 0 : i64, scratch_operands = 0 : i64, tpu.core_type = #tpu.core_type<tc>, window_params = [{transform_indices = @transform_0, window_bounds = array<i64: 1, 80, 48>}, {pipeline_mode = #tpu.pipeline_mode<synchronous>, transform_indices = @transform_1, window_bounds = array<i64: 9, 64, 1>}, {pipeline_mode = #tpu.pipeline_mode<synchronous>, transform_indices = @transform_2, window_bounds = array<i64: 3, 48, 16>}, {transform_indices = @transform_3, window_bounds = array<i64: 1, 64, 64>}, {transform_indices = @transform_4, window_bounds = array<i64: 1, 8, 16>}]} {
    %c0 = arith.constant 0 : index
    %c0_0 = arith.constant 0 : index
    %c0_1 = arith.constant 0 : index
    %0 = vector.load %arg1[%c0, %c0_0, %c0_1] : memref<1x80x48xf32, #tpu.memory_space<vmem>>, vector<1x64x48xf32>
    %1 = vector.shape_cast %0 : vector<1x64x48xf32> to vector<64x48xf32>
    %c0_2 = arith.constant 0 : index
    %c8 = arith.constant 8 : index
    %c0_3 = arith.constant 0 : index
    %2 = vector.load %arg1[%c0_2, %c8, %c0_3] : memref<1x80x48xf32, #tpu.memory_space<vmem>>, vector<1x64x48xf32>
    %3 = vector.shape_cast %2 : vector<1x64x48xf32> to vector<64x48xf32>
    %c0_4 = arith.constant 0 : index
    %c16 = arith.constant 16 : index
    %c0_5 = arith.constant 0 : index
    %4 = vector.load %arg1[%c0_4, %c16, %c0_5] : memref<1x80x48xf32, #tpu.memory_space<vmem>>, vector<1x64x48xf32>
    %5 = vector.shape_cast %4 : vector<1x64x48xf32> to vector<64x48xf32>
    %6 = arith.truncf %1 : vector<64x48xf32> to vector<64x48xbf16>
    %c0_6 = arith.constant 0 : index
    %c0_7 = arith.constant 0 : index
    %c0_8 = arith.constant 0 : index
    %7 = vector.load %arg3[%c0_6, %c0_7, %c0_8] : memref<3x48x16xbf16, #tpu.memory_space<vmem>>, vector<1x48x16xbf16>
    %8 = vector.shape_cast %7 : vector<1x48x16xbf16> to vector<48x16xbf16>
    %cst = arith.constant dense<0.000000e+00> : vector<64x16xf32>
    %9 = tpu.matmul %6, %8, %cst {dimension_numbers = #tpu.dot_dimension_numbers<[1], [0], [0], [1], [0, 0, 1, 1], [], []>} : vector<64x48xbf16>, vector<48x16xbf16>, vector<64x16xf32> -> vector<64x16xf32>
    %10 = arith.truncf %3 : vector<64x48xf32> to vector<64x48xbf16>
    %c1 = arith.constant 1 : index
    %c0_9 = arith.constant 0 : index
    %c0_10 = arith.constant 0 : index
    %11 = vector.load %arg3[%c1, %c0_9, %c0_10] : memref<3x48x16xbf16, #tpu.memory_space<vmem>>, vector<1x48x16xbf16>
    %12 = vector.shape_cast %11 : vector<1x48x16xbf16> to vector<48x16xbf16>
    %cst_11 = arith.constant dense<0.000000e+00> : vector<64x16xf32>
    %13 = tpu.matmul %10, %12, %cst_11 {dimension_numbers = #tpu.dot_dimension_numbers<[1], [0], [0], [1], [0, 0, 1, 1], [], []>} : vector<64x48xbf16>, vector<48x16xbf16>, vector<64x16xf32> -> vector<64x16xf32>
    %14 = arith.addf %9, %13 : vector<64x16xf32>
    %15 = arith.truncf %5 : vector<64x48xf32> to vector<64x48xbf16>
    %c2 = arith.constant 2 : index
    %c0_12 = arith.constant 0 : index
    %c0_13 = arith.constant 0 : index
    %16 = vector.load %arg3[%c2, %c0_12, %c0_13] : memref<3x48x16xbf16, #tpu.memory_space<vmem>>, vector<1x48x16xbf16>
    %17 = vector.shape_cast %16 : vector<1x48x16xbf16> to vector<48x16xbf16>
    %cst_14 = arith.constant dense<0.000000e+00> : vector<64x16xf32>
    %18 = tpu.matmul %15, %17, %cst_14 {dimension_numbers = #tpu.dot_dimension_numbers<[1], [0], [0], [1], [0, 0, 1, 1], [], []>} : vector<64x48xbf16>, vector<48x16xbf16>, vector<64x16xf32> -> vector<64x16xf32>
    %19 = arith.addf %14, %18 : vector<64x16xf32>
    %20 = vector.extract_strided_slice %1 {offsets = [0, 0], sizes = [64, 16], strides = [1, 1]} : vector<64x48xf32> to vector<64x16xf32>
    %c0_15 = arith.constant 0 : index
    %c0_16 = arith.constant 0 : index
    %c0_17 = arith.constant 0 : index
    %21 = vector.load %arg2[%c0_15, %c0_16, %c0_17] : memref<9x64x1xf32, #tpu.memory_space<vmem>>, vector<1x64x1xf32>
    %22 = vector.shape_cast %21 : vector<1x64x1xf32> to vector<64x1xf32>
    %23 = vector.broadcast %22 : vector<64x1xf32> to vector<64x16xf32>
    %24 = arith.addf %20, %23 : vector<64x16xf32>
    %25 = vector.extract_strided_slice %1 {offsets = [0, 16], sizes = [64, 16], strides = [1, 1]} : vector<64x48xf32> to vector<64x16xf32>
    %c1_18 = arith.constant 1 : index
    %c0_19 = arith.constant 0 : index
    %c0_20 = arith.constant 0 : index
    %26 = vector.load %arg2[%c1_18, %c0_19, %c0_20] : memref<9x64x1xf32, #tpu.memory_space<vmem>>, vector<1x64x1xf32>
    %27 = vector.shape_cast %26 : vector<1x64x1xf32> to vector<64x1xf32>
    %28 = vector.broadcast %27 : vector<64x1xf32> to vector<64x16xf32>
    %29 = arith.addf %25, %28 : vector<64x16xf32>
    %30 = arith.maximumf %24, %29 : vector<64x16xf32>
    %31 = vector.extract_strided_slice %1 {offsets = [0, 32], sizes = [64, 16], strides = [1, 1]} : vector<64x48xf32> to vector<64x16xf32>
    %c2_21 = arith.constant 2 : index
    %c0_22 = arith.constant 0 : index
    %c0_23 = arith.constant 0 : index
    %32 = vector.load %arg2[%c2_21, %c0_22, %c0_23] : memref<9x64x1xf32, #tpu.memory_space<vmem>>, vector<1x64x1xf32>
    %33 = vector.shape_cast %32 : vector<1x64x1xf32> to vector<64x1xf32>
    %34 = vector.broadcast %33 : vector<64x1xf32> to vector<64x16xf32>
    %35 = arith.addf %31, %34 : vector<64x16xf32>
    %36 = arith.maximumf %30, %35 : vector<64x16xf32>
    %37 = vector.extract_strided_slice %3 {offsets = [0, 0], sizes = [64, 16], strides = [1, 1]} : vector<64x48xf32> to vector<64x16xf32>
    %c3 = arith.constant 3 : index
    %c0_24 = arith.constant 0 : index
    %c0_25 = arith.constant 0 : index
    %38 = vector.load %arg2[%c3, %c0_24, %c0_25] : memref<9x64x1xf32, #tpu.memory_space<vmem>>, vector<1x64x1xf32>
    %39 = vector.shape_cast %38 : vector<1x64x1xf32> to vector<64x1xf32>
    %40 = vector.broadcast %39 : vector<64x1xf32> to vector<64x16xf32>
    %41 = arith.addf %37, %40 : vector<64x16xf32>
    %42 = arith.maximumf %36, %41 : vector<64x16xf32>
    %43 = vector.extract_strided_slice %3 {offsets = [0, 16], sizes = [64, 16], strides = [1, 1]} : vector<64x48xf32> to vector<64x16xf32>
    %c4 = arith.constant 4 : index
    %c0_26 = arith.constant 0 : index
    %c0_27 = arith.constant 0 : index
    %44 = vector.load %arg2[%c4, %c0_26, %c0_27] : memref<9x64x1xf32, #tpu.memory_space<vmem>>, vector<1x64x1xf32>
    %45 = vector.shape_cast %44 : vector<1x64x1xf32> to vector<64x1xf32>
    %46 = vector.broadcast %45 : vector<64x1xf32> to vector<64x16xf32>
    %47 = arith.addf %43, %46 : vector<64x16xf32>
    %48 = arith.maximumf %42, %47 : vector<64x16xf32>
    %49 = vector.extract_strided_slice %3 {offsets = [0, 32], sizes = [64, 16], strides = [1, 1]} : vector<64x48xf32> to vector<64x16xf32>
    %c5 = arith.constant 5 : index
    %c0_28 = arith.constant 0 : index
    %c0_29 = arith.constant 0 : index
    %50 = vector.load %arg2[%c5, %c0_28, %c0_29] : memref<9x64x1xf32, #tpu.memory_space<vmem>>, vector<1x64x1xf32>
    %51 = vector.shape_cast %50 : vector<1x64x1xf32> to vector<64x1xf32>
    %52 = vector.broadcast %51 : vector<64x1xf32> to vector<64x16xf32>
    %53 = arith.addf %49, %52 : vector<64x16xf32>
    %54 = arith.maximumf %48, %53 : vector<64x16xf32>
    %55 = vector.extract_strided_slice %5 {offsets = [0, 0], sizes = [64, 16], strides = [1, 1]} : vector<64x48xf32> to vector<64x16xf32>
    %c6 = arith.constant 6 : index
    %c0_30 = arith.constant 0 : index
    %c0_31 = arith.constant 0 : index
    %56 = vector.load %arg2[%c6, %c0_30, %c0_31] : memref<9x64x1xf32, #tpu.memory_space<vmem>>, vector<1x64x1xf32>
    %57 = vector.shape_cast %56 : vector<1x64x1xf32> to vector<64x1xf32>
    %58 = vector.broadcast %57 : vector<64x1xf32> to vector<64x16xf32>
    %59 = arith.addf %55, %58 : vector<64x16xf32>
    %60 = arith.maximumf %54, %59 : vector<64x16xf32>
    %61 = vector.extract_strided_slice %5 {offsets = [0, 16], sizes = [64, 16], strides = [1, 1]} : vector<64x48xf32> to vector<64x16xf32>
    %c7 = arith.constant 7 : index
    %c0_32 = arith.constant 0 : index
    %c0_33 = arith.constant 0 : index
    %62 = vector.load %arg2[%c7, %c0_32, %c0_33] : memref<9x64x1xf32, #tpu.memory_space<vmem>>, vector<1x64x1xf32>
    %63 = vector.shape_cast %62 : vector<1x64x1xf32> to vector<64x1xf32>
    %64 = vector.broadcast %63 : vector<64x1xf32> to vector<64x16xf32>
    %65 = arith.addf %61, %64 : vector<64x16xf32>
    %66 = arith.maximumf %60, %65 : vector<64x16xf32>
    %67 = vector.extract_strided_slice %5 {offsets = [0, 32], sizes = [64, 16], strides = [1, 1]} : vector<64x48xf32> to vector<64x16xf32>
    %c8_34 = arith.constant 8 : index
    %c0_35 = arith.constant 0 : index
    %c0_36 = arith.constant 0 : index
    %68 = vector.load %arg2[%c8_34, %c0_35, %c0_36] : memref<9x64x1xf32, #tpu.memory_space<vmem>>, vector<1x64x1xf32>
    %69 = vector.shape_cast %68 : vector<1x64x1xf32> to vector<64x1xf32>
    %70 = vector.broadcast %69 : vector<64x1xf32> to vector<64x16xf32>
    %71 = arith.addf %67, %70 : vector<64x16xf32>
    %72 = arith.maximumf %66, %71 : vector<64x16xf32>
    %73 = arith.addf %1, %3 : vector<64x48xf32>
    %74 = arith.addf %73, %5 : vector<64x48xf32>
    %75 = vector.extract_strided_slice %74 {offsets = [0, 0], sizes = [64, 16], strides = [1, 1]} : vector<64x48xf32> to vector<64x16xf32>
    %76 = vector.extract_strided_slice %74 {offsets = [0, 16], sizes = [64, 16], strides = [1, 1]} : vector<64x48xf32> to vector<64x16xf32>
    %77 = arith.addf %75, %76 : vector<64x16xf32>
    %78 = vector.extract_strided_slice %74 {offsets = [0, 32], sizes = [64, 16], strides = [1, 1]} : vector<64x48xf32> to vector<64x16xf32>
    %79 = arith.addf %77, %78 : vector<64x16xf32>
    %cst_37 = arith.constant 0.111111112 : f32
    %80 = vector.broadcast %cst_37 : f32 to vector<64x16xf32>
    %81 = arith.mulf %79, %80 : vector<64x16xf32>
    %82 = vector.extract_strided_slice %3 {offsets = [0, 16], sizes = [64, 16], strides = [1, 1]} : vector<64x48xf32> to vector<64x16xf32>
    %cst_38 = arith.constant dense<0.000000e+00> : vector<16xf32>
    %83 = vector.multi_reduction <add>, %72, %cst_38 [0] : vector<64x16xf32> to vector<16xf32>
    %84 = vector.shape_cast %83 : vector<16xf32> to vector<1x16xf32>
    %85 = arith.mulf %72, %72 : vector<64x16xf32>
    %cst_39 = arith.constant dense<0.000000e+00> : vector<16xf32>
    %86 = vector.multi_reduction <add>, %85, %cst_39 [0] : vector<64x16xf32> to vector<16xf32>
    %87 = vector.shape_cast %86 : vector<16xf32> to vector<1x16xf32>
    %cst_40 = arith.constant dense<0.000000e+00> : vector<16xf32>
    %88 = vector.multi_reduction <add>, %81, %cst_40 [0] : vector<64x16xf32> to vector<16xf32>
    %89 = vector.shape_cast %88 : vector<16xf32> to vector<1x16xf32>
    %90 = arith.mulf %81, %81 : vector<64x16xf32>
    %cst_41 = arith.constant dense<0.000000e+00> : vector<16xf32>
    %91 = vector.multi_reduction <add>, %90, %cst_41 [0] : vector<64x16xf32> to vector<16xf32>
    %92 = vector.shape_cast %91 : vector<16xf32> to vector<1x16xf32>
    %cst_42 = arith.constant dense<0.000000e+00> : vector<16xf32>
    %93 = vector.multi_reduction <add>, %19, %cst_42 [0] : vector<64x16xf32> to vector<16xf32>
    %94 = vector.shape_cast %93 : vector<16xf32> to vector<1x16xf32>
    %95 = arith.mulf %19, %19 : vector<64x16xf32>
    %cst_43 = arith.constant dense<0.000000e+00> : vector<16xf32>
    %96 = vector.multi_reduction <add>, %95, %cst_43 [0] : vector<64x16xf32> to vector<16xf32>
    %97 = vector.shape_cast %96 : vector<16xf32> to vector<1x16xf32>
    %cst_44 = arith.constant dense<0.000000e+00> : vector<16xf32>
    %98 = vector.multi_reduction <add>, %82, %cst_44 [0] : vector<64x16xf32> to vector<16xf32>
    %99 = vector.shape_cast %98 : vector<16xf32> to vector<1x16xf32>
    %100 = arith.mulf %82, %82 : vector<64x16xf32>
    %cst_45 = arith.constant dense<0.000000e+00> : vector<16xf32>
    %101 = vector.multi_reduction <add>, %100, %cst_45 [0] : vector<64x16xf32> to vector<16xf32>
    %102 = vector.shape_cast %101 : vector<16xf32> to vector<1x16xf32>
    %103 = tpu.concatenate %84, %87, %89, %92, %94, %97, %99, %102 in 0 : vector<1x16xf32>, vector<1x16xf32>, vector<1x16xf32>, vector<1x16xf32>, vector<1x16xf32>, vector<1x16xf32>, vector<1x16xf32>, vector<1x16xf32> -> vector<8x16xf32>
    %c0_46 = arith.constant 0 : index
    %c0_47 = arith.constant 0 : index
    %c0_48 = arith.constant 0 : index
    %104 = vector.load %arg5[%c0_46, %c0_47, %c0_48] : memref<1x8x16xf32, #tpu.memory_space<vmem>>, vector<1x8x16xf32>
    %105 = vector.shape_cast %104 : vector<1x8x16xf32> to vector<8x16xf32>
    %106 = vector.shape_cast %103 : vector<8x16xf32> to vector<1x8x16xf32>
    tpu.vector_store %arg5[%c0_46, %c0_47, %c0_48], %106 {strides = array<i32>} : memref<1x8x16xf32, #tpu.memory_space<vmem>>, vector<1x8x16xf32>,
    %107 = arith.truncf %72 : vector<64x16xf32> to vector<64x16xbf16>
    %108 = arith.truncf %81 : vector<64x16xf32> to vector<64x16xbf16>
    %109 = arith.truncf %19 : vector<64x16xf32> to vector<64x16xbf16>
    %110 = arith.truncf %82 : vector<64x16xf32> to vector<64x16xbf16>
    %111 = tpu.concatenate %107, %108, %109, %110 in 1 : vector<64x16xbf16>, vector<64x16xbf16>, vector<64x16xbf16>, vector<64x16xbf16> -> vector<64x64xbf16>
    %c0_49 = arith.constant 0 : index
    %c0_50 = arith.constant 0 : index
    %c0_51 = arith.constant 0 : index
    %112 = vector.load %arg4[%c0_49, %c0_50, %c0_51] : memref<1x64x64xbf16, #tpu.memory_space<vmem>>, vector<1x64x64xbf16>
    %113 = vector.shape_cast %112 : vector<1x64x64xbf16> to vector<64x64xbf16>
    %114 = vector.shape_cast %111 : vector<64x64xbf16> to vector<1x64x64xbf16>
    tpu.vector_store %arg4[%c0_49, %c0_50, %c0_51], %114 {strides = array<i32>} : memref<1x64x64xbf16, #tpu.memory_space<vmem>>, vector<1x64x64xbf16>,
    return
  }
  func.func @transform_0(%arg0: i32) -> (i32, i32, i32) {
    %c0_i32 = arith.constant 0 : i32
    %c0_i32_0 = arith.constant 0 : i32
    %c0_i32_1 = arith.constant 0 : i32
    return %arg0, %c0_i32, %c0_i32_0 : i32, i32, i32
  }
  func.func @transform_1(%arg0: i32) -> (i32, i32, i32) {
    %c0_i32 = arith.constant 0 : i32
    %c0_i32_0 = arith.constant 0 : i32
    %c0_i32_1 = arith.constant 0 : i32
    %c0_i32_2 = arith.constant 0 : i32
    return %c0_i32, %c0_i32_0, %c0_i32_1 : i32, i32, i32
  }
  func.func @transform_2(%arg0: i32) -> (i32, i32, i32) {
    %c0_i32 = arith.constant 0 : i32
    %c0_i32_0 = arith.constant 0 : i32
    %c0_i32_1 = arith.constant 0 : i32
    %c0_i32_2 = arith.constant 0 : i32
    return %c0_i32, %c0_i32_0, %c0_i32_1 : i32, i32, i32
  }
  func.func @transform_3(%arg0: i32) -> (i32, i32, i32) {
    %c0_i32 = arith.constant 0 : i32
    %c0_i32_0 = arith.constant 0 : i32
    %c0_i32_1 = arith.constant 0 : i32
    return %arg0, %c0_i32, %c0_i32_0 : i32, i32, i32
  }
  func.func @transform_4(%arg0: i32) -> (i32, i32, i32) {
    %c0_i32 = arith.constant 0 : i32
    %c0_i32_0 = arith.constant 0 : i32
    %c0_i32_1 = arith.constant 0 : i32
    return %arg0, %c0_i32, %c0_i32_0 : i32, i32, i32
  }
}

module attributes {stable_mosaic.version = 11 : i64} {
  func.func @_node_apply_kernel(%arg0: i32, %arg1: memref<1x64x64xbf16, #tpu.memory_space<vmem>>, %arg2: memref<1x64x64xbf16, #tpu.memory_space<vmem>>, %arg3: memref<5x16xf32, #tpu.memory_space<vmem>>, %arg4: memref<5x16xf32, #tpu.memory_space<vmem>>, %arg5: memref<1x64x16xf32, #tpu.memory_space<vmem>>) attributes {dimension_semantics = [#tpu.dimension_semantics<parallel>], iteration_bounds = array<i64: 2>, scalar_prefetch = 0 : i64, scratch_operands = 0 : i64, tpu.core_type = #tpu.core_type<tc>, window_params = [{transform_indices = @transform_0, window_bounds = array<i64: 1, 64, 64>}, {transform_indices = @transform_1, window_bounds = array<i64: 1, 64, 64>}, {pipeline_mode = #tpu.pipeline_mode<synchronous>, transform_indices = @transform_2, window_bounds = array<i64: 5, 16>}, {pipeline_mode = #tpu.pipeline_mode<synchronous>, transform_indices = @transform_3, window_bounds = array<i64: 5, 16>}, {transform_indices = @transform_4, window_bounds = array<i64: 1, 64, 16>}]} {
    %c0 = arith.constant 0 : index
    %c0_0 = arith.constant 0 : index
    %c0_1 = arith.constant 0 : index
    %0 = vector.load %arg1[%c0, %c0_0, %c0_1] : memref<1x64x64xbf16, #tpu.memory_space<vmem>>, vector<1x64x64xbf16>
    %1 = vector.shape_cast %0 : vector<1x64x64xbf16> to vector<64x64xbf16>
    %c0_2 = arith.constant 0 : index
    %c0_3 = arith.constant 0 : index
    %2 = vector.load %arg3[%c0_2, %c0_3] : memref<5x16xf32, #tpu.memory_space<vmem>>, vector<5x16xf32>
    %3 = vector.extract_strided_slice %1 {offsets = [0, 0], sizes = [64, 16], strides = [1, 1]} : vector<64x64xbf16> to vector<64x16xbf16>
    %4 = arith.extf %3 : vector<64x16xbf16> to vector<64x16xf32>
    %5 = vector.extract_strided_slice %2 {offsets = [0, 0], sizes = [1, 16], strides = [1, 1]} : vector<5x16xf32> to vector<1x16xf32>
    %6 = vector.broadcast %5 : vector<1x16xf32> to vector<64x16xf32>
    %7 = arith.mulf %4, %6 : vector<64x16xf32>
    %8 = vector.extract_strided_slice %1 {offsets = [0, 16], sizes = [64, 16], strides = [1, 1]} : vector<64x64xbf16> to vector<64x16xbf16>
    %9 = arith.extf %8 : vector<64x16xbf16> to vector<64x16xf32>
    %10 = vector.extract_strided_slice %2 {offsets = [1, 0], sizes = [1, 16], strides = [1, 1]} : vector<5x16xf32> to vector<1x16xf32>
    %11 = vector.broadcast %10 : vector<1x16xf32> to vector<64x16xf32>
    %12 = arith.mulf %9, %11 : vector<64x16xf32>
    %13 = arith.addf %7, %12 : vector<64x16xf32>
    %14 = vector.extract_strided_slice %1 {offsets = [0, 32], sizes = [64, 16], strides = [1, 1]} : vector<64x64xbf16> to vector<64x16xbf16>
    %15 = arith.extf %14 : vector<64x16xbf16> to vector<64x16xf32>
    %16 = vector.extract_strided_slice %2 {offsets = [2, 0], sizes = [1, 16], strides = [1, 1]} : vector<5x16xf32> to vector<1x16xf32>
    %17 = vector.broadcast %16 : vector<1x16xf32> to vector<64x16xf32>
    %18 = arith.mulf %15, %17 : vector<64x16xf32>
    %19 = arith.addf %13, %18 : vector<64x16xf32>
    %20 = vector.extract_strided_slice %1 {offsets = [0, 48], sizes = [64, 16], strides = [1, 1]} : vector<64x64xbf16> to vector<64x16xbf16>
    %21 = arith.extf %20 : vector<64x16xbf16> to vector<64x16xf32>
    %22 = vector.extract_strided_slice %2 {offsets = [3, 0], sizes = [1, 16], strides = [1, 1]} : vector<5x16xf32> to vector<1x16xf32>
    %23 = vector.broadcast %22 : vector<1x16xf32> to vector<64x16xf32>
    %24 = arith.mulf %21, %23 : vector<64x16xf32>
    %25 = arith.addf %19, %24 : vector<64x16xf32>
    %26 = vector.extract_strided_slice %2 {offsets = [4, 0], sizes = [1, 16], strides = [1, 1]} : vector<5x16xf32> to vector<1x16xf32>
    %27 = vector.broadcast %26 : vector<1x16xf32> to vector<64x16xf32>
    %28 = arith.addf %25, %27 : vector<64x16xf32>
    %c0_4 = arith.constant 0 : index
    %c0_5 = arith.constant 0 : index
    %c0_6 = arith.constant 0 : index
    %29 = vector.load %arg2[%c0_4, %c0_5, %c0_6] : memref<1x64x64xbf16, #tpu.memory_space<vmem>>, vector<1x64x64xbf16>
    %30 = vector.shape_cast %29 : vector<1x64x64xbf16> to vector<64x64xbf16>
    %c0_7 = arith.constant 0 : index
    %c0_8 = arith.constant 0 : index
    %31 = vector.load %arg4[%c0_7, %c0_8] : memref<5x16xf32, #tpu.memory_space<vmem>>, vector<5x16xf32>
    %32 = vector.extract_strided_slice %30 {offsets = [0, 0], sizes = [64, 16], strides = [1, 1]} : vector<64x64xbf16> to vector<64x16xbf16>
    %33 = arith.extf %32 : vector<64x16xbf16> to vector<64x16xf32>
    %34 = vector.extract_strided_slice %31 {offsets = [0, 0], sizes = [1, 16], strides = [1, 1]} : vector<5x16xf32> to vector<1x16xf32>
    %35 = vector.broadcast %34 : vector<1x16xf32> to vector<64x16xf32>
    %36 = arith.mulf %33, %35 : vector<64x16xf32>
    %37 = vector.extract_strided_slice %30 {offsets = [0, 16], sizes = [64, 16], strides = [1, 1]} : vector<64x64xbf16> to vector<64x16xbf16>
    %38 = arith.extf %37 : vector<64x16xbf16> to vector<64x16xf32>
    %39 = vector.extract_strided_slice %31 {offsets = [1, 0], sizes = [1, 16], strides = [1, 1]} : vector<5x16xf32> to vector<1x16xf32>
    %40 = vector.broadcast %39 : vector<1x16xf32> to vector<64x16xf32>
    %41 = arith.mulf %38, %40 : vector<64x16xf32>
    %42 = arith.addf %36, %41 : vector<64x16xf32>
    %43 = vector.extract_strided_slice %30 {offsets = [0, 32], sizes = [64, 16], strides = [1, 1]} : vector<64x64xbf16> to vector<64x16xbf16>
    %44 = arith.extf %43 : vector<64x16xbf16> to vector<64x16xf32>
    %45 = vector.extract_strided_slice %31 {offsets = [2, 0], sizes = [1, 16], strides = [1, 1]} : vector<5x16xf32> to vector<1x16xf32>
    %46 = vector.broadcast %45 : vector<1x16xf32> to vector<64x16xf32>
    %47 = arith.mulf %44, %46 : vector<64x16xf32>
    %48 = arith.addf %42, %47 : vector<64x16xf32>
    %49 = vector.extract_strided_slice %30 {offsets = [0, 48], sizes = [64, 16], strides = [1, 1]} : vector<64x64xbf16> to vector<64x16xbf16>
    %50 = arith.extf %49 : vector<64x16xbf16> to vector<64x16xf32>
    %51 = vector.extract_strided_slice %31 {offsets = [3, 0], sizes = [1, 16], strides = [1, 1]} : vector<5x16xf32> to vector<1x16xf32>
    %52 = vector.broadcast %51 : vector<1x16xf32> to vector<64x16xf32>
    %53 = arith.mulf %50, %52 : vector<64x16xf32>
    %54 = arith.addf %48, %53 : vector<64x16xf32>
    %55 = vector.extract_strided_slice %31 {offsets = [4, 0], sizes = [1, 16], strides = [1, 1]} : vector<5x16xf32> to vector<1x16xf32>
    %56 = vector.broadcast %55 : vector<1x16xf32> to vector<64x16xf32>
    %57 = arith.addf %54, %56 : vector<64x16xf32>
    %58 = arith.addf %28, %57 : vector<64x16xf32>
    %c0_9 = arith.constant 0 : index
    %c0_10 = arith.constant 0 : index
    %c0_11 = arith.constant 0 : index
    %59 = vector.load %arg5[%c0_9, %c0_10, %c0_11] : memref<1x64x16xf32, #tpu.memory_space<vmem>>, vector<1x64x16xf32>
    %60 = vector.shape_cast %59 : vector<1x64x16xf32> to vector<64x16xf32>
    %61 = vector.shape_cast %58 : vector<64x16xf32> to vector<1x64x16xf32>
    tpu.vector_store %arg5[%c0_9, %c0_10, %c0_11], %61 {strides = array<i32>} : memref<1x64x16xf32, #tpu.memory_space<vmem>>, vector<1x64x16xf32>,
    return
  }
  func.func @transform_0(%arg0: i32) -> (i32, i32, i32) {
    %c0_i32 = arith.constant 0 : i32
    %c0_i32_0 = arith.constant 0 : i32
    %c0_i32_1 = arith.constant 0 : i32
    return %arg0, %c0_i32, %c0_i32_0 : i32, i32, i32
  }
  func.func @transform_1(%arg0: i32) -> (i32, i32, i32) {
    %c0_i32 = arith.constant 0 : i32
    %c0_i32_0 = arith.constant 0 : i32
    %c0_i32_1 = arith.constant 0 : i32
    return %arg0, %c0_i32, %c0_i32_0 : i32, i32, i32
  }
  func.func @transform_2(%arg0: i32) -> (i32, i32) {
    %c0_i32 = arith.constant 0 : i32
    %c0_i32_0 = arith.constant 0 : i32
    %c0_i32_1 = arith.constant 0 : i32
    return %c0_i32, %c0_i32_0 : i32, i32
  }
  func.func @transform_3(%arg0: i32) -> (i32, i32) {
    %c0_i32 = arith.constant 0 : i32
    %c0_i32_0 = arith.constant 0 : i32
    %c0_i32_1 = arith.constant 0 : i32
    return %c0_i32, %c0_i32_0 : i32, i32
  }
  func.func @transform_4(%arg0: i32) -> (i32, i32, i32) {
    %c0_i32 = arith.constant 0 : i32
    %c0_i32_0 = arith.constant 0 : i32
    %c0_i32_1 = arith.constant 0 : i32
    return %arg0, %c0_i32, %c0_i32_0 : i32, i32, i32
  }
}

module attributes {stable_mosaic.version = 11 : i64} {
  func.func @_node_apply_kernel(%arg0: i32, %arg1: memref<1x64x64xbf16, #tpu.memory_space<vmem>>, %arg2: memref<1x64x64xbf16, #tpu.memory_space<vmem>>, %arg3: memref<1x64x64xbf16, #tpu.memory_space<vmem>>, %arg4: memref<5x16xf32, #tpu.memory_space<vmem>>, %arg5: memref<5x16xf32, #tpu.memory_space<vmem>>, %arg6: memref<5x16xf32, #tpu.memory_space<vmem>>, %arg7: memref<1x64x48xf32, #tpu.memory_space<vmem>>) attributes {dimension_semantics = [#tpu.dimension_semantics<parallel>], iteration_bounds = array<i64: 2>, scalar_prefetch = 0 : i64, scratch_operands = 0 : i64, tpu.core_type = #tpu.core_type<tc>, window_params = [{transform_indices = @transform_0, window_bounds = array<i64: 1, 64, 64>}, {transform_indices = @transform_1, window_bounds = array<i64: 1, 64, 64>}, {transform_indices = @transform_2, window_bounds = array<i64: 1, 64, 64>}, {pipeline_mode = #tpu.pipeline_mode<synchronous>, transform_indices = @transform_3, window_bounds = array<i64: 5, 16>}, {pipeline_mode = #tpu.pipeline_mode<synchronous>, transform_indices = @transform_4, window_bounds = array<i64: 5, 16>}, {pipeline_mode = #tpu.pipeline_mode<synchronous>, transform_indices = @transform_5, window_bounds = array<i64: 5, 16>}, {transform_indices = @transform_6, window_bounds = array<i64: 1, 64, 48>}]} {
    %c0 = arith.constant 0 : index
    %c0_0 = arith.constant 0 : index
    %c0_1 = arith.constant 0 : index
    %0 = vector.load %arg1[%c0, %c0_0, %c0_1] : memref<1x64x64xbf16, #tpu.memory_space<vmem>>, vector<1x64x64xbf16>
    %1 = vector.shape_cast %0 : vector<1x64x64xbf16> to vector<64x64xbf16>
    %c0_2 = arith.constant 0 : index
    %c0_3 = arith.constant 0 : index
    %2 = vector.load %arg4[%c0_2, %c0_3] : memref<5x16xf32, #tpu.memory_space<vmem>>, vector<5x16xf32>
    %3 = vector.extract_strided_slice %1 {offsets = [0, 0], sizes = [64, 16], strides = [1, 1]} : vector<64x64xbf16> to vector<64x16xbf16>
    %4 = arith.extf %3 : vector<64x16xbf16> to vector<64x16xf32>
    %5 = vector.extract_strided_slice %2 {offsets = [0, 0], sizes = [1, 16], strides = [1, 1]} : vector<5x16xf32> to vector<1x16xf32>
    %6 = vector.broadcast %5 : vector<1x16xf32> to vector<64x16xf32>
    %7 = arith.mulf %4, %6 : vector<64x16xf32>
    %8 = vector.extract_strided_slice %1 {offsets = [0, 16], sizes = [64, 16], strides = [1, 1]} : vector<64x64xbf16> to vector<64x16xbf16>
    %9 = arith.extf %8 : vector<64x16xbf16> to vector<64x16xf32>
    %10 = vector.extract_strided_slice %2 {offsets = [1, 0], sizes = [1, 16], strides = [1, 1]} : vector<5x16xf32> to vector<1x16xf32>
    %11 = vector.broadcast %10 : vector<1x16xf32> to vector<64x16xf32>
    %12 = arith.mulf %9, %11 : vector<64x16xf32>
    %13 = arith.addf %7, %12 : vector<64x16xf32>
    %14 = vector.extract_strided_slice %1 {offsets = [0, 32], sizes = [64, 16], strides = [1, 1]} : vector<64x64xbf16> to vector<64x16xbf16>
    %15 = arith.extf %14 : vector<64x16xbf16> to vector<64x16xf32>
    %16 = vector.extract_strided_slice %2 {offsets = [2, 0], sizes = [1, 16], strides = [1, 1]} : vector<5x16xf32> to vector<1x16xf32>
    %17 = vector.broadcast %16 : vector<1x16xf32> to vector<64x16xf32>
    %18 = arith.mulf %15, %17 : vector<64x16xf32>
    %19 = arith.addf %13, %18 : vector<64x16xf32>
    %20 = vector.extract_strided_slice %1 {offsets = [0, 48], sizes = [64, 16], strides = [1, 1]} : vector<64x64xbf16> to vector<64x16xbf16>
    %21 = arith.extf %20 : vector<64x16xbf16> to vector<64x16xf32>
    %22 = vector.extract_strided_slice %2 {offsets = [3, 0], sizes = [1, 16], strides = [1, 1]} : vector<5x16xf32> to vector<1x16xf32>
    %23 = vector.broadcast %22 : vector<1x16xf32> to vector<64x16xf32>
    %24 = arith.mulf %21, %23 : vector<64x16xf32>
    %25 = arith.addf %19, %24 : vector<64x16xf32>
    %26 = vector.extract_strided_slice %2 {offsets = [4, 0], sizes = [1, 16], strides = [1, 1]} : vector<5x16xf32> to vector<1x16xf32>
    %27 = vector.broadcast %26 : vector<1x16xf32> to vector<64x16xf32>
    %28 = arith.addf %25, %27 : vector<64x16xf32>
    %c0_4 = arith.constant 0 : index
    %c0_5 = arith.constant 0 : index
    %c0_6 = arith.constant 0 : index
    %29 = vector.load %arg2[%c0_4, %c0_5, %c0_6] : memref<1x64x64xbf16, #tpu.memory_space<vmem>>, vector<1x64x64xbf16>
    %30 = vector.shape_cast %29 : vector<1x64x64xbf16> to vector<64x64xbf16>
    %c0_7 = arith.constant 0 : index
    %c0_8 = arith.constant 0 : index
    %31 = vector.load %arg5[%c0_7, %c0_8] : memref<5x16xf32, #tpu.memory_space<vmem>>, vector<5x16xf32>
    %32 = vector.extract_strided_slice %30 {offsets = [0, 0], sizes = [64, 16], strides = [1, 1]} : vector<64x64xbf16> to vector<64x16xbf16>
    %33 = arith.extf %32 : vector<64x16xbf16> to vector<64x16xf32>
    %34 = vector.extract_strided_slice %31 {offsets = [0, 0], sizes = [1, 16], strides = [1, 1]} : vector<5x16xf32> to vector<1x16xf32>
    %35 = vector.broadcast %34 : vector<1x16xf32> to vector<64x16xf32>
    %36 = arith.mulf %33, %35 : vector<64x16xf32>
    %37 = vector.extract_strided_slice %30 {offsets = [0, 16], sizes = [64, 16], strides = [1, 1]} : vector<64x64xbf16> to vector<64x16xbf16>
    %38 = arith.extf %37 : vector<64x16xbf16> to vector<64x16xf32>
    %39 = vector.extract_strided_slice %31 {offsets = [1, 0], sizes = [1, 16], strides = [1, 1]} : vector<5x16xf32> to vector<1x16xf32>
    %40 = vector.broadcast %39 : vector<1x16xf32> to vector<64x16xf32>
    %41 = arith.mulf %38, %40 : vector<64x16xf32>
    %42 = arith.addf %36, %41 : vector<64x16xf32>
    %43 = vector.extract_strided_slice %30 {offsets = [0, 32], sizes = [64, 16], strides = [1, 1]} : vector<64x64xbf16> to vector<64x16xbf16>
    %44 = arith.extf %43 : vector<64x16xbf16> to vector<64x16xf32>
    %45 = vector.extract_strided_slice %31 {offsets = [2, 0], sizes = [1, 16], strides = [1, 1]} : vector<5x16xf32> to vector<1x16xf32>
    %46 = vector.broadcast %45 : vector<1x16xf32> to vector<64x16xf32>
    %47 = arith.mulf %44, %46 : vector<64x16xf32>
    %48 = arith.addf %42, %47 : vector<64x16xf32>
    %49 = vector.extract_strided_slice %30 {offsets = [0, 48], sizes = [64, 16], strides = [1, 1]} : vector<64x64xbf16> to vector<64x16xbf16>
    %50 = arith.extf %49 : vector<64x16xbf16> to vector<64x16xf32>
    %51 = vector.extract_strided_slice %31 {offsets = [3, 0], sizes = [1, 16], strides = [1, 1]} : vector<5x16xf32> to vector<1x16xf32>
    %52 = vector.broadcast %51 : vector<1x16xf32> to vector<64x16xf32>
    %53 = arith.mulf %50, %52 : vector<64x16xf32>
    %54 = arith.addf %48, %53 : vector<64x16xf32>
    %55 = vector.extract_strided_slice %31 {offsets = [4, 0], sizes = [1, 16], strides = [1, 1]} : vector<5x16xf32> to vector<1x16xf32>
    %56 = vector.broadcast %55 : vector<1x16xf32> to vector<64x16xf32>
    %57 = arith.addf %54, %56 : vector<64x16xf32>
    %c0_9 = arith.constant 0 : index
    %c0_10 = arith.constant 0 : index
    %c0_11 = arith.constant 0 : index
    %58 = vector.load %arg3[%c0_9, %c0_10, %c0_11] : memref<1x64x64xbf16, #tpu.memory_space<vmem>>, vector<1x64x64xbf16>
    %59 = vector.shape_cast %58 : vector<1x64x64xbf16> to vector<64x64xbf16>
    %c0_12 = arith.constant 0 : index
    %c0_13 = arith.constant 0 : index
    %60 = vector.load %arg6[%c0_12, %c0_13] : memref<5x16xf32, #tpu.memory_space<vmem>>, vector<5x16xf32>
    %61 = vector.extract_strided_slice %59 {offsets = [0, 0], sizes = [64, 16], strides = [1, 1]} : vector<64x64xbf16> to vector<64x16xbf16>
    %62 = arith.extf %61 : vector<64x16xbf16> to vector<64x16xf32>
    %63 = vector.extract_strided_slice %60 {offsets = [0, 0], sizes = [1, 16], strides = [1, 1]} : vector<5x16xf32> to vector<1x16xf32>
    %64 = vector.broadcast %63 : vector<1x16xf32> to vector<64x16xf32>
    %65 = arith.mulf %62, %64 : vector<64x16xf32>
    %66 = vector.extract_strided_slice %59 {offsets = [0, 16], sizes = [64, 16], strides = [1, 1]} : vector<64x64xbf16> to vector<64x16xbf16>
    %67 = arith.extf %66 : vector<64x16xbf16> to vector<64x16xf32>
    %68 = vector.extract_strided_slice %60 {offsets = [1, 0], sizes = [1, 16], strides = [1, 1]} : vector<5x16xf32> to vector<1x16xf32>
    %69 = vector.broadcast %68 : vector<1x16xf32> to vector<64x16xf32>
    %70 = arith.mulf %67, %69 : vector<64x16xf32>
    %71 = arith.addf %65, %70 : vector<64x16xf32>
    %72 = vector.extract_strided_slice %59 {offsets = [0, 32], sizes = [64, 16], strides = [1, 1]} : vector<64x64xbf16> to vector<64x16xbf16>
    %73 = arith.extf %72 : vector<64x16xbf16> to vector<64x16xf32>
    %74 = vector.extract_strided_slice %60 {offsets = [2, 0], sizes = [1, 16], strides = [1, 1]} : vector<5x16xf32> to vector<1x16xf32>
    %75 = vector.broadcast %74 : vector<1x16xf32> to vector<64x16xf32>
    %76 = arith.mulf %73, %75 : vector<64x16xf32>
    %77 = arith.addf %71, %76 : vector<64x16xf32>
    %78 = vector.extract_strided_slice %59 {offsets = [0, 48], sizes = [64, 16], strides = [1, 1]} : vector<64x64xbf16> to vector<64x16xbf16>
    %79 = arith.extf %78 : vector<64x16xbf16> to vector<64x16xf32>
    %80 = vector.extract_strided_slice %60 {offsets = [3, 0], sizes = [1, 16], strides = [1, 1]} : vector<5x16xf32> to vector<1x16xf32>
    %81 = vector.broadcast %80 : vector<1x16xf32> to vector<64x16xf32>
    %82 = arith.mulf %79, %81 : vector<64x16xf32>
    %83 = arith.addf %77, %82 : vector<64x16xf32>
    %84 = vector.extract_strided_slice %60 {offsets = [4, 0], sizes = [1, 16], strides = [1, 1]} : vector<5x16xf32> to vector<1x16xf32>
    %85 = vector.broadcast %84 : vector<1x16xf32> to vector<64x16xf32>
    %86 = arith.addf %83, %85 : vector<64x16xf32>
    %87 = tpu.concatenate %28, %57, %86 in 1 : vector<64x16xf32>, vector<64x16xf32>, vector<64x16xf32> -> vector<64x48xf32>
    %c0_14 = arith.constant 0 : index
    %c0_15 = arith.constant 0 : index
    %c0_16 = arith.constant 0 : index
    %88 = vector.load %arg7[%c0_14, %c0_15, %c0_16] : memref<1x64x48xf32, #tpu.memory_space<vmem>>, vector<1x64x48xf32>
    %89 = vector.shape_cast %88 : vector<1x64x48xf32> to vector<64x48xf32>
    %90 = vector.shape_cast %87 : vector<64x48xf32> to vector<1x64x48xf32>
    tpu.vector_store %arg7[%c0_14, %c0_15, %c0_16], %90 {strides = array<i32>} : memref<1x64x48xf32, #tpu.memory_space<vmem>>, vector<1x64x48xf32>,
    return
  }
  func.func @transform_0(%arg0: i32) -> (i32, i32, i32) {
    %c0_i32 = arith.constant 0 : i32
    %c0_i32_0 = arith.constant 0 : i32
    %c0_i32_1 = arith.constant 0 : i32
    return %arg0, %c0_i32, %c0_i32_0 : i32, i32, i32
  }
  func.func @transform_1(%arg0: i32) -> (i32, i32, i32) {
    %c0_i32 = arith.constant 0 : i32
    %c0_i32_0 = arith.constant 0 : i32
    %c0_i32_1 = arith.constant 0 : i32
    return %arg0, %c0_i32, %c0_i32_0 : i32, i32, i32
  }
  func.func @transform_2(%arg0: i32) -> (i32, i32, i32) {
    %c0_i32 = arith.constant 0 : i32
    %c0_i32_0 = arith.constant 0 : i32
    %c0_i32_1 = arith.constant 0 : i32
    return %arg0, %c0_i32, %c0_i32_0 : i32, i32, i32
  }
  func.func @transform_3(%arg0: i32) -> (i32, i32) {
    %c0_i32 = arith.constant 0 : i32
    %c0_i32_0 = arith.constant 0 : i32
    %c0_i32_1 = arith.constant 0 : i32
    return %c0_i32, %c0_i32_0 : i32, i32
  }
  func.func @transform_4(%arg0: i32) -> (i32, i32) {
    %c0_i32 = arith.constant 0 : i32
    %c0_i32_0 = arith.constant 0 : i32
    %c0_i32_1 = arith.constant 0 : i32
    return %c0_i32, %c0_i32_0 : i32, i32
  }
  func.func @transform_5(%arg0: i32) -> (i32, i32) {
    %c0_i32 = arith.constant 0 : i32
    %c0_i32_0 = arith.constant 0 : i32
    %c0_i32_1 = arith.constant 0 : i32
    return %c0_i32, %c0_i32_0 : i32, i32
  }
  func.func @transform_6(%arg0: i32) -> (i32, i32, i32) {
    %c0_i32 = arith.constant 0 : i32
    %c0_i32_0 = arith.constant 0 : i32
    %c0_i32_1 = arith.constant 0 : i32
    return %arg0, %c0_i32, %c0_i32_0 : i32, i32, i32
  }
}

</mosaic_0001>

<bundles_post_ra>
// kernel: search_reduction_cell_forward.10
= control target key start
LH: loop header
LB: loop body
LE: loop exit
PB: predicated region body
PF: predicated region fallthrough
CT: control target
= control target key end

     0   :  { %s477_s9 = smov 0   ;;  %s572_s0 = inlined_call_operand.vmem [shape: bf16[2,64,64], index: 0, kind: input, shape index: {}]   ;;  %s573_s1 = inlined_call_operand.vmem [shape: f32[5,16], index: 1, kind: input, shape index: {}]   ;;  %s574_s2 = inlined_call_operand.vmem [shape: f32[2,64,16], index: 2, kind: output, shape index: {}]  }
   0x1 LB: > { %s402_s10 = sadd.s32 4294967295, %s454_s9   ;;  %p406_p0 = scmp.ge.s32.totalorder %s454_s9, 1  ;;  %s454_s9 = sphi %s477_s9, %s12_s9  }
   0x2   : > { %p112_p1 = scmp.lt.s32.totalorder %s454_s9, 3 }
   0x4   : > { %p113_p2 = pnand %p406_p0, %p112_p1 }
   0x5   : > { %s456_s13 = smov (!%p113_p2), 16   ;;  %s457_s14 = smov (!%p113_p2), 48  }
   0x6   : > { %116 = sbr.rel (%p113_p2) target bundleno = 308 (0x134), region = 28  ;;  %s458_s15 = smov (!%p113_p2), 32  }
   0x7   : > { %p134_p3 = scmp.lt.s32.totalorder (!%p113_p2), %s402_s10, 1  ;;  %s459_s20 = smov (!%p113_p2), 112  }
   0x8   : > { %s460_s21 = smov (!%p113_p2), 96   ;;  %s461_s22 = smov (!%p113_p2), 80  }
   0xb   : > { %v488_v0 = vld [vmem:[%s573_s1] sm:$0x1f]  ;;  %s576_s10 = smov (!%p134_p3, %s402_s10), 1  ;;  %vm338_vm0 = vcmask 130048  }
   0xc   : > { %v170_v1 = vperm.slane %v488_v0, 1  ;;  %v276_v2 = vperm.slane %v488_v0, 3  ;;  %v223_v3 = vperm.slane %v488_v0, 2  ;;  %s413_s16 = sshll.u32 %s576_s10, 5  ;;  %v527_v40 = vperm.slane %v488_v0, 0  ;;  %s414_s23 = sshll.u32 %s576_s10, 6 }
   0xd   : > { %s138_s19 = scalar_lea.vmem %s572_s0, %s413_s16  ;;  %v329_v59 = vperm.slane %v488_v0, 4  ;;  %s541_s26 = scalar_lea.vmem %s574_s2, %s414_s23 }
   0xe   : > { %172 = vrot.lane.b32.xlu0 %v170_v1, %s456_s13  ;;  %278 = vrot.lane.b32.xlu1 %v276_v2, %s457_s14  ;;  %v431_v4 = vld [vmem:[%s138_s19 + $0x8] sm:$0xff]   ;;  %v416_v5 = vld [vmem:[%s138_s19] sm:$0xff]  }
   0xf   : > { %v499_v6 = vunpack.c.h.bf16 %v431_v4  ;;  %v418_v7 = vunpack.c.h.bf16 %v416_v5  ;;  %v501_v8 = vunpack.c.l.bf16 %v416_v5  ;;  %v433_v13 = vld [vmem:[%s138_s19 + $0x18] sm:$0xff]   ;;  %v432_v14 = vld [vmem:[%s138_s19 + $0x10] sm:$0xff]   ;;  %v421_v16 = vunpack.c.l.bf16 %v431_v4 }
  0x10   : > { %v505_v15 = vunpack.c.l.bf16 %v433_v13  ;;  %v507_v17 = vunpack.c.l.bf16 %v432_v14  ;;  %v511_v22 = vunpack.c.h.bf16 %v432_v14  ;;  %v513_v23 = vunpack.c.h.bf16 %v433_v13 }
  0x11   : > { %v163_v43 = vmul.f32 %v418_v7, %v527_v40  ;;  %v164_v44 = vmul.f32 %v421_v16, %v527_v40  ;;  %v162_v5 = vmul.f32 %v501_v8, %v527_v40 }
  0x12   : > { %v166_v63 = vmul.f32 %v507_v17, %v527_v40 }
  0x16   : > { %225 = vrot.lane.b32.xlu0 %v223_v3, %s458_s15 }
  0x80   : > { %v173_v9 = vpop.permute.xlu0 %172  ;;  %v279_v33 = vpop.permute.xlu1 %278 }
  0x81   : > { %v178_v10 = vmul.f32 %v499_v6, %v173_v9  ;;  %v176_v11 = vmul.f32 %v418_v7, %v173_v9  ;;  %v175_v12 = vmul.f32 %v501_v8, %v173_v9  ;;  %v181_v18 = vmul.f32 %v505_v15, %v173_v9 }
  0x82   : > { %v177_v19 = vmul.f32 %v421_v16, %v173_v9  ;;  %v179_v20 = vmul.f32 %v507_v17, %v173_v9  ;;  %v180_v25 = vmul.f32 %v511_v22, %v173_v9  ;;  %v182_v26 = vmul.f32 %v513_v23, %v173_v9 }
  0x83   : > { %197 = vrot.lane.b32.xlu0 %v178_v10, %s459_s20  ;;  %193 = vrot.lane.b32.xlu2 %v176_v11, %s459_s20  ;;  %v283_v34 = vmul.f32 %v421_v16, %v279_v33  ;;  %v281_v35 = vmul.f32 %v501_v8, %v279_v33  ;;  %v286_v37 = vmul.f32 %v511_v22, %v279_v33 }
  0x84   : > { %191 = vrot.lane.b32.xlu1 %v175_v12, %s459_s20  ;;  %v282_v38 = vmul.f32 %v418_v7, %v279_v33  ;;  %v284_v39 = vmul.f32 %v499_v6, %v279_v33  ;;  %v285_v41 = vmul.f32 %v507_v17, %v279_v33  ;;  %v287_v42 = vmul.f32 %v505_v15, %v279_v33 }
  0x85   : > { %v288_v45 = vmul.f32 %v513_v23, %v279_v33  ;;  %v169_v10 = vmul.f32 %v513_v23, %v527_v40 }
  0x88   : > { %v226_v21 = vpop.permute.xlu0 %225 }
  0x89   : > { %v229_v24 = vmul.f32 %v418_v7, %v226_v21  ;;  %v232_v27 = vmul.f32 %v507_v17, %v226_v21  ;;  %v228_v28 = vmul.f32 %v501_v8, %v226_v21  ;;  %v230_v29 = vmul.f32 %v421_v16, %v226_v21 }
  0x8a   : > { %v235_v30 = vmul.f32 %v513_v23, %v226_v21  ;;  %v231_v31 = vmul.f32 %v499_v6, %v226_v21  ;;  %v233_v32 = vmul.f32 %v511_v22, %v226_v21  ;;  %v234_v36 = vmul.f32 %v505_v15, %v226_v21 }
  0x8b   : > { %203 = vrot.lane.b32.xlu0 %v181_v18, %s459_s20  ;;  %195 = vrot.lane.b32.xlu2 %v177_v19, %s459_s20 }
  0x8c   : > { %199 = vrot.lane.b32.xlu1 %v179_v20, %s459_s20 }
  0x93   : > { %246 = vrot.lane.b32.xlu0 %v229_v24, %s460_s21  ;;  %201 = vrot.lane.b32.xlu2 %v180_v25, %s459_s20  ;;  %v167_v24 = vmul.f32 %v511_v22, %v527_v40 }
  0x94   : > { %205 = vrot.lane.b32.xlu1 %v182_v26, %s459_s20 }
  0x9b   : > { %252 = vrot.lane.b32.xlu0 %v232_v27, %s460_s21  ;;  %244 = vrot.lane.b32.xlu2 %v228_v28, %s460_s21  ;;  %v165_v27 = vmul.f32 %v499_v6, %v527_v40 }
  0x9c   : > { %248 = vrot.lane.b32.xlu1 %v230_v29, %s460_s21 }
  0xa3   : > { %258 = vrot.lane.b32.xlu0 %v235_v30, %s460_s21  ;;  %250 = vrot.lane.b32.xlu2 %v231_v31, %s460_s21 }
  0xa4   : > { %254 = vrot.lane.b32.xlu1 %v233_v32, %s460_s21 }
  0xab   : > { %301 = vrot.lane.b32.xlu0 %v283_v34, %s461_s22  ;;  %256 = vrot.lane.b32.xlu2 %v234_v36, %s460_s21 }
  0xac   : > { %297 = vrot.lane.b32.xlu1 %v281_v35, %s461_s22 }
  0xb3   : > { %307 = vrot.lane.b32.xlu0 %v286_v37, %s461_s22  ;;  %299 = vrot.lane.b32.xlu2 %v282_v38, %s461_s22  ;;  %v168_v37 = vmul.f32 %v505_v15, %v527_v40 }
  0xb4   : > { %303 = vrot.lane.b32.xlu1 %v284_v39, %s461_s22 }
  0xbb   : > { %305 = vrot.lane.b32.xlu2 %v285_v41, %s461_s22 }
  0xbc   : > { %309 = vrot.lane.b32.xlu1 %v287_v42, %s461_s22 }
  0xc3   : > { %311 = vrot.lane.b32.xlu2 %v288_v45, %s461_s22 }
  0xdd   : > { %v194_v46 = vpop.permute.xlu2 %193 }
  0xde   : > { %v216_v58 = vadd.f32 %v194_v46, %v163_v43 }
  0xe5   : > { %v196_v47 = vpop.permute.xlu2 %195 }
  0xe6   : > { %v217_v16 = vadd.f32 %v196_v47, %v164_v44 }
  0xed   : > { %v202_v48 = vpop.permute.xlu2 %201 }
  0xee   : > { %v220_v32 = vadd.f32 %v202_v48, %v167_v24 }
  0xf5   : > { %v198_v49 = vpop.permute.xlu0 %197  ;;  %v245_v50 = vpop.permute.xlu2 %244 }
  0xf6   : > { %v192_v51 = vpop.permute.xlu1 %191  ;;  %v218_v33 = vadd.f32 %v198_v49, %v165_v27 }
  0xf7   : > { %v215_v14 = vadd.f32 %v192_v51, %v162_v5 }
  0xf9   : > { %v268_v8 = vadd.f32 %v245_v50, %v215_v14 }
  0xfd   : > { %v204_v52 = vpop.permute.xlu0 %203  ;;  %v251_v53 = vpop.permute.xlu2 %250 }
  0xfe   : > { %v200_v54 = vpop.permute.xlu1 %199  ;;  %v271_v22 = vadd.f32 %v251_v53, %v218_v33  ;;  %v221_v42 = vadd.f32 %v204_v52, %v168_v37 }
  0xff   : > { %v219_v4 = vadd.f32 %v200_v54, %v166_v63 }
 0x105   : > { %v247_v55 = vpop.permute.xlu0 %246  ;;  %v257_v56 = vpop.permute.xlu2 %256 }
 0x106   : > { %v206_v57 = vpop.permute.xlu1 %205  ;;  %v269_v60 = vadd.f32 %v247_v55, %v216_v58  ;;  %v274_v43 = vadd.f32 %v257_v56, %v221_v42 }
 0x107   : > { %v222_v17 = vadd.f32 %v206_v57, %v169_v10 }
 0x10d   : > { %v253_v61 = vpop.permute.xlu0 %252  ;;  %v300_v62 = vpop.permute.xlu2 %299 }
 0x10e   : > { %v322_v1 = vadd.f32 %v300_v62, %v269_v60  ;;  %v249_v2 = vpop.permute.xlu1 %248  ;;  %v272_v0 = vadd.f32 %v253_v61, %v219_v4 }
 0x10f   : > { %v270_v18 = vadd.f32 %v249_v2, %v217_v16 }
 0x110   : > { %v331_v3 = vadd.f32 %v329_v59, %v322_v1 }
 0x112   : > { %340 = vst.msk [vmem:[%s541_s26 + $0x8] sm:$0xff] %vm338_vm0, %v331_v3 }
 0x115   : > { %v259_v7 = vpop.permute.xlu0 %258  ;;  %v306_v9 = vpop.permute.xlu2 %305 }
 0x116   : > { %v325_v11 = vadd.f32 %v306_v9, %v272_v0  ;;  %v255_v12 = vpop.permute.xlu1 %254  ;;  %v275_v19 = vadd.f32 %v259_v7, %v222_v17 }
 0x117   : > { %v273_v34 = vadd.f32 %v255_v12, %v220_v32 }
 0x118   : > { %v334_v13 = vadd.f32 %v329_v59, %v325_v11 }
 0x11a   : > { %343 = vst.msk [vmem:[%s541_s26 + $0x20] sm:$0xff] %vm338_vm0, %v334_v13 }
 0x11d   : > { %v302_v20 = vpop.permute.xlu0 %301  ;;  %v312_v21 = vpop.permute.xlu2 %311 }
 0x11e   : > { %v323_v23 = vadd.f32 %v302_v20, %v270_v18  ;;  %v328_v25 = vadd.f32 %v312_v21, %v275_v19  ;;  %v298_v26 = vpop.permute.xlu1 %297 }
 0x11f   : > { %v321_v28 = vadd.f32 %v298_v26, %v268_v8 }
 0x120   : > { %v332_v29 = vadd.f32 %v329_v59, %v323_v23  ;;  %v337_v30 = vadd.f32 %v329_v59, %v328_v25 }
 0x121   : > { %v330_v31 = vadd.f32 %v329_v59, %v321_v28 }
 0x122   : > { %341 = vst.msk [vmem:[%s541_s26 + $0x10] sm:$0xff] %vm338_vm0, %v332_v29 }
 0x123   : > { %346 = vst.msk [vmem:[%s541_s26 + $0x38] sm:$0xff] %vm338_vm0, %v337_v30 }
 0x124   : > { %339 = vst.msk [vmem:[%s541_s26] sm:$0xff] %vm338_vm0, %v330_v31 }
 0x125   : > { %v308_v35 = vpop.permute.xlu0 %307 }
 0x126   : > { %v326_v36 = vadd.f32 %v308_v35, %v273_v34  ;;  %v304_v6 = vpop.permute.xlu1 %303 }
 0x127   : > { %v324_v38 = vadd.f32 %v304_v6, %v271_v22 }
 0x128   : > { %v335_v39 = vadd.f32 %v329_v59, %v326_v36 }
 0x129   : > { %v333_v41 = vadd.f32 %v329_v59, %v324_v38 }
 0x12a   : > { %344 = vst.msk [vmem:[%s541_s26 + $0x28] sm:$0xff] %vm338_vm0, %v335_v39 }
 0x12b   : > { %342 = vst.msk [vmem:[%s541_s26 + $0x18] sm:$0xff] %vm338_vm0, %v333_v41 }
 0x12e   : > { %v310_v44 = vpop.permute.xlu1 %309 }
 0x12f   : > { %v327_v45 = vadd.f32 %v310_v44, %v274_v43 }
 0x131   : > { %v336_v46 = vadd.f32 %v329_v59, %v327_v45 }
 0x133   : > { %345 = vst.msk [vmem:[%s541_s26 + $0x30] sm:$0xff] %vm338_vm0, %v336_v46 }
 0x134 PF: > { %s12_s9 = sadd.s32 1, %s454_s9  }
 0x135   : > { %p9_p4 = scmp.ge.s32.totalorder %s12_s9, 4  }
 0x137   :  { %11 = sbr.rel (!%p9_p4) target bundleno = 1 (0x1), region = 58 }

// kernel: search_reduction_cell_forward.14
= control target key start
LH: loop header
LB: loop body
LE: loop exit
PB: predicated region body
PF: predicated region fallthrough
CT: control target
= control target key end

     0   :  { %s2289_s21 = smov 0   ;;  %s3424_s0 = inlined_call_operand.vmem [shape: f32[2,72,48], index: 0, kind: input, shape index: {}]   ;;  %s3425_s1 = inlined_call_operand.vmem [shape: f32[2,72,48], index: 1, kind: input, shape index: {}]   ;;  %s3426_s2 = inlined_call_operand.vmem [shape: f32[9,64,1], index: 2, kind: input, shape index: {}]   ;;  %s3427_s3 = inlined_call_operand.vmem [shape: bf16[3,48,16], index: 3, kind: input, shape index: {}]   ;;  %s3428_s4 = inlined_call_operand.vmem [shape: bf16[2,16,16], index: 4, kind: input, shape index: {}]   ;;  %s3429_s5 = inlined_call_operand.vmem [shape: bf16[2,64,64], index: 5, kind: output, shape index: {0}]   ;;  %s3430_s6 = inlined_call_operand.vmem [shape: f32[2,8,16], index: 6, kind: output, shape index: {1}]  }
   0x1 LB: > { %s2046_s22 = sadd.s32 4294967295, %s2246_s21   ;;  %p2050_p0 = scmp.ge.s32.totalorder %s2246_s21, 1  ;;  %s2246_s21 = sphi %s2289_s21, %s17_s21  }
   0x2   : > { %p225_p1 = scmp.lt.s32.totalorder %s2246_s21, 3 }
   0x4   : > { %p226_p2 = pnand %p2050_p0, %p225_p1 }
   0x6   : > { %229 = sbr.rel (%p226_p2) target bundleno = 1047 (0x417), region = 40 }
   0xb   : > { %v523_v0 = vld [vmem:[%s3426_s2 + $0x20] sm:$0xff]  ;;  %v521_v1 = vld [vmem:[%s3426_s2 + $0x10] sm:$0xff]  ;;  %v2248_v3 = vmov 0   ;;  %v524_v4 = vld [vmem:[%s3426_s2 + $0x28] sm:$0xff]  ;;  %p264_p3 = scmp.lt.s32.totalorder %s2046_s22, 1  ;;  %s2249_s17 = smov 112  }
   0xc   : > { %v519_v2 = vld [vmem:[%s3426_s2] sm:$0xff]  ;;  %2234 = vset.pattern.permute.xlu2 %v2248_v3  ;;  %2233 = vset.pattern.permute.xlu1 %v2248_v3  ;;  %v522_v5 = vld [vmem:[%s3426_s2 + $0x18] sm:$0xff]  ;;  %v520_v6 = vld [vmem:[%s3426_s2 + $0x8] sm:$0xff]  ;;  %s2250_s18 = smov 96   ;;  %vm340_vm0 = vcmask 392192   ;;  %vm1430_vm1 = vcmask 130048  }
   0xd   : > { %2232 = vset.pattern.permute.xlu0 %v2248_v3  ;;  %549 = vperm.xlu2 %2234, %v523_v0   ;;  %v2116_v7 = vld [vmem:[%s3426_s2 + $0x40] sm:$0xff]  ;;  %v526_v8 = vld [vmem:[%s3426_s2 + $0x38] sm:$0xff]  ;;  %v525_v9 = vld [vmem:[%s3426_s2 + $0x30] sm:$0xff]  ;;  %s3465_s22 = smov (!%p264_p3, %s2046_s22), 1  ;;  %vm1731_vm2 = vcmask 1040384   ;;  %vm1733_vm3 = vcmask 1041408  }
   0xe   : > { %539 = vperm.xlu1 %2233, %v521_v1   ;;  %529 = vperm.xlu0 %2232, %v519_v2   ;;  %v2119_v10 = vld [vmem:[%s3426_s2 + $0x58] sm:$0xff]  ;;  %v2118_v11 = vld [vmem:[%s3426_s2 + $0x50] sm:$0xff]  ;;  %v2117_v12 = vld [vmem:[%s3426_s2 + $0x48] sm:$0xff]  ;;  %s2217_s13 = smul.u32 72, %s3465_s22  ;;  %vm1735_vm4 = vcmask 1042432   ;;  %vm1737_vm5 = vcmask 1043456  }
   0xf   : > { %v2122_v13 = vld [vmem:[%s3426_s2 + $0x70] sm:$0xff]  ;;  %v2121_v14 = vld [vmem:[%s3426_s2 + $0x68] sm:$0xff]  ;;  %v2120_v15 = vld [vmem:[%s3426_s2 + $0x60] sm:$0xff]  ;;  %s2055_s14 = sshll.u32 %s3465_s22, 3  ;;  %vm1739_vm6 = vcmask 1044480   ;;  %vm1741_vm7 = vcmask 1045504  }
  0x10   : > { %v2126_v16 = vld [vmem:[%s3426_s2 + $0x90] sm:$0xff]  ;;  %v2125_v17 = vld [vmem:[%s3426_s2 + $0x88] sm:$0xff]  ;;  %v2123_v18 = vld [vmem:[%s3426_s2 + $0x78] sm:$0xff]  ;;  %s2400_s16 = scalar_lea.vmem %s3424_s0, %s2217_s13  ;;  %s2514_s27 = scalar_lea.vmem %s3425_s1, %s2217_s13  ;;  %vm1743_vm8 = vcmask 1046528   ;;  %vm1894_vm9 = vcmask 261120   ;;  %vm1939_vm10 = vcmask 519168  }
  0x11   : > { %v2129_v19 = vld [vmem:[%s3426_s2 + $0xa8] sm:$0xff]  ;;  %v2128_v20 = vld [vmem:[%s3426_s2 + $0xa0] sm:$0xff]  ;;  %v2131_v23 = vld [vmem:[%s3426_s2 + $0xb8] sm:$0xff]  ;;  %s282_s20 = scalar_lea.vmem %s3430_s6, %s2055_s14  ;;  %s2200_s23 = sshll.u32 %s3465_s22, 5 }
  0x12   : > { %v2124_v21 = vld [vmem:[%s3426_s2 + $0x80] sm:$0xff]  ;;  %v2133_v22 = vld [vmem:[%s3426_s2 + $0xc8] sm:$0xff]  ;;  %v2127_v24 = vld [vmem:[%s3426_s2 + $0x98] sm:$0xff]  ;;  %s3385_s26 = scalar_lea.vmem %s3429_s5, %s2200_s23 }
  0x13   : > { %v2136_v25 = vld [vmem:[%s3426_s2 + $0xe0] sm:$0xff]  ;;  %v2130_v27 = vld [vmem:[%s3426_s2 + $0xb0] sm:$0xff]  ;;  %v2135_v28 = vld [vmem:[%s3426_s2 + $0xd8] sm:$0xff] }
  0x14   : > { %v2132_v26 = vld [vmem:[%s3426_s2 + $0xc0] sm:$0xff]  ;;  %v2134_v29 = vld [vmem:[%s3426_s2 + $0xd0] sm:$0xff]  ;;  %v2408_v35 = vld [vmem:[%s2400_s16 + $0x18] sm:$0xff] }
  0x15   : > { %554 = vperm.xlu2 %2234, %v524_v4   ;;  %v2403_v32 = vld [vmem:[%s2400_s16] sm:$0xff]  ;;  %v2417_v40 = vld [vmem:[%s2400_s16 + $0x30] sm:$0xff]  ;;  %v2435_v50 = vld [vmem:[%s2400_s16 + $0x28] sm:$0xff] }
  0x16   : > { %544 = vperm.xlu1 %2233, %v522_v5   ;;  %534 = vperm.xlu0 %2232, %v520_v6   ;;  %v2426_v45 = vld [vmem:[%s2400_s16 + $0x10] sm:$0xff]  ;;  %v2438_v52 = vld [vmem:[%s2400_s16 + $0x8] sm:$0xff]  ;;  %v2450_v59 = vld [vmem:[%s2400_s16 + $0x20] sm:$0xff] }
  0x17   : > { %v2138_v58 = vld [vmem:[%s3426_s2 + $0xf0] sm:$0xff]  ;;  %v2141_v0 = vld [vmem:[%s3426_s2 + $0x108] sm:$0xff]  ;;  %v2460_v1 = vld [vmem:[%s2400_s16 + $0x38] sm:$0xff] }
  0x18   : > { %v2144_v6 = vld [vmem:[%s3426_s2 + $0x120] sm:$0xff] }
  0x1d   : > { %586 = vperm.xlu2 %2234, %v2116_v7  }
  0x1e   : > { %564 = vperm.xlu1 %2233, %v526_v8   ;;  %559 = vperm.xlu0 %2232, %v525_v9  }
  0x25   : > { %601 = vperm.xlu2 %2234, %v2119_v10  }
  0x26   : > { %596 = vperm.xlu1 %2233, %v2118_v11   ;;  %591 = vperm.xlu0 %2232, %v2117_v12   ;;  %v2147_v11 = vld [vmem:[%s3426_s2 + $0x138] sm:$0xff] }
  0x2d   : > { %616 = vperm.xlu2 %2234, %v2122_v13  }
  0x2e   : > { %611 = vperm.xlu1 %2233, %v2121_v14   ;;  %606 = vperm.xlu0 %2232, %v2120_v15  }
  0x35   : > { %693 = vperm.xlu2 %2234, %v2126_v16  }
  0x36   : > { %688 = vperm.xlu1 %2233, %v2125_v17   ;;  %621 = vperm.xlu0 %2232, %v2123_v18   ;;  %v2137_v17 = vld [vmem:[%s3426_s2 + $0xe8] sm:$0xff] }
  0x3d   : > { %708 = vperm.xlu2 %2234, %v2129_v19   ;;  %v2140_v19 = vld [vmem:[%s3426_s2 + $0x100] sm:$0xff] }
  0x3e   : > { %703 = vperm.xlu1 %2233, %v2128_v20   ;;  %683 = vperm.xlu0 %2232, %v2124_v21   ;;  %v2139_v20 = vld [vmem:[%s3426_s2 + $0xf8] sm:$0xff] }
  0x3f   : > { %v2143_v21 = vld [vmem:[%s3426_s2 + $0x118] sm:$0xff] }
  0x45   : > { %785 = vperm.xlu2 %2234, %v2133_v22   ;;  %v2142_v22 = vld [vmem:[%s3426_s2 + $0x110] sm:$0xff] }
  0x46   : > { %718 = vperm.xlu1 %2233, %v2131_v23   ;;  %698 = vperm.xlu0 %2232, %v2127_v24   ;;  %v2146_v23 = vld [vmem:[%s3426_s2 + $0x130] sm:$0xff]  ;;  %v2145_v24 = vld [vmem:[%s3426_s2 + $0x128] sm:$0xff] }
  0x4d   : > { %800 = vperm.xlu2 %2234, %v2136_v25  }
  0x4e   : > { %780 = vperm.xlu1 %2233, %v2132_v26   ;;  %713 = vperm.xlu0 %2232, %v2130_v27  }
  0x56   : > { %795 = vperm.xlu1 %2233, %v2135_v28   ;;  %790 = vperm.xlu0 %2232, %v2134_v29  }
  0x67   : > { %v2386_v30 = vpop.permute.xlu2 %549 }
  0x6f   : > { %v2393_v31 = vpop.permute.xlu2 %554 }
  0x77   : > { %v587_v33 = vpop.permute.xlu2 %586 }
  0x78   : > { %v624_v34 = vadd.f32 %v587_v33, %v2403_v32 }
  0x7a   : > { %640 = vrot.lane.b32.xlu1 %v624_v34, %s2249_s17 }
  0x7f   : > { %v602_v36 = vpop.permute.xlu2 %601 }
  0x80   : > { %v627_v37 = vadd.f32 %v602_v36, %v2408_v35  ;;  %v2411_v38 = vpop.permute.xlu1 %539  ;;  %v2413_v39 = vpop.permute.xlu0 %529 }
  0x82   : > { %646 = vrot.lane.b32.xlu1 %v627_v37, %s2249_s17 }
  0x87   : > { %v617_v41 = vpop.permute.xlu2 %616 }
  0x88   : > { %v630_v42 = vadd.f32 %v617_v41, %v2417_v40  ;;  %v2420_v43 = vpop.permute.xlu1 %544  ;;  %v2422_v44 = vpop.permute.xlu0 %534 }
  0x8a   : > { %652 = vrot.lane.b32.xlu1 %v630_v42, %s2249_s17 }
  0x8f   : > { %v694_v46 = vpop.permute.xlu2 %693 }
  0x90   : > { %v723_v47 = vadd.f32 %v694_v46, %v2426_v45  ;;  %v2429_v48 = vpop.permute.xlu1 %564  ;;  %v2431_v49 = vpop.permute.xlu0 %559 }
  0x92   : > { %741 = vrot.lane.b32.xlu1 %v723_v47, %s2250_s18  ;;  %v567_v47 = vadd.f32 %v2413_v39, %v2403_v32 }
  0x97   : > { %v709_v51 = vpop.permute.xlu2 %708 }
  0x98   : > { %v726_v53 = vadd.f32 %v709_v51, %v2435_v50  ;;  %v597_v54 = vpop.permute.xlu1 %596  ;;  %v592_v55 = vpop.permute.xlu0 %591  ;;  %v2517_v51 = vld [vmem:[%s2514_s27] sm:$0xff] }
  0x99   : > { %v626_v56 = vadd.f32 %v597_v54, %v2426_v45  ;;  %v625_v57 = vadd.f32 %v592_v55, %v2438_v52 }
  0x9a   : > { %747 = vrot.lane.b32.xlu1 %v726_v53, %s2250_s18  ;;  %v569_v53 = vadd.f32 %v2411_v38, %v2426_v45  ;;  %v570_v38 = vadd.f32 %v2420_v43, %v2408_v35 }
  0x9b   : > { %644 = vrot.lane.b32.xlu0 %v626_v56, %s2249_s17  ;;  %642 = vrot.lane.b32.xlu2 %v625_v57, %s2249_s17 }
  0x9f   : > { %v786_v26 = vpop.permute.xlu2 %785 }
  0xa0   : > { %v612_v60 = vpop.permute.xlu1 %611  ;;  %v607_v61 = vpop.permute.xlu0 %606 }
  0xa1   : > { %v629_v62 = vadd.f32 %v612_v60, %v2435_v50  ;;  %v628_v63 = vadd.f32 %v607_v61, %v2450_v59 }
  0xa2   : > { %810 = vperm.xlu1 %2233, %v2138_v58  }
  0xa3   : > { %650 = vrot.lane.b32.xlu0 %v629_v62, %s2249_s17  ;;  %648 = vrot.lane.b32.xlu2 %v628_v63, %s2249_s17  ;;  %v2533_v63 = vld [vmem:[%s2514_s27 + $0x18] sm:$0xff] }
  0xa7   : > { %v2503_v29 = vpop.permute.xlu2 %800 }
  0xa8   : > { %v689_v2 = vpop.permute.xlu1 %688  ;;  %v622_v3 = vpop.permute.xlu0 %621 }
  0xa9   : > { %v722_v4 = vadd.f32 %v689_v2, %v2438_v52  ;;  %v631_v5 = vadd.f32 %v622_v3, %v2460_v1 }
  0xaa   : > { %850 = vperm.xlu1 %2233, %v2141_v0   ;;  %v572_v0 = vadd.f32 %v2393_v31, %v2435_v50  ;;  %v573_v31 = vadd.f32 %v2431_v49, %v2417_v40 }
  0xab   : > { %739 = vrot.lane.b32.xlu0 %v722_v4, %s2250_s18  ;;  %654 = vrot.lane.b32.xlu2 %v631_v5, %s2249_s17 }
  0xb0   : > { %v704_v7 = vpop.permute.xlu1 %703  ;;  %v684_v8 = vpop.permute.xlu0 %683 }
  0xb1   : > { %v725_v9 = vadd.f32 %v704_v7, %v2450_v59  ;;  %v721_v10 = vadd.f32 %v684_v8, %v2403_v32 }
  0xb2   : > { %865 = vperm.xlu1 %2233, %v2144_v6  }
  0xb3   : > { %745 = vrot.lane.b32.xlu0 %v725_v9, %s2250_s18  ;;  %737 = vrot.lane.b32.xlu2 %v721_v10, %s2250_s18  ;;  %v568_v10 = vadd.f32 %v2422_v44, %v2438_v52 }
  0xb8   : > { %v719_v12 = vpop.permute.xlu1 %718  ;;  %v699_v13 = vpop.permute.xlu0 %698 }
  0xb9   : > { %v728_v14 = vadd.f32 %v719_v12, %v2460_v1  ;;  %v724_v15 = vadd.f32 %v699_v13, %v2408_v35  ;;  %v2554_v12 = vld [vmem:[%s2514_s27 + $0x30] sm:$0xff] }
  0xba   : > { %880 = vperm.xlu1 %2233, %v2147_v11   ;;  %v2551_v11 = vld [vmem:[%s2514_s27 + $0x8] sm:$0xff] }
  0xbb   : > { %751 = vrot.lane.b32.xlu0 %v728_v14, %s2250_s18  ;;  %743 = vrot.lane.b32.xlu2 %v724_v15, %s2250_s18 }
  0xc0   : > { %v714_v16 = vpop.permute.xlu0 %713  ;;  %v781_v25 = vpop.permute.xlu1 %780 }
  0xc1   : > { %v727_v18 = vadd.f32 %v714_v16, %v2417_v40  ;;  %v2522_v58 = vadd.f32 %v781_v25, %v2517_v51 }
  0xc3   : > { %805 = vperm.xlu0 %2232, %v2137_v17   ;;  %749 = vrot.lane.b32.xlu2 %v727_v18, %s2250_s18 }
  0xc8   : > { %v796_v27 = vpop.permute.xlu1 %795  ;;  %v2505_v42 = vpop.permute.xlu0 %790 }
  0xc9   : > { %v2538_v6 = vadd.f32 %v796_v27, %v2533_v63 }
  0xcb   : > { %845 = vperm.xlu0 %2232, %v2140_v19   ;;  %815 = vperm.xlu2 %2234, %v2139_v20   ;;  %v2558_v19 = vadd.f32 %v786_v26, %v2551_v11 }
  0xd3   : > { %860 = vperm.xlu0 %2232, %v2143_v21   ;;  %855 = vperm.xlu2 %2234, %v2142_v22  }
  0xdb   : > { %875 = vperm.xlu0 %2232, %v2146_v23   ;;  %870 = vperm.xlu2 %2234, %v2145_v24   ;;  %v571_v23 = vadd.f32 %v2386_v30, %v2450_v59  ;;  %v2572_v24 = vld [vmem:[%s2514_s27 + $0x20] sm:$0xff]  ;;  %v2582_v30 = vld [vmem:[%s2514_s27 + $0x10] sm:$0xff] }
  0xec   : > { %v641_v28 = vpop.permute.xlu1 %640 }
  0xed   : > { %v664_v54 = vmax.f32 %v567_v47, %v641_v28 }
  0xf4   : > { %v647_v33 = vpop.permute.xlu1 %646 }
  0xf5   : > { %v643_v34 = vpop.permute.xlu2 %642  ;;  %v667_v2 = vmax.f32 %v570_v38, %v647_v33  ;;  %v2590_v38 = vld [vmem:[%s2514_s27 + $0x28] sm:$0xff] }
  0xf6   : > { %v665_v13 = vmax.f32 %v568_v10, %v643_v34 }
  0xfc   : > { %v653_v36 = vpop.permute.xlu1 %652 }
  0xfd   : > { %v649_v37 = vpop.permute.xlu2 %648  ;;  %v670_v14 = vmax.f32 %v573_v31, %v653_v36  ;;  %v574_v36 = vadd.f32 %v2429_v48, %v2460_v1  ;;  %v2148_v31 = vld [vmem:[%s3426_s2 + $0x140] sm:$0xff] }
  0xfe   : > { %v668_v25 = vmax.f32 %v571_v23, %v649_v37  ;;  %v2155_v23 = vld [vmem:[%s3426_s2 + $0x178] sm:$0xff] }
 0x104   : > { %v742_v41 = vpop.permute.xlu1 %741 }
 0x105   : > { %v655_v46 = vpop.permute.xlu2 %654 }
 0x106   : > { %v671_v47 = vmax.f32 %v574_v36, %v655_v46  ;;  %v2150_v46 = vld [vmem:[%s3426_s2 + $0x150] sm:$0xff] }
 0x10c   : > { %v748_v55 = vpop.permute.xlu1 %747 }
 0x10d   : > { %v645_v56 = vpop.permute.xlu0 %644  ;;  %v738_v57 = vpop.permute.xlu2 %737 }
 0x10e   : > { %v666_v39 = vmax.f32 %v569_v53, %v645_v56  ;;  %v2524_v60 = vmax.f32 %v664_v54, %v738_v57 }
 0x110   : > { %v2526_v61 = vmax.f32 %v666_v39, %v742_v41  ;;  %v826_v62 = vmax.f32 %v2524_v60, %v2522_v58  ;;  %v2579_v41 = vld [vmem:[%s2514_s27 + $0x38] sm:$0xff] }
 0x114   : > { %v811_v3 = vpop.permute.xlu1 %810 }
 0x115   : > { %v651_v4 = vpop.permute.xlu0 %650  ;;  %v744_v5 = vpop.permute.xlu2 %743  ;;  %v2561_v44 = vadd.f32 %v811_v3, %v2554_v12 }
 0x116   : > { %v669_v7 = vmax.f32 %v572_v0, %v651_v4  ;;  %v2540_v8 = vmax.f32 %v667_v2, %v744_v5 }
 0x118   : > { %v2542_v9 = vmax.f32 %v669_v7, %v748_v55  ;;  %v829_v43 = vmax.f32 %v2540_v8, %v2538_v6  ;;  %v2153_v7 = vld [vmem:[%s3426_s2 + $0x168] sm:$0xff] }
 0x11c   : > { %v851_v15 = vpop.permute.xlu1 %850 }
 0x11d   : > { %v740_v16 = vpop.permute.xlu0 %739  ;;  %v750_v17 = vpop.permute.xlu2 %749  ;;  %v884_v18 = vadd.f32 %v851_v15, %v2551_v11 }
 0x11e   : > { %v762_v49 = vmax.f32 %v665_v13, %v740_v16  ;;  %v2563_v20 = vmax.f32 %v670_v14, %v750_v17  ;;  %v2154_v17 = vld [vmem:[%s3426_s2 + $0x170] sm:$0xff] }
 0x11f   : > { %901 = vrot.lane.b32.xlu0 %v884_v18, %s2249_s17 }
 0x120   : > { %v827_v21 = vmax.f32 %v762_v49, %v2558_v19  ;;  %v832_v22 = vmax.f32 %v2563_v20, %v2561_v44  ;;  %v2149_v19 = vld [vmem:[%s3426_s2 + $0x148] sm:$0xff]  ;;  %v2152_v49 = vld [vmem:[%s3426_s2 + $0x160] sm:$0xff] }
 0x121   : > { %v2156_v44 = vld [vmem:[%s3426_s2 + $0x180] sm:$0xff] }
 0x124   : > { %v866_v26 = vpop.permute.xlu1 %865 }
 0x125   : > { %v746_v27 = vpop.permute.xlu0 %745  ;;  %v816_v28 = vpop.permute.xlu2 %815  ;;  %v887_v33 = vadd.f32 %v866_v26, %v2572_v24 }
 0x126   : > { %v765_v34 = vmax.f32 %v668_v25, %v746_v27  ;;  %v825_v56 = vadd.f32 %v816_v28, %v2579_v41  ;;  %v822_v27 = vadd.f32 %v2503_v29, %v2572_v24 }
 0x127   : > { %907 = vrot.lane.b32.xlu0 %v887_v33, %s2249_s17 }
 0x128   : > { %v830_v28 = vmax.f32 %v765_v34, %v822_v27  ;;  %v1395_v27 = vmax.f32 %v2438_v52, 0.0 }
 0x12c   : > { %v881_v53 = vpop.permute.xlu1 %880 }
 0x12d   : > { %v752_v54 = vpop.permute.xlu0 %751  ;;  %v856_v37 = vpop.permute.xlu2 %855  ;;  %v890_v55 = vadd.f32 %v881_v53, %v2579_v41 }
 0x12e   : > { %v768_v57 = vmax.f32 %v671_v47, %v752_v54  ;;  %v885_v39 = vadd.f32 %v856_v37, %v2582_v30  ;;  %v820_v54 = vadd.f32 %v2505_v42, %v2582_v30 }
 0x12f   : > { %913 = vrot.lane.b32.xlu0 %v890_v55, %s2249_s17 }
 0x130   : > { %903 = vrot.lane.b32.xlu1 %v885_v39, %s2249_s17  ;;  %v833_v48 = vmax.f32 %v768_v57, %v825_v56 }
 0x135   : > { %v806_v0 = vpop.permute.xlu0 %805  ;;  %v871_v2 = vpop.permute.xlu2 %870 }
 0x136   : > { %v823_v3 = vadd.f32 %v806_v0, %v2590_v38  ;;  %v888_v4 = vadd.f32 %v871_v2, %v2590_v38 }
 0x137   : > { %952 = vperm.xlu0 %2232, %v2150_v46  }
 0x138   : > { %909 = vrot.lane.b32.xlu1 %v888_v4, %s2249_s17  ;;  %v831_v5 = vmax.f32 %v2542_v9, %v823_v3  ;;  %v2151_v9 = vld [vmem:[%s3426_s2 + $0x158] sm:$0xff]  ;;  %v2158_v4 = vld [vmem:[%s3426_s2 + $0x190] sm:$0xff] }
 0x13d   : > { %v846_v10 = vpop.permute.xlu0 %845 }
 0x13e   : > { %v883_v13 = vadd.f32 %v846_v10, %v2517_v51  ;;  %v2675_v10 = vld [vmem:[%s2400_s16 + $0x40] sm:$0xff] }
 0x13f   : > { %967 = vperm.xlu0 %2232, %v2153_v7  }
 0x140   : > { %899 = vrot.lane.b32.xlu2 %v883_v13, %s2249_s17  ;;  %942 = vperm.xlu1 %2233, %v2148_v31  }
 0x145   : > { %v861_v14 = vpop.permute.xlu0 %860 }
 0x146   : > { %v886_v15 = vadd.f32 %v861_v14, %v2533_v63  ;;  %v1401_v14 = vmax.f32 %v2460_v1, 0.0 }
 0x148   : > { %905 = vrot.lane.b32.xlu2 %v886_v15, %s2249_s17  ;;  %957 = vperm.xlu1 %2233, %v2151_v9   ;;  %v1402_v9 = vmax.f32 %v2675_v10, 0.0  ;;  %v2160_v15 = vld [vmem:[%s3426_s2 + $0x1a0] sm:$0xff] }
 0x14d   : > { %v876_v16 = vpop.permute.xlu0 %875 }
 0x14e   : > { %v889_v18 = vadd.f32 %v876_v16, %v2554_v12  ;;  %v1406_v16 = vpack.c.bf16 %v1402_v9, %v1401_v14  ;;  %v2208_v14 = vld [vmem:[%s3427_s3 + $0x38] sm:$0xff]  ;;  %v2168_v9 = vld [vmem:[%s3426_s2 + $0x1e0] sm:$0xff] }
 0x150   : > { %911 = vrot.lane.b32.xlu2 %v889_v18, %s2249_s17  ;;  %972 = vperm.xlu1 %2233, %v2154_v17   ;;  %v2157_v17 = vld [vmem:[%s3426_s2 + $0x188] sm:$0xff]  ;;  %v1383_v18 = vmax.f32 %v2517_v51, 0.0 }
 0x158   : > { %947 = vperm.xlu2 %2234, %v2149_v19   ;;  %v1384_v19 = vmax.f32 %v2551_v11, 0.0 }
 0x160   : > { %962 = vperm.xlu2 %2234, %v2152_v49   ;;  %v2162_v49 = vld [vmem:[%s3426_s2 + $0x1b0] sm:$0xff] }
 0x168   : > { %977 = vperm.xlu2 %2234, %v2155_v23   ;;  %v1391_v23 = vpack.c.bf16 %v1384_v19, %v1383_v18  ;;  %v441_v18 = vpack.c.bf16 %v2426_v45, %v2438_v52  ;;  %v2171_v19 = vld [vmem:[%s3426_s2 + $0x1f8] sm:$0xff] }
 0x191   : > { %v902_v25 = vpop.permute.xlu0 %901 }
 0x192   : > { %v2626_v26 = vmax.f32 %v827_v21, %v902_v25  ;;  %v828_v21 = vmax.f32 %v2526_v61, %v820_v54  ;;  %v2159_v25 = vld [vmem:[%s3426_s2 + $0x198] sm:$0xff] }
 0x199   : > { %v908_v33 = vpop.permute.xlu0 %907 }
 0x19a   : > { %v900_v36 = vpop.permute.xlu2 %899  ;;  %v2630_v47 = vmax.f32 %v830_v28, %v908_v33  ;;  %v1396_v28 = vmax.f32 %v2426_v45, 0.0  ;;  %v1385_v33 = vmax.f32 %v2582_v30, 0.0 }
 0x19b   : > { %v2635_v53 = vmax.f32 %v826_v62, %v900_v36  ;;  %v1386_v36 = vmax.f32 %v2533_v63, 0.0 }
 0x19c   : > { %v1403_v54 = vpack.c.bf16 %v1396_v28, %v1395_v27  ;;  %v313_v28 = vpack.c.bf16 %v2590_v38, %v2572_v24 }
 0x1a1   : > { %v914_v37 = vpop.permute.xlu0 %913 }
 0x1a2   : > { %v906_v55 = vpop.permute.xlu2 %905  ;;  %v2640_v56 = vmax.f32 %v833_v48, %v914_v37  ;;  %v904_v29 = vpop.permute.xlu1 %903  ;;  %v1392_v37 = vpack.c.bf16 %v1386_v36, %v1385_v33  ;;  %v442_v33 = vpack.c.bf16 %v2450_v59, %v2408_v35 }
 0x1a3   : > { %v2645_v34 = vmax.f32 %v829_v43, %v906_v55  ;;  %v2647_v57 = vmax.f32 %v828_v21, %v904_v29  ;;  %v2161_v21 = vld [vmem:[%s3426_s2 + $0x1a8] sm:$0xff]  ;;  %v1389_v55 = vmax.f32 %v2554_v12, 0.0  ;;  %v1390_v29 = vmax.f32 %v2579_v41, 0.0 }
 0x1a9   : > { %v953_v58 = vpop.permute.xlu0 %952 }
 0x1aa   : > { %v912_v60 = vpop.permute.xlu2 %911  ;;  %v982_v62 = vadd.f32 %v953_v58, %v2582_v30  ;;  %v910_v39 = vpop.permute.xlu1 %909  ;;  %v1387_v58 = vmax.f32 %v2572_v24, 0.0 }
 0x1ab   : > { %v2653_v42 = vmax.f32 %v832_v22, %v912_v60  ;;  %v2655_v61 = vmax.f32 %v831_v5, %v910_v39  ;;  %v1388_v60 = vmax.f32 %v2590_v38, 0.0  ;;  %v1394_v39 = vpack.c.bf16 %v1390_v29, %v1389_v55 }
 0x1ac   : > { %1000 = vrot.lane.b32.xlu2 %v982_v62, %s2250_s18  ;;  %v2206_v62 = vld [vmem:[%s3427_s3 + $0x28] sm:$0xff] }
 0x1ad   : > { %358 = vmatpush.bf16.msra.mxu0 %v2206_v62  ;;  %2212 = vmatpush.bf16.msra.mxu1 %v2206_v62 }
 0x1b1   : > { %v968_v48 = vpop.permute.xlu0 %967 }
 0x1b2   : > { %v948_v6 = vpop.permute.xlu2 %947  ;;  %v985_v8 = vadd.f32 %v968_v48, %v2590_v38  ;;  %v943_v43 = vpop.permute.xlu1 %942  ;;  %v1393_v48 = vpack.c.bf16 %v1388_v60, %v1387_v58 }
 0x1b3   : > { %v981_v46 = vadd.f32 %v948_v6, %v2551_v11  ;;  %v980_v0 = vadd.f32 %v943_v43, %v2517_v51  ;;  %v2163_v6 = vld [vmem:[%s3426_s2 + $0x1b8] sm:$0xff]  ;;  %v1400_v43 = vmax.f32 %v2417_v40, 0.0 }
 0x1b4   : > { %1006 = vrot.lane.b32.xlu2 %v985_v8, %s2250_s18  ;;  %v1399_v8 = vmax.f32 %v2435_v50, 0.0 }
 0x1b5   : > { %998 = vrot.lane.b32.xlu1 %v981_v46, %s2250_s18  ;;  %996 = vrot.lane.b32.xlu0 %v980_v0, %s2250_s18  ;;  %v2205_v46 = vld [vmem:[%s3427_s3 + $0x20] sm:$0xff] }
 0x1b6   : > { %v1405_v0 = vpack.c.bf16 %v1400_v43, %v1399_v8  ;;  %359 = vmatpush.bf16.msra.mxu0 %v2205_v46  ;;  %2213 = vmatpush.bf16.msra.mxu1 %v2205_v46  ;;  %v444_v46 = vpack.c.bf16 %v2675_v10, %v2460_v1 }
 0x1ba   : > { %v963_v20 = vpop.permute.xlu2 %962  ;;  %v958_v22 = vpop.permute.xlu1 %957 }
 0x1bb   : > { %v984_v2 = vadd.f32 %v963_v20, %v2572_v24  ;;  %v983_v3 = vadd.f32 %v958_v22, %v2533_v63  ;;  %v2164_v20 = vld [vmem:[%s3426_s2 + $0x1c0] sm:$0xff]  ;;  %v2204_v22 = vld [vmem:[%s3427_s3 + $0x18] sm:$0xff] }
 0x1bc   : > { %1039 = vperm.xlu2 %2234, %v2156_v44   ;;  %v2166_v44 = vld [vmem:[%s3426_s2 + $0x1d0] sm:$0xff]  ;;  %360 = vmatpush.bf16.msra.mxu0 %v2204_v22 }
 0x1bd   : > { %1004 = vrot.lane.b32.xlu1 %v984_v2, %s2250_s18  ;;  %1002 = vrot.lane.b32.xlu0 %v983_v3, %s2250_s18  ;;  %v1397_v2 = vmax.f32 %v2408_v35, 0.0  ;;  %v1398_v3 = vmax.f32 %v2450_v59, 0.0 }
 0x1be   : > { %2214 = vmatpush.bf16.msra.mxu1 %v2204_v22 }
 0x1c2   : > { %v978_v5 = vpop.permute.xlu2 %977  ;;  %v973_v7 = vpop.permute.xlu1 %972 }
 0x1c3   : > { %v987_v31 = vadd.f32 %v978_v5, %v2579_v41  ;;  %v986_v13 = vadd.f32 %v973_v7, %v2554_v12  ;;  %v2209_v5 = vld [vmem:[%s3427_s3 + $0x40] sm:$0xff]  ;;  %v2169_v7 = vld [vmem:[%s3426_s2 + $0x1e8] sm:$0xff] }
 0x1c4   : > { %1049 = vperm.xlu2 %2234, %v2158_v4   ;;  %v311_v4 = vpack.c.bf16 %v2551_v11, %v2517_v51  ;;  %487 = vmatpush.bf16.msra.mxu2 %v2209_v5 }
 0x1c5   : > { %1010 = vrot.lane.b32.xlu1 %v987_v31, %s2250_s18  ;;  %1008 = vrot.lane.b32.xlu0 %v986_v13, %s2250_s18  ;;  %v1404_v31 = vpack.c.bf16 %v1398_v3, %v1397_v2  ;;  %v2165_v13 = vld [vmem:[%s3426_s2 + $0x1c8] sm:$0xff] }
 0x1c6   : > { %2074 = vmatmul.msk.bf16.vlgmr.msra.gmra.mxu0 %vm340_vm0, %v311_v4 }
 0x1c8   : > { %488 = vmatpush.bf16.msra.mxu2 %v2208_v14 }
 0x1cc   : > { %1059 = vperm.xlu2 %2234, %v2160_v15   ;;  %v2167_v15 = vld [vmem:[%s3426_s2 + $0x1d8] sm:$0xff] }
 0x1cd   : > { %1044 = vperm.xlu1 %2233, %v2157_v17   ;;  %1422 = vrot.lane.b32.xlu0 %v1406_v16, %s2250_s18  ;;  %v2207_v16 = vld [vmem:[%s3427_s3 + $0x30] sm:$0xff]  ;;  %v312_v17 = vpack.c.bf16 %v2533_v63, %v2582_v30 }
 0x1ce   : > { %489 = vmatpush.bf16.msra.mxu2 %v2207_v16 }
 0x1d1   : > { %2112 = vmatmul.msk.bf16.vlgmr.msra.gmra.mxu2 %vm340_vm0, %v441_v18 }
 0x1d4   : > { %1069 = vperm.xlu2 %2234, %v2162_v49   ;;  %v2170_v49 = vld [vmem:[%s3426_s2 + $0x1f0] sm:$0xff] }
 0x1d5   : > { %1054 = vperm.xlu1 %2233, %v2159_v25   ;;  %1476 = vrot.lane.b32.xlu0 %v1391_v23, %s2249_s17 }
 0x1d6   : > { %2075 = vmatmul.msk.bf16.gmra.mxu0 %vm340_vm0, %v312_v17 }
 0x1dc   : > { %1416 = vrot.lane.b32.xlu2 %v1403_v54, %s2250_s18 }
 0x1dd   : > { %1478 = vrot.lane.b32.xlu1 %v1392_v37, %s2249_s17  ;;  %1064 = vperm.xlu0 %2232, %v2161_v21   ;;  %v443_v21 = vpack.c.bf16 %v2417_v40, %v2435_v50 }
 0x1e1   : > { %2113 = vmatmul.msk.bf16.gmra.mxu2 %vm340_vm0, %v442_v33  ;;  %v314_v33 = vpack.c.bf16 %v2579_v41, %v2554_v12 }
 0x1e3   : > { %2077 = vmatmul.msk.bf16.vlgmr.msra.gmra.mxu1 %vm340_vm0, %v314_v33 }
 0x1e4   : > { %1482 = vrot.lane.b32.xlu2 %v1394_v39, %s2249_s17 }
 0x1e5   : > { %1480 = vrot.lane.b32.xlu1 %v1393_v48, %s2249_s17  ;;  %1074 = vperm.xlu0 %2232, %v2163_v6   ;;  %v2210_v6 = vld [vmem:[%s3428_s4] sm:$0xff] }
 0x1e6   : > { %2076 = vmatmul.msk.bf16.gmra.mxu0 %vm340_vm0, %v313_v28 }
 0x1ec   : > { %1114 = vperm.xlu2 %2234, %v2166_v44  }
 0x1ed   : > { %1420 = vrot.lane.b32.xlu1 %v1405_v0, %s2250_s18  ;;  %1104 = vperm.xlu0 %2232, %v2164_v20  }
 0x1f1   : > { %2114 = vmatmul.msk.bf16.gmra.mxu2 %vm340_vm0, %v443_v21 }
 0x1f4   : > { %1129 = vperm.xlu2 %2234, %v2169_v7  }
 0x1f5   : > { %1109 = vperm.xlu1 %2233, %v2165_v13   ;;  %1418 = vrot.lane.b32.xlu0 %v1404_v31, %s2250_s18 }
 0x1fd   : > { %1124 = vperm.xlu1 %2233, %v2168_v9   ;;  %1119 = vperm.xlu0 %2232, %v2167_v15  }
 0x201   : > { %2115 = vmatmul.msk.bf16.gmra.mxu2 %vm340_vm0, %v444_v46  ;;  %v2178_v46 = vld [vmem:[%s3426_s2 + $0x230] sm:$0xff] }
 0x205   : > { %1139 = vperm.xlu1 %2233, %v2171_v19   ;;  %1134 = vperm.xlu0 %2232, %v2170_v49  }
 0x206   : > { %v1001_v23 = vpop.permute.xlu2 %1000 }
 0x207   : > { %v1022_v25 = vmax.f32 %v2647_v57, %v1001_v23  ;;  %v2211_v57 = vld [vmem:[%s3428_s4 + $0x8] sm:$0xff] }
 0x208   : > { %1450 = vmatpush.bf16.msrb.mxu0 %v2211_v57  ;;  %2216 = vmatpush.bf16.msra.mxu3 %v2211_v57 }
 0x209   : > { %2215 = vmatpush.bf16.msrb.mxu2 %v2211_v57  ;;  %v2172_v57 = vld [vmem:[%s3426_s2 + $0x200] sm:$0xff] }
 0x20c   : > { %1509 = vmatpush.bf16.msrb.mxu3 %v2210_v6  ;;  %v2201_v6 = vld [vmem:[%s3427_s3] sm:$0xff] }
 0x20e   : > { %v2775_v27 = vpop.permute.xlu2 %1006 }
 0x20f   : > { %v1025_v36 = vmax.f32 %v2655_v61, %v2775_v27 }
 0x216   : > { %v1040_v54 = vpop.permute.xlu2 %1039 }
 0x217   : > { %v1077_v62 = vadd.f32 %v1040_v54, %v2438_v52 }
 0x21e   : > { %v1050_v37 = vpop.permute.xlu2 %1049 }
 0x21f   : > { %v1079_v55 = vadd.f32 %v1050_v37, %v2408_v35 }
 0x221   : > { %v2792_v61 = vmax.f32 %v1022_v25, %v1079_v55 }
 0x226   : > { %v1060_v29 = vpop.permute.xlu2 %1059 }
 0x227   : > { %v997_v58 = vpop.permute.xlu0 %996  ;;  %v999_v60 = vpop.permute.xlu1 %998  ;;  %v1081_v20 = vadd.f32 %v1060_v29, %v2435_v50  ;;  %v2203_v29 = vld [vmem:[%s3427_s3 + $0x10] sm:$0xff] }
 0x228   : > { %v1020_v39 = vmax.f32 %v2635_v53, %v997_v58  ;;  %v1021_v48 = vmax.f32 %v2626_v26, %v999_v60  ;;  %417 = vmatpush.bf16.msrb.mxu1 %v2203_v29  ;;  %v2175_v60 = vld [vmem:[%s3426_s2 + $0x218] sm:$0xff] }
 0x22a   : > { %v2800_v8 = vmax.f32 %v1020_v39, %v1077_v62 }
 0x22e   : > { %v1070_v43 = vpop.permute.xlu2 %1069 }
 0x22f   : > { %v1003_v0 = vpop.permute.xlu0 %1002  ;;  %v1005_v44 = vpop.permute.xlu1 %1004  ;;  %v1083_v5 = vadd.f32 %v1070_v43, %v2460_v1  ;;  %v301_v43 = vpack.c.bf16 %v2438_v52, %v2403_v32 }
 0x230   : > { %v1023_v22 = vmax.f32 %v2645_v34, %v1003_v0  ;;  %v1024_v53 = vmax.f32 %v2630_v47, %v1005_v44 }
 0x232   : > { %v2808_v26 = vmax.f32 %v1024_v53, %v1081_v20 }
 0x234   : > { %3439 = vst [vmem:[#allocation2_spill] sm:$0xff] %v2808_v26 }
 0x236   : > { %v1417_v2 = vpop.permute.xlu2 %1416 }
 0x237   : > { %v1009_v3 = vpop.permute.xlu0 %1008  ;;  %v1011_v4 = vpop.permute.xlu1 %1010  ;;  %2186 = vmatmul.msk.bf16.vlgmr.msrb.gmra.mxu0 %vm1430_vm1, %v1417_v2 }
 0x238   : > { %v1026_v7 = vmax.f32 %v2653_v42, %v1009_v3  ;;  %v1027_v31 = vmax.f32 %v2640_v56, %v1011_v4  ;;  %v302_v4 = vpack.c.bf16 %v2408_v35, %v2426_v45 }
 0x23a   : > { %v2814_v13 = vmax.f32 %v1026_v7, %v1083_v5 }
 0x23c   : > { %3440 = vst [vmem:[#allocation3_spill] sm:$0xff] %v2814_v13 }
 0x23e   : > { %v2816_v34 = vpop.permute.xlu2 %1482 }
 0x23f   : > { %v1423_v47 = vpop.permute.xlu0 %1422  ;;  %v1045_v14 = vpop.permute.xlu1 %1044 }
 0x240   : > { %v1078_v9 = vadd.f32 %v1045_v14, %v2426_v45  ;;  %2189 = vmatmul.msk.bf16.vlgmr.msra.gmra.mxu3 %vm1430_vm1, %v1423_v47  ;;  %v2173_v14 = vld [vmem:[%s3426_s2 + $0x208] sm:$0xff] }
 0x242   : > { %v2820_v15 = vmax.f32 %v1021_v48, %v1078_v9  ;;  %v2174_v9 = vld [vmem:[%s3426_s2 + $0x210] sm:$0xff] }
 0x246   : > { %v1115_v16 = vpop.permute.xlu2 %1114 }
 0x247   : > { %v1144_v17 = vadd.f32 %v1115_v16, %v2408_v35  ;;  %v1477_v18 = vpop.permute.xlu0 %1476  ;;  %v1055_v19 = vpop.permute.xlu1 %1054  ;;  %v303_v16 = vpack.c.bf16 %v2435_v50, %v2450_v59 }
 0x248   : > { %v1080_v42 = vadd.f32 %v1055_v19, %v2450_v59  ;;  %v304_v19 = vpack.c.bf16 %v2460_v1, %v2417_v40 }
 0x249   : > { %1162 = vrot.lane.b32.xlu1 %v1144_v17, %s2249_s17  ;;  %v2176_v17 = vld [vmem:[%s3426_s2 + $0x220] sm:$0xff] }
 0x24a   : > { %v2825_v56 = vmax.f32 %v1023_v22, %v1080_v42  ;;  %v2902_v42 = vpop.f32.mrf.mxu0 }
 0x24e   : > { %v1130_v49 = vpop.permute.xlu2 %1129 }
 0x24f   : > { %v1147_v23 = vadd.f32 %v1130_v49, %v2417_v40  ;;  %v1065_v25 = vpop.permute.xlu0 %1064  ;;  %v1479_v27 = vpop.permute.xlu1 %1478 }
 0x250   : > { %v1082_v28 = vadd.f32 %v1065_v25, %v2417_v40  ;;  %2194 = vmatmul.msk.bf16.vlgmr.msrb.gmra.mxu3 %vm1430_vm1, %v1477_v18  ;;  %v2177_v18 = vld [vmem:[%s3426_s2 + $0x228] sm:$0xff] }
 0x251   : > { %1168 = vrot.lane.b32.xlu1 %v1147_v23, %s2249_s17 }
 0x252   : > { %v2833_v54 = vmax.f32 %v1025_v36, %v1082_v28  ;;  %v2202_v36 = vld [vmem:[%s3427_s3 + $0x8] sm:$0xff]  ;;  %v2906_v23 = vpop.f32.mrf.mxu0 }
 0x253   : > { %418 = vmatpush.bf16.msrb.mxu1 %v2202_v36 }
 0x254   : > { %v2904_v49 = vpop.f32.mrf.mxu2 }
 0x257   : > { %v1075_v37 = vpop.permute.xlu0 %1074  ;;  %v1481_v21 = vpop.permute.xlu1 %1480  ;;  %419 = vmatpush.bf16.msrb.mxu1 %v2201_v6 }
 0x258   : > { %v1084_v55 = vadd.f32 %v1075_v37, %v2675_v10  ;;  %v2235_v37 = vld [vmem:[%s2400_s16 + $0x18] sm:$0xff] }
 0x259   : > { %1201 = vperm.xlu1 %2233, %v2172_v57  }
 0x25a   : > { %v2843_v58 = vmax.f32 %v1027_v31, %v1084_v55  ;;  %2090 = vmatmul.msk.bf16.vlgmr.msrb.gmra.mxu1 %vm340_vm0, %v301_v43 }
 0x25c   : > { %3441 = vst [vmem:[#allocation4_spill] sm:$0xff] %v2843_v58  ;;  %v2908_v25 = vpop.f32.mrf.mxu2 }
 0x25f   : > { %v1105_v62 = vpop.permute.xlu0 %1104  ;;  %v1421_v39 = vpop.permute.xlu1 %1420 }
 0x260   : > { %v1142_v48 = vadd.f32 %v1105_v62, %v2438_v52  ;;  %2188 = vmatmul.msk.bf16.vlgmr.msrb.gmra.mxu2 %vm1430_vm1, %v1421_v39  ;;  %2195 = vmatmul.msk.bf16.gmra.mxu3 %vm1430_vm1, %v1479_v27  ;;  %v2910_v27 = vpop.f32.mrf.mxu0 }
 0x261   : > { %1216 = vperm.xlu1 %2233, %v2175_v60  }
 0x262   : > { %1158 = vrot.lane.b32.xlu2 %v1142_v48, %s2249_s17 }
 0x264   : > { %v2912_v28 = vpop.f32.mrf.mxu2 }
 0x267   : > { %v1419_v0 = vpop.permute.xlu0 %1418  ;;  %v1110_v44 = vpop.permute.xlu1 %1109 }
 0x268   : > { %v1143_v20 = vadd.f32 %v1110_v44, %v2426_v45  ;;  %2187 = vmatmul.msk.bf16.gmra.mxu0 %vm1430_vm1, %v1419_v0  ;;  %v2922_v55 = vpop.f32.mrf.mxu0 }
 0x269   : > { %1231 = vperm.xlu1 %2233, %v2178_v46  }
 0x26a   : > { %1160 = vrot.lane.b32.xlu0 %v1143_v20, %s2249_s17  ;;  %2091 = vmatmul.msk.bf16.gmra.mxu1 %vm340_vm0, %v302_v4  ;;  %v2949_v4 = vpop.f32.mrf.mxu1 }
 0x26c   : > { %v2928_v60 = vpop.f32.mrf.mxu2 }
 0x26f   : > { %v1120_v22 = vpop.permute.xlu0 %1119  ;;  %v1125_v53 = vpop.permute.xlu1 %1124 }
 0x270   : > { %v1145_v2 = vadd.f32 %v1120_v22, %v2450_v59  ;;  %v1146_v3 = vadd.f32 %v1125_v53, %v2435_v50  ;;  %2196 = vmatmul.msk.bf16.gmra.mxu3 %vm1430_vm1, %v1481_v21  ;;  %v2932_v39 = vpop.f32.mrf.mxu0 }
 0x272   : > { %1164 = vrot.lane.b32.xlu2 %v1145_v2, %s2249_s17  ;;  %1166 = vrot.lane.b32.xlu0 %v1146_v3, %s2249_s17 }
 0x274   : > { %v2941_v44 = vpop.f32.mrf.mxu2 }
 0x277   : > { %v1135_v5 = vpop.permute.xlu0 %1134  ;;  %v1140_v7 = vpop.permute.xlu1 %1139 }
 0x278   : > { %v1148_v31 = vadd.f32 %v1135_v5, %v2460_v1  ;;  %v1149_v47 = vadd.f32 %v1140_v7, %v2675_v10  ;;  %v2944_v20 = vpop.f32.mrf.mxu0  ;;  %v1289_v7 = vadd.f32 %v2582_v30, %v2426_v45  ;;  %v1292_v30 = vadd.f32 %v2590_v38, %v2435_v50 }
 0x27a   : > { %1170 = vrot.lane.b32.xlu2 %v1148_v31, %s2249_s17  ;;  %1172 = vrot.lane.b32.xlu0 %v1149_v47, %s2249_s17  ;;  %v2959_v47 = vadd.f32 %v1289_v7, %v2408_v35 }
 0x27b   : > { %2092 = vmatmul.msk.bf16.gmra.mxu1 %vm340_vm0, %v303_v16 }
 0x27c   : > { %v2956_v31 = vpop.f32.mrf.mxu2 }
 0x280   : > { %2197 = vmatmul.msk.bf16.gmra.mxu3 %vm1430_vm1, %v2816_v34  ;;  %v2179_v34 = vld [vmem:[%s3426_s2 + $0x238] sm:$0xff] }
 0x282   : > { %1206 = vperm.xlu2 %2234, %v2173_v14   ;;  %1211 = vperm.xlu0 %2232, %v2174_v9  }
 0x28a   : > { %1221 = vperm.xlu2 %2234, %v2176_v17   ;;  %1226 = vperm.xlu0 %2232, %v2177_v18  }
 0x28b   : > { %2093 = vmatmul.msk.bf16.gmra.mxu1 %vm340_vm0, %v304_v19  ;;  %v2966_v19 = vpop.f32.mrf.mxu1 }
 0x292   : > { %1236 = vperm.xlu2 %2234, %v2179_v34  }
 0x2b4   : > { %v1452_v17 = vpop.f32.mrf.mxu0 }
 0x2bb   : > { %v2914_v33 = vpop.permute.xlu1 %1162 }
 0x2bc   : > { %v2916_v57 = vpop.permute.xlu2 %1158  ;;  %v1454_v38 = vpop.f32.mrf.mxu0 }
 0x2c3   : > { %v2924_v29 = vpop.f32.mrf.mxu3  ;;  %v2926_v36 = vpop.permute.xlu1 %1168 }
 0x2cb   : > { %v2934_v48 = vpop.f32.mrf.mxu3  ;;  %v1202_v6 = vpop.permute.xlu1 %1201 }
 0x2cc   : > { %v2936_v43 = vpop.permute.xlu2 %1164  ;;  %v1239_v46 = vadd.f32 %v1202_v6, %v2438_v52  ;;  %v1287_v6 = vadd.f32 %v2517_v51, %v2403_v32  ;;  %v1290_v32 = vadd.f32 %v2533_v63, %v2408_v35  ;;  %v1293_v35 = vadd.f32 %v2554_v12, %v2417_v40 }
 0x2ce   : > { %1255 = vrot.lane.b32.xlu0 %v1239_v46, %s2250_s18  ;;  %v2975_v46 = vpop.f32.mrf.mxu2 }
 0x2d3   : > { %v1511_v22 = vpop.f32.mrf.mxu3  ;;  %v1217_v53 = vpop.permute.xlu1 %1216 }
 0x2d4   : > { %v2946_v2 = vpop.permute.xlu2 %1170  ;;  %v1242_v3 = vadd.f32 %v1217_v53, %v2450_v59  ;;  %v3016_v13 = vadd.f32 %v1511_v22, %v1452_v17 }
 0x2d5   : > { %3442 = vst [vmem:[#allocation5_spill] sm:$0xff] %v2946_v2 }
 0x2d6   : > { %1261 = vrot.lane.b32.xlu0 %v1242_v3, %s2250_s18  ;;  %v2981_v3 = vadd.f32 %v1287_v6, %v2438_v52  ;;  %v1702_v22 = vmul.f32 %v3016_v13, %v3016_v13 }
 0x2d7   : > { %v421_v50 = vpop.f32.mrf.mxu1 }
 0x2db   : > { %v1513_v14 = vpop.f32.mrf.mxu3 }
 0x2dc   : > { %v1207_v9 = vpop.permute.xlu2 %1206  ;;  %v2961_v16 = vpop.permute.xlu0 %1160  ;;  %v3012_v21 = vadd.f32 %v1513_v14, %v1454_v38  ;;  %v422_v14 = vadd.f32 %v421_v50, %v2902_v42  ;;  %v1291_v50 = vadd.f32 %v2572_v24, %v2450_v59 }
 0x2dd   : > { %v1240_v18 = vadd.f32 %v1207_v9, %v2426_v45  ;;  %v2978_v45 = vadd.f32 %v1292_v30, %v2417_v40  ;;  %v2996_v30 = vpop.f32.mrf.mxu2  ;;  %v1288_v40 = vadd.f32 %v2551_v11, %v2438_v52 }
 0x2de   : > { %1315 = vrot.lane.b32.xlu0 %v2959_v47, %s2249_s17  ;;  %v1682_v11 = vsel %vm1430_vm1, %v3012_v21, 0.0 }
 0x2df   : > { %1257 = vrot.lane.b32.xlu1 %v1240_v18, %s2250_s18  ;;  %v2994_v18 = vadd.f32 %v1290_v32, %v2450_v59  ;;  %v423_v9 = vpop.f32.mrf.mxu1  ;;  %v3009_v32 = vadd.f32 %v1293_v35, %v2460_v1 }
 0x2e0   : > { %v424_v52 = vadd.f32 %v423_v9, %v2906_v23  ;;  %v1710_v23 = vsel %vm1430_vm1, %v1702_v22, 0.0 }
 0x2e3   : > { %v1516_v53 = vpop.f32.mrf.mxu3 }
 0x2e4   : > { %v2983_v7 = vpop.permute.xlu0 %1166 }
 0x2e5   : > { %3443 = vst [vmem:[#allocation6_spill] sm:$0xff] %v2983_v7  ;;  %v1457_v62 = vpop.f32.mrf.mxu0  ;;  %v1462_v2 = vpop.f32.mrf.mxu2 }
 0x2e6   : > { %1321 = vrot.lane.b32.xlu0 %v2978_v45, %s2249_s17  ;;  %v3023_v1 = vadd.f32 %v1516_v53, %v1457_v62  ;;  %v3044_v53 = vadd.f32 %v2904_v49, %v422_v14 }
 0x2e7   : > { %1311 = vrot.lane.b32.xlu1 %v2981_v3, %s2249_s17  ;;  %v426_v5 = vpop.f32.mrf.mxu1 }
 0x2e8   : > { %3445 = vst [vmem:[#allocation8_spill] sm:$0xff] %v3023_v1  ;;  %v1684_v9 = vsel %vm1430_vm1, %v3023_v1, 0.0  ;;  %v427_v22 = vadd.f32 %v426_v5, %v2910_v27  ;;  %v1652_v27 = vmul.f32 %v3044_v53, %v3044_v53 }
 0x2ea   : > { %v1660_v58 = vsel %vm1430_vm1, %v1652_v27, 0.0 }
 0x2eb   : > { %v1518_v51 = vpop.f32.mrf.mxu3 }
 0x2ec   : > { %v2998_v6 = vpop.permute.xlu0 %1172 }
 0x2ed   : > { %3444 = vst [vmem:[#allocation7_spill] sm:$0xff] %v2998_v6  ;;  %v1459_v12 = vpop.f32.mrf.mxu0  ;;  %v1464_v24 = vpop.f32.mrf.mxu2 }
 0x2ee   : > { %1343 = vrot.lane.b32.xlu0 %v2981_v3, %s2250_s18  ;;  %v3035_v35 = vadd.f32 %v1518_v51, %v1459_v12  ;;  %v1681_v51 = vsel %vm1430_vm1, %v3016_v13, 0.0 }
 0x2ef   : > { %1317 = vrot.lane.b32.xlu1 %v2994_v18, %s2249_s17  ;;  %v428_v62 = vpop.f32.mrf.mxu1  ;;  %v1683_v49 = vadd.f32 %v1682_v11, %v1681_v51  ;;  %v1631_v11 = vsel %vm1430_vm1, %v3044_v53, 0.0  ;;  %v3071_v51 = vld [vmem:[%s2400_s16 + $0x28] sm:$0xff] }
 0x2f0   : > { %3446 = vst [vmem:[#allocation9_spill] sm:$0xff] %v3035_v35  ;;  %v1705_v12 = vmul.f32 %v3035_v35, %v3035_v35 }
 0x2f3   : > { %v1521_v63 = vpop.f32.mrf.mxu3 }
 0x2f4   : > { %v1212_v34 = vpop.permute.xlu0 %1211 }
 0x2f5   : > { %v1241_v0 = vadd.f32 %v2235_v37, %v1212_v34  ;;  %v1703_v37 = vmul.f32 %v3012_v21, %v3012_v21  ;;  %v2236_v34 = vld [vmem:[%s2400_s16 + $0x10] sm:$0xff] }
 0x2f6   : > { %1349 = vrot.lane.b32.xlu0 %v2994_v18, %s2250_s18  ;;  %v3031_v38 = vadd.f32 %v2236_v34, %v1288_v40  ;;  %v3053_v40 = vadd.f32 %v1521_v63, %v1462_v2  ;;  %v1685_v34 = vadd.f32 %v1684_v9, %v1683_v49 }
 0x2f7   : > { %1323 = vrot.lane.b32.xlu1 %v3009_v32, %s2249_s17  ;;  %1259 = vrot.lane.b32.xlu2 %v1241_v0, %s2250_s18  ;;  %v1704_v0 = vmul.f32 %v3023_v1, %v3023_v1  ;;  %v1711_v42 = vsel %vm1430_vm1, %v1703_v37, 0.0  ;;  %v3063_v37 = vadd.f32 %v2908_v25, %v424_v52  ;;  %v1686_v25 = vsel %vm1430_vm1, %v3035_v35, 0.0 }
 0x2f8   : > { %v1712_v14 = vadd.f32 %v1711_v42, %v1710_v23  ;;  %v1715_v52 = vsel %vm1430_vm1, %v1705_v12, 0.0  ;;  %v2238_v42 = vld [vmem:[%s2400_s16 + $0x30] sm:$0xff]  ;;  %v431_v35 = vpop.f32.mrf.mxu1  ;;  %v1688_v12 = vsel %vm1430_vm1, %v3053_v40, 0.0 }
 0x2f9   : > { %v1713_v59 = vsel %vm1430_vm1, %v1704_v0, 0.0  ;;  %v3074_v0 = vadd.f32 %v3071_v51, %v1291_v50  ;;  %v1653_v50 = vmul.f32 %v3063_v37, %v3063_v37 }
 0x2fa   : > { %v1714_v1 = vadd.f32 %v1713_v59, %v1712_v14  ;;  %v1632_v59 = vsel %vm1430_vm1, %v3063_v37, 0.0  ;;  %v429_v14 = vadd.f32 %v428_v62, %v2922_v55 }
 0x2fb   : > { %v1523_v17 = vpop.f32.mrf.mxu3  ;;  %v1633_v62 = vadd.f32 %v1632_v59, %v1631_v11 }
 0x2fc   : > { %v3065_v2 = vadd.f32 %v1523_v17, %v1464_v24  ;;  %v1227_v63 = vpop.permute.xlu0 %1226  ;;  %v1706_v17 = vmul.f32 %v3053_v40, %v3053_v40  ;;  %v3092_v24 = vadd.f32 %v2912_v28, %v427_v22  ;;  %v1661_v22 = vsel %vm1430_vm1, %v1653_v50, 0.0 }
 0x2fd   : > { %v1244_v23 = vadd.f32 %v2238_v42, %v1227_v63  ;;  %v1716_v42 = vadd.f32 %v1715_v52, %v1714_v1  ;;  %v1662_v59 = vadd.f32 %v1661_v22, %v1660_v58 }
 0x2fe   : > { %1355 = vrot.lane.b32.xlu0 %v3009_v32, %s2250_s18  ;;  %v1707_v49 = vmul.f32 %v3065_v2, %v3065_v2  ;;  %v1717_v6 = vsel %vm1430_vm1, %v1706_v17, 0.0  ;;  %v1690_v28 = vsel %vm1430_vm1, %v3065_v2, 0.0  ;;  %v1634_v52 = vsel %vm1430_vm1, %v3092_v24, 0.0 }
 0x2ff   : > { %1345 = vrot.lane.b32.xlu1 %v3031_v38, %s2250_s18  ;;  %1313 = vrot.lane.b32.xlu2 %v3031_v38, %s2249_s17  ;;  %v1718_v17 = vadd.f32 %v1717_v6, %v1716_v42 }
 0x300   : > { %v1719_v1 = vsel %vm1430_vm1, %v1707_v49, 0.0 }
 0x301   : > { %v1720_v49 = vadd.f32 %v1719_v1, %v1718_v17  ;;  %v1232_v17 = vpop.permute.xlu1 %1231 }
 0x303   : > { %v1526_v5 = vpop.f32.mrf.mxu3 }
 0x304   : > { %v1527_v9 = vadd.f32 %v1526_v5, %v2924_v29  ;;  %v2239_v29 = vld [vmem:[%s2400_s16 + $0x38] sm:$0xff]  ;;  %v1687_v5 = vadd.f32 %v1686_v25, %v1685_v34  ;;  %v1654_v34 = vmul.f32 %v3092_v24, %v3092_v24  ;;  %v3113_v25 = vadd.f32 %v2928_v60, %v429_v14  ;;  %s2251_s16 = smov 16  }
 0x305   : > { %v1294_v63 = vadd.f32 %v2239_v29, %v2579_v41  ;;  %v1635_v14 = vadd.f32 %v1634_v52, %v1633_v62 }
 0x306   : > { %1265 = vrot.lane.b32.xlu0 %v1244_v23, %s2250_s18  ;;  %v1708_v55 = vmul.f32 %v1527_v9, %v1527_v9  ;;  %v1689_v41 = vadd.f32 %v1688_v12, %v1687_v5  ;;  %v1692_v27 = vsel %vm1430_vm1, %v1527_v9, 0.0  ;;  %v432_v23 = vadd.f32 %v431_v35, %v2932_v39  ;;  %v433_v39 = vpop.f32.mrf.mxu1 }
 0x307   : > { %1351 = vrot.lane.b32.xlu1 %v3074_v0, %s2250_s18  ;;  %1319 = vrot.lane.b32.xlu2 %v3074_v0, %s2249_s17  ;;  %v3120_v12 = vadd.f32 %v1294_v63, %v2675_v10  ;;  %v1776_v7 = vpack.c.bf16 %v1527_v9, %v1527_v9  ;;  %v1663_v42 = vsel %vm1430_vm1, %v1654_v34, 0.0  ;;  %v1655_v26 = vmul.f32 %v3113_v25, %v3113_v25 }
 0x308   : > { %v1691_v11 = vadd.f32 %v1690_v28, %v1689_v41  ;;  %v1721_v5 = vsel %vm1430_vm1, %v1708_v55, 0.0  ;;  %v3129_v63 = vadd.f32 %v2941_v44, %v432_v23  ;;  %v1636_v44 = vsel %vm1430_vm1, %v3113_v25, 0.0 }
 0x309   : > { %v1722_v22 = vadd.f32 %v1721_v5, %v1720_v49  ;;  %v3138_v9 = vunpack.c.l.b16 %v1776_v7  ;;  %v1664_v34 = vadd.f32 %v1663_v42, %v1662_v59  ;;  %v1637_v23 = vadd.f32 %v1636_v44, %v1635_v14  ;;  %v1222_v44 = vpop.permute.xlu2 %1221 }
 0x30a   : > { %v1693_v6 = vadd.f32 %v1692_v27, %v1691_v11  ;;  %v1665_v27 = vsel %vm1430_vm1, %v1655_v26, 0.0  ;;  %v1656_v52 = vmul.f32 %v3129_v63, %v3129_v63  ;;  %v1638_v11 = vsel %vm1430_vm1, %v3129_v63, 0.0 }
 0x30b   : > { %v1528_v50 = vpop.f32.mrf.mxu3  ;;  %v1666_v49 = vadd.f32 %v1665_v27, %v1664_v34 }
 0x30c   : > { %v1529_v60 = vadd.f32 %v1528_v50, %v2934_v48  ;;  %v434_v48 = vadd.f32 %v433_v39, %v2944_v20  ;;  %v1245_v50 = vadd.f32 %v2239_v29, %v1232_v17  ;;  %v1667_v59 = vsel %vm1430_vm1, %v1656_v52, 0.0 }
 0x30d   : > { %v1668_v14 = vadd.f32 %v1667_v59, %v1666_v49 }
 0x30e   : > { %v1694_v58 = vsel %vm1430_vm1, %v1529_v60, 0.0  ;;  %v1709_v35 = vmul.f32 %v1529_v60, %v1529_v60  ;;  %v1777_v28 = vpack.c.bf16 %v1529_v60, %v1529_v60  ;;  %v3151_v20 = vadd.f32 %v2956_v31, %v434_v48  ;;  %v436_v5 = vpop.f32.mrf.mxu1 }
 0x30f   : > { %v3131_v55 = vadd.f32 %v1694_v58, %v1693_v6  ;;  %1357 = vrot.lane.b32.xlu1 %v3120_v12, %s2250_s18  ;;  %1325 = vrot.lane.b32.xlu2 %v3120_v12, %s2249_s17  ;;  %v437_v60 = vadd.f32 %v436_v5, %v2949_v4  ;;  %v1639_v31 = vadd.f32 %v1638_v11, %v1637_v23  ;;  %s2252_s17 = smov 32  }
 0x310   : > { %v1723_v62 = vsel %vm1430_vm1, %v1709_v35, 0.0  ;;  %v3141_v41 = vunpack.c.l.b16 %v1777_v28  ;;  %v1657_v26 = vmul.f32 %v3151_v20, %v3151_v20  ;;  %v1640_v6 = vsel %vm1430_vm1, %v3151_v20, 0.0 }
 0x311   : > { %v3145_v1 = vadd.f32 %v1723_v62, %v1722_v22  ;;  %v517_v29 = vadd.f32 %v2975_v46, %v437_v60  ;;  %v1641_v58 = vadd.f32 %v1640_v6, %v1639_v31  ;;  %v1243_v11 = vadd.f32 %v3071_v51, %v1222_v44  ;;  %v1237_v5 = vpop.permute.xlu2 %1236 }
 0x312   : > { %v1873_v7 = vpack.c.b16 %v3141_v41, %v3138_v9  ;;  %v1669_v42 = vsel %vm1430_vm1, %v1657_v26, 0.0  ;;  %v1246_v26 = vadd.f32 %v1237_v5, %v2675_v10  ;;  %v3447_v6 = vmax.f32 %v2800_v8, %v2916_v57 }
 0x313   : > { %v1658_v39 = vmul.f32 %v517_v29, %v517_v29  ;;  %v1642_v35 = vsel %vm1430_vm1, %v517_v29, 0.0  ;;  %v1670_v28 = vadd.f32 %v1669_v42, %v1668_v14 }
 0x314   : > { %v1643_v62 = vadd.f32 %v1642_v35, %v1641_v58 }
 0x315   : > { %v1671_v22 = vsel %vm1430_vm1, %v1658_v39, 0.0 }
 0x316   : > { %v438_v4 = vpop.f32.mrf.mxu1  ;;  %v1672_v34 = vadd.f32 %v1671_v22, %v1670_v28  ;;  %v3449_v22 = vmax.f32 %v2792_v61, %v2914_v33 }
 0x317   : > { %1347 = vrot.lane.b32.xlu2 %v2959_v47, %s2250_s18  ;;  %1267 = vrot.lane.b32.xlu1 %v1245_v50, %s2250_s18  ;;  %v439_v48 = vadd.f32 %v438_v4, %v2966_v19  ;;  %v1768_v19 = vpack.c.bf16 %v517_v29, %v517_v29  ;;  %v3448_v29 = vmax.f32 %v2825_v56, %v2936_v43 }
 0x319   : > { %v518_v46 = vadd.f32 %v2996_v30, %v439_v48  ;;  %v3182_v59 = vunpack.c.l.b16 %v1768_v19 }
 0x31b   : > { %v1644_v17 = vsel %vm1430_vm1, %v518_v46, 0.0  ;;  %v1659_v27 = vmul.f32 %v518_v46, %v518_v46  ;;  %v1769_v49 = vpack.c.bf16 %v518_v46, %v518_v46 }
 0x31c   : > { %v3175_v52 = vadd.f32 %v1644_v17, %v1643_v62  ;;  %v3450_v62 = vmax.f32 %v2820_v15, %v2961_v16 }
 0x31d   : > { %v1673_v23 = vsel %vm1430_vm1, %v1659_v27, 0.0  ;;  %v3184_v30 = vunpack.c.l.b16 %v1769_v49 }
 0x31e   : > { %v3179_v50 = vadd.f32 %v1673_v23, %v1672_v34 }
 0x31f   : > { %1353 = vrot.lane.b32.xlu2 %v2978_v45, %s2250_s18  ;;  %v1845_v60 = vpack.c.b16 %v3184_v30, %v3182_v59 }
 0x327   : > { %1263 = vrot.lane.b32.xlu2 %v1243_v11, %s2250_s18 }
 0x32f   : > { %1269 = vrot.lane.b32.xlu2 %v1246_v26, %s2250_s18  ;;  %s2253_s18 = smov 48  }
 0x340   : > { %v1256_v31 = vpop.permute.xlu0 %1255 }
 0x341   : > { %v1279_v14 = vmax.f32 %v3447_v6, %v1256_v31 }
 0x343   : > { %v1552_v39 = vmul.f32 %v1279_v14, %v1279_v14  ;;  %v1746_v10 = vpack.c.bf16 %v1279_v14, %v1279_v14  ;;  %v1531_v8 = vsel %vm1430_vm1, %v1279_v14, 0.0 }
 0x345   : > { %v1560_v57 = vsel %vm1430_vm1, %v1552_v39, 0.0  ;;  %v3205_v23 = vunpack.c.l.b16 %v1746_v10 }
 0x348   : > { %v1262_v51 = vpop.permute.xlu0 %1261 }
 0x349   : > { %v1282_v42 = vmax.f32 %v3448_v29, %v1262_v51 }
 0x34b   : > { %v1749_v4 = vpack.c.bf16 %v1282_v42, %v1282_v42  ;;  %v1555_v15 = vmul.f32 %v1282_v42, %v1282_v42  ;;  %v1536_v5 = vsel %vm1430_vm1, %v1282_v42, 0.0 }
 0x34d   : > { %v3207_v11 = vunpack.c.l.b16 %v1749_v4  ;;  %v1565_v10 = vsel %vm1430_vm1, %v1555_v15, 0.0  ;;  %v1765_v15 = vpack.c.bf16 %v3113_v25, %v3113_v25  ;;  %v1775_v25 = vpack.c.bf16 %v3065_v2, %v3065_v2 }
 0x350   : > { %v1316_v58 = vpop.permute.xlu0 %1315 }
 0x351   : > { %v1260_v35 = vpop.permute.xlu2 %1259  ;;  %v1258_v28 = vpop.permute.xlu1 %1257 }
 0x352   : > { %v1281_v48 = vmax.f32 %v3449_v22, %v1260_v35  ;;  %v1280_v44 = vmax.f32 %v3450_v62, %v1258_v28 }
 0x354   : > { %v1748_v56 = vpack.c.bf16 %v1281_v48, %v1281_v48  ;;  %v1532_v43 = vsel %vm1430_vm1, %v1280_v44, 0.0  ;;  %v1554_v46 = vmul.f32 %v1281_v48, %v1281_v48  ;;  %v1553_v17 = vmul.f32 %v1280_v44, %v1280_v44 }
 0x355   : > { %v1533_v34 = vadd.f32 %v1532_v43, %v1531_v8  ;;  %v1747_v27 = vpack.c.bf16 %v1280_v44, %v1280_v44  ;;  %v1534_v61 = vsel %vm1430_vm1, %v1281_v48, 0.0 }
 0x356   : > { %v3210_v33 = vunpack.c.l.b16 %v1748_v56  ;;  %v1561_v19 = vsel %vm1430_vm1, %v1553_v17, 0.0  ;;  %v1563_v6 = vsel %vm1430_vm1, %v1554_v46, 0.0  ;;  %v1771_v17 = vpack.c.bf16 %v3012_v21, %v3012_v21 }
 0x357   : > { %v1535_v16 = vadd.f32 %v1534_v61, %v1533_v34  ;;  %v3213_v49 = vunpack.c.l.b16 %v1747_v27  ;;  %v1562_v26 = vadd.f32 %v1561_v19, %v1560_v57  ;;  %v1770_v34 = vpack.c.bf16 %v3016_v13, %v3016_v13 }
 0x358   : > { %v1322_v31 = vpop.permute.xlu0 %1321  ;;  %v1762_v27 = vpack.c.bf16 %v3044_v53, %v3044_v53  ;;  %v1763_v61 = vpack.c.bf16 %v3063_v37, %v3063_v37  ;;  %v1337_v13 = vadd.f32 %v1316_v58, %v2959_v47 }
 0x359   : > { %v1314_v14 = vpop.permute.xlu2 %1313  ;;  %v1312_v29 = vpop.permute.xlu1 %1311  ;;  %v3219_v39 = vadd.f32 %v1536_v5, %v1535_v16  ;;  %v1794_v35 = vpack.c.b16 %v3213_v49, %v3205_v23  ;;  %v1564_v28 = vadd.f32 %v1563_v6, %v1562_v26  ;;  %v3246_v53 = vunpack.c.l.b16 %v1770_v34 }
 0x35a   : > { %v1335_v44 = vadd.f32 %v1312_v29, %v2981_v3  ;;  %v1774_v3 = vpack.c.bf16 %v3053_v40, %v3053_v40  ;;  %v1336_v21 = vadd.f32 %v1314_v14, %v3031_v38  ;;  %v3248_v26 = vunpack.c.l.b16 %v1771_v17 }
 0x35b   : > { %v3224_v4 = vadd.f32 %v1565_v10, %v1564_v28  ;;  %v3250_v37 = vunpack.c.l.b16 %v1762_v27  ;;  %v3252_v40 = vunpack.c.l.b16 %v1763_v61  ;;  %v3260_v14 = vunpack.c.l.b16 %v1765_v15 }
 0x35c   : > { %v3254_v29 = vunpack.c.l.b16 %v1774_v3 }
 0x360   : > { %v1344_v42 = vpop.permute.xlu0 %1343 }
 0x361   : > { %v1320_v22 = vpop.permute.xlu2 %1319  ;;  %v1318_v48 = vpop.permute.xlu1 %1317  ;;  %v1367_v43 = vadd.f32 %v1344_v42, %v1335_v44  ;;  %v1766_v42 = vpack.c.bf16 %v3129_v63, %v3129_v63 }
 0x362   : > { %v1338_v56 = vadd.f32 %v1318_v48, %v2994_v18  ;;  %v1764_v18 = vpack.c.bf16 %v3092_v24, %v3092_v24 }
 0x363   : > { %v1375_v16 = vmul.f32 0.11111111, %v1367_v43  ;;  %v1340_v43 = vadd.f32 %v1322_v31, %v2978_v45 }
 0x364   : > { %v3258_v38 = vunpack.c.l.b16 %v1764_v18 }
 0x365   : > { %v1602_v28 = vmul.f32 %v1375_v16, %v1375_v16  ;;  %v1581_v17 = vsel %vm1430_vm1, %v1375_v16, 0.0  ;;  %v1754_v27 = vpack.c.bf16 %v1375_v16, %v1375_v16 }
 0x368   : > { %v1350_v62 = vpop.permute.xlu0 %1349 }
 0x369   : > { %v3227_v8 = vpop.permute.xlu2 %1325  ;;  %v1324_v57 = vpop.permute.xlu1 %1323  ;;  %v1370_v46 = vadd.f32 %v1350_v62, %v1338_v56  ;;  %v1767_v56 = vpack.c.bf16 %v3151_v20, %v3151_v20 }
 0x36a   : > { %v1341_v10 = vadd.f32 %v1324_v57, %v3009_v32  ;;  %v1610_v57 = vsel %vm1430_vm1, %v1602_v28, 0.0 }
 0x36b   : > { %v1378_v19 = vmul.f32 0.11111111, %v1370_v46  ;;  %v1339_v46 = vadd.f32 %v1320_v22, %v3074_v0 }
 0x36d   : > { %v1757_v48 = vpack.c.bf16 %v1378_v19, %v1378_v19  ;;  %v1605_v31 = vmul.f32 %v1378_v19, %v1378_v19 }
 0x36f   : > { %v1809_v45 = vunpack.c.l.b16 %v1757_v48  ;;  %v1842_v48 = vpack.c.b16 %v3252_v40, %v3250_v37 }
 0x370   : > { %v1356_v5 = vpop.permute.xlu0 %1355 }
 0x371   : > { %v1348_v6 = vpop.permute.xlu2 %1347  ;;  %v1346_v24 = vpop.permute.xlu1 %1345  ;;  %v1373_v34 = vadd.f32 %v1356_v5, %v1341_v10 }
 0x372   : > { %v1369_v47 = vadd.f32 %v1348_v6, %v1337_v13  ;;  %v1368_v58 = vadd.f32 %v1346_v24, %v1336_v21 }
 0x373   : > { %v3273_v0 = vmul.f32 0.11111111, %v1373_v34 }
 0x374   : > { %v1377_v62 = vmul.f32 0.11111111, %v1369_v47  ;;  %v1376_v44 = vmul.f32 0.11111111, %v1368_v58 }
 0x376   : > { %v1756_v61 = vpack.c.bf16 %v1377_v62, %v1377_v62  ;;  %v1582_v32 = vsel %vm1430_vm1, %v1376_v44, 0.0  ;;  %v1604_v3 = vmul.f32 %v1377_v62, %v1377_v62  ;;  %v1603_v15 = vmul.f32 %v1376_v44, %v1376_v44 }
 0x377   : > { %v1583_v18 = vadd.f32 %v1582_v32, %v1581_v17  ;;  %v1584_v13 = vsel %vm1430_vm1, %v1377_v62, 0.0  ;;  %v1755_v21 = vpack.c.bf16 %v1376_v44, %v1376_v44  ;;  %v3451_v62 = vmax.f32 %v2833_v54, %v2926_v36 }
 0x378   : > { %v1266_v6 = vpop.permute.xlu0 %1265  ;;  %v1808_v24 = vunpack.c.l.b16 %v1756_v61  ;;  %v1611_v16 = vsel %vm1430_vm1, %v1603_v15, 0.0  ;;  %v1613_v17 = vsel %vm1430_vm1, %v1604_v3, 0.0  ;;  %v1806_v61 = vunpack.c.l.b16 %v1754_v27 }
 0x379   : > { %v1585_v22 = vadd.f32 %v1584_v13, %v1583_v18  ;;  %v1354_v5 = vpop.permute.xlu2 %1353  ;;  %v1352_v47 = vpop.permute.xlu1 %1351  ;;  %v1612_v58 = vadd.f32 %v1611_v16, %v1610_v57  ;;  %v1284_v44 = vmax.f32 %v3451_v62, %v1266_v6  ;;  %v1807_v57 = vunpack.c.l.b16 %v1755_v21 }
 0x37a   : > { %v1372_v10 = vadd.f32 %v1354_v5, %v1340_v43  ;;  %v1371_v28 = vadd.f32 %v1352_v47, %v1339_v46  ;;  %v1815_v51 = vpack.c.b16 %v1809_v45, %v1808_v24  ;;  %v1342_v43 = vadd.f32 %v3227_v8, %v3120_v12 }
 0x37b   : > { %v1614_v34 = vadd.f32 %v1613_v17, %v1612_v58  ;;  %v1586_v46 = vsel %vm1430_vm1, %v1378_v19, 0.0  ;;  %v1615_v3 = vsel %vm1430_vm1, %v1605_v31, 0.0  ;;  %v1592_v54 = vsel %vm1430_vm1, %v3273_v0, 0.0 }
 0x37c   : > { %v1380_v32 = vmul.f32 0.11111111, %v1372_v10  ;;  %v1379_v18 = vmul.f32 0.11111111, %v1371_v28  ;;  %1820 = vrot.lane.b32.xlu1 %v1815_v51, %s2251_s16  ;;  %v1608_v36 = vmul.f32 %v3273_v0, %v3273_v0  ;;  %v1587_v27 = vadd.f32 %v1586_v46, %v1585_v22  ;;  %v3452_v10 = vld [vmem:[#allocation2_spill] sm:$0xff] }
 0x37d   : > { %v1814_v21 = vpack.c.b16 %v1807_v57, %v1806_v61  ;;  %v1557_v6 = vmul.f32 %v1284_v44, %v1284_v44  ;;  %v1616_v12 = vadd.f32 %v1615_v3, %v1614_v34  ;;  %v1751_v45 = vpack.c.bf16 %v1284_v44, %v1284_v44  ;;  %v3453_v28 = vld [vmem:[#allocation6_spill] sm:$0xff] }
 0x37e   : > { %v1607_v37 = vmul.f32 %v1380_v32, %v1380_v32  ;;  %v1759_v40 = vpack.c.bf16 %v1380_v32, %v1380_v32  ;;  %v1588_v15 = vsel %vm1430_vm1, %v1379_v18, 0.0  ;;  %v1606_v51 = vmul.f32 %v1379_v18, %v1379_v18 }
 0x37f   : > { %v1758_v13 = vpack.c.bf16 %v1379_v18, %v1379_v18  ;;  %v1589_v8 = vadd.f32 %v1588_v15, %v1587_v27  ;;  %v1590_v24 = vsel %vm1430_vm1, %v1380_v32, 0.0  ;;  %1818 = vrot.lane.b32.xlu0 %v1814_v21, %s2251_s16  ;;  %v3454_v17 = vmax.f32 %v3452_v10, %v3453_v28  ;;  %v3456_v10 = vld [vmem:[#allocation7_spill] sm:$0xff] }
 0x380   : > { %v1811_v19 = vunpack.c.l.b16 %v1759_v40  ;;  %v1617_v31 = vsel %vm1430_vm1, %v1606_v51, 0.0  ;;  %v1621_v34 = vsel %vm1430_vm1, %v1608_v36, 0.0  ;;  %v1760_v32 = vpack.c.bf16 %v3273_v0, %v3273_v0 }
 0x381   : > { %v1264_v16 = vpop.permute.xlu2 %1263  ;;  %v1358_v5 = vpop.permute.xlu1 %1357  ;;  %v1810_v47 = vunpack.c.l.b16 %v1758_v13  ;;  %v1591_v22 = vadd.f32 %v1590_v24, %v1589_v8  ;;  %v1618_v58 = vadd.f32 %v1617_v31, %v1616_v12  ;;  %v1619_v18 = vsel %vm1430_vm1, %v1607_v37, 0.0 }
 0x382   : > { %v1283_v62 = vmax.f32 %v3454_v17, %v1264_v16  ;;  %v1374_v61 = vadd.f32 %v1358_v5, %v1342_v43  ;;  %v1540_v15 = vsel %vm1430_vm1, %v1284_v44, 0.0  ;;  %v1569_v43 = vsel %vm1430_vm1, %v1557_v6, 0.0 }
 0x383   : > { %v1816_v57 = vpack.c.b16 %v1811_v19, %v1810_v47  ;;  %v1620_v46 = vadd.f32 %v1619_v18, %v1618_v58  ;;  %v3308_v0 = vunpack.c.l.b16 %v1751_v45  ;;  %v1593_v21 = vadd.f32 %v1592_v54, %v1591_v22 }
 0x384   : > { %v1538_v3 = vsel %vm1430_vm1, %v1283_v62, 0.0  ;;  %v1556_v40 = vmul.f32 %v1283_v62, %v1283_v62  ;;  %v1750_v27 = vpack.c.bf16 %v1283_v62, %v1283_v62  ;;  %1846 = vrot.lane.b32.xlu1 %v1842_v48, %s2252_s17  ;;  %v1382_v51 = vmul.f32 0.11111111, %v1374_v61  ;;  %v3458_v62 = vld [vmem:[#allocation3_spill] sm:$0xff]  ;;  %v3459_v61 = vld [vmem:[#allocation5_spill] sm:$0xff] }
 0x385   : > { %v1539_v36 = vadd.f32 %v1538_v3, %v3219_v39  ;;  %1822 = vrot.lane.b32.xlu2 %v1816_v57, %s2251_s16  ;;  %v1622_v19 = vadd.f32 %v1621_v34, %v1620_v46  ;;  %v1812_v31 = vunpack.c.l.b16 %v1760_v32  ;;  %v3460_v34 = vmax.f32 %v3458_v62, %v3459_v61 }
 0x386   : > { %v1567_v37 = vsel %vm1430_vm1, %v1556_v40, 0.0  ;;  %v3311_v13 = vunpack.c.l.b16 %v1750_v27  ;;  %v1594_v48 = vsel %vm1430_vm1, %v1382_v51, 0.0  ;;  %v1609_v8 = vmul.f32 %v1382_v51, %v1382_v51 }
 0x387   : > { %v1568_v12 = vadd.f32 %v1567_v37, %v3224_v4  ;;  %v1761_v44 = vpack.c.bf16 %v1382_v51, %v1382_v51  ;;  %v1595_v6 = vadd.f32 %v1594_v48, %v1593_v21  ;;  %v1541_v24 = vadd.f32 %v1540_v15, %v1539_v36  ;;  %v3455_v4 = vld [vmem:[#allocation4_spill] sm:$0xff] }
 0x388   : > { %v1796_v39 = vpack.c.b16 %v3308_v0, %v3311_v13  ;;  %v1623_v45 = vsel %vm1430_vm1, %v1609_v8, 0.0  ;;  %v3457_v28 = vmax.f32 %v3455_v4, %v3456_v10  ;;  %v1867_v32 = vunpack.c.l.b16 %v1775_v25  ;;  %v3462_v4 = vld [vmem:[#allocation8_spill] sm:$0xff] }
 0x389   : > { %v1813_v16 = vunpack.c.l.b16 %v1761_v44  ;;  %v1270_v5 = vpop.permute.xlu2 %1269  ;;  %v1268_v47 = vpop.permute.xlu1 %1267  ;;  %v1570_v58 = vadd.f32 %v1569_v43, %v1568_v12  ;;  %v1596_v54 = vrot.slane %v1595_v6, 4  ;;  %v1624_v22 = vadd.f32 %v1623_v45, %v1622_v19 }
 0x38a   : > { %v1286_v17 = vmax.f32 %v3457_v28, %v1270_v5  ;;  %v1285_v18 = vmax.f32 %v3460_v34, %v1268_v47  ;;  %v1838_v57 = vunpack.c.l.b16 %v1766_v42  ;;  %v1843_v3 = vpack.c.b16 %v3260_v14, %v3258_v38 }
 0x38b   : > { %v1817_v46 = vpack.c.b16 %v1813_v16, %v1812_v31  ;;  %v1696_v40 = vrot.slane %v3131_v55, 4  ;;  %v1646_v27 = vrot.slane %v3175_v52, 4  ;;  %v1625_v15 = vrot.slane %v1624_v22, 4  ;;  %v3461_v16 = vld [vmem:[#allocation9_spill] sm:$0xff] }
 0x38c   : > { %v1559_v43 = vmul.f32 %v1286_v17, %v1286_v17  ;;  %1852 = vrot.lane.b32.xlu1 %v1845_v60, %s2252_s17  ;;  %v1753_v2 = vpack.c.bf16 %v1286_v17, %v1286_v17  ;;  %v1542_v25 = vsel %vm1430_vm1, %v1285_v18, 0.0  ;;  %v1558_v63 = vmul.f32 %v1285_v18, %v1285_v18 }
 0x38d   : > { %v1752_v42 = vpack.c.bf16 %v1285_v18, %v1285_v18  ;;  %1824 = vrot.lane.b32.xlu0 %v1817_v46, %s2251_s16  ;;  %1848 = vrot.lane.b32.xlu2 %v1843_v3, %s2252_s17  ;;  %v1839_v38 = vunpack.c.l.b16 %v1767_v56  ;;  %v1675_v14 = vrot.slane %v3179_v50, 4  ;;  %v1597_v36 = vadd.f32 %v1596_v54, %v1595_v6 }
 0x38e   : > { %v1543_v51 = vadd.f32 %v1542_v25, %v1541_v24  ;;  %v1544_v59 = vsel %vm1430_vm1, %v1286_v17, 0.0  ;;  %v3346_v30 = vunpack.c.l.b16 %v1753_v2  ;;  %v1571_v60 = vsel %vm1430_vm1, %v1558_v63, 0.0 }
 0x38f   : > { %v3349_v37 = vunpack.c.l.b16 %v1752_v42  ;;  %v1725_v21 = vrot.slane %v3145_v1, 4  ;;  %v1626_v12 = vadd.f32 %v1625_v15, %v1624_v22  ;;  %v1572_v8 = vadd.f32 %v1571_v60, %v1570_v58 }
 0x390   : > { %v1545_v48 = vadd.f32 %v1544_v59, %v1543_v51  ;;  %v1647_v20 = vadd.f32 %v1646_v27, %v3175_v52  ;;  %v1573_v56 = vsel %vm1430_vm1, %v1559_v43, 0.0  ;;  %v1870_v44 = vpack.c.b16 %v3248_v26, %v3246_v53 }
 0x391   : > { %v1797_v19 = vpack.c.b16 %v3346_v30, %v3349_v37  ;;  %v1676_v6 = vadd.f32 %v1675_v14, %v3179_v50  ;;  %v1574_v31 = vadd.f32 %v1573_v56, %v1572_v8  ;;  %v1872_v45 = vpack.c.b16 %v1867_v32, %v3254_v29 }
 0x392   : > { %v1546_v24 = vrot.slane %v1545_v48, 4  ;;  %v1773_v5 = vpack.c.bf16 %v3461_v16, %v3461_v16  ;;  %v1697_v47 = vadd.f32 %v1696_v40, %v3131_v55  ;;  %v1598_v52 = vrot.slane %v1597_v36, 2 }
 0x393   : > { %v1844_v58 = vpack.c.b16 %v1839_v38, %v1838_v57  ;;  %v1726_v54 = vadd.f32 %v1725_v21, %v3145_v1  ;;  %v1627_v22 = vrot.slane %v1626_v12, 2  ;;  %v1575_v26 = vrot.slane %v1574_v31, 4 }
 0x394   : > { %v1547_v53 = vadd.f32 %v1546_v24, %v1545_v48  ;;  %1878 = vrot.lane.b32.xlu1 %v1872_v45, %s2253_s18  ;;  %v1772_v50 = vpack.c.bf16 %v3462_v4, %v3462_v4  ;;  %v1648_v10 = vrot.slane %v1647_v20, 2  ;;  %v1677_v29 = vrot.slane %v1676_v6, 2 }
 0x395   : > { %1850 = vrot.lane.b32.xlu0 %v1844_v58, %s2252_s17  ;;  %1874 = vrot.lane.b32.xlu2 %v1870_v44, %s2253_s18  ;;  %v1576_v17 = vadd.f32 %v1575_v26, %v1574_v31  ;;  %v1865_v55 = vunpack.c.l.b16 %v1773_v5  ;;  %v1698_v62 = vrot.slane %v1697_v47, 2  ;;  %v1599_v61 = vadd.f32 %v1598_v52, %v1597_v36 }
 0x396   : > { %v1548_v28 = vrot.slane %v1547_v53, 2  ;;  %v1727_v34 = vrot.slane %v1726_v54, 2  ;;  %v1628_v1 = vadd.f32 %v1627_v22, %v1626_v12  ;;  %v1864_v57 = vunpack.c.l.b16 %v1772_v50 }
 0x397   : > { %v1577_v32 = vrot.slane %v1576_v17, 2  ;;  %v1649_v46 = vadd.f32 %v1648_v10, %v1647_v20  ;;  %v1678_v3 = vadd.f32 %v1677_v29, %v1676_v6  ;;  %v1699_v15 = vadd.f32 %v1698_v62, %v1697_v47 }
 0x398   : > { %v1549_v18 = vadd.f32 %v1548_v28, %v1547_v53  ;;  %v1600_v43 = vrot.slane %v1599_v61, 1  ;;  %v1871_v2 = vpack.c.b16 %v1865_v55, %v1864_v57  ;;  %v1728_v25 = vadd.f32 %v1727_v34, %v1726_v54 }
 0x399   : > { %v1578_v27 = vadd.f32 %v1577_v32, %v1576_v17  ;;  %v1629_v63 = vrot.slane %v1628_v1, 1  ;;  %v1650_v38 = vrot.slane %v1649_v46, 1  ;;  %v1679_v14 = vrot.slane %v1678_v3, 1 }
 0x39a   : > { %v1550_v40 = vrot.slane %v1549_v18, 1  ;;  %v1700_v59 = vrot.slane %v1699_v15, 1  ;;  %v1601_v60 = vadd.f32 %v1600_v43, %v1599_v61  ;;  %v1729_v21 = vrot.slane %v1728_v25, 1 }
 0x39b   : > { %v1579_v42 = vrot.slane %v1578_v27, 1  ;;  %v1630_v12 = vadd.f32 %v1629_v63, %v1628_v1  ;;  %v1651_v8 = vadd.f32 %v1650_v38, %v1649_v46  ;;  %v1680_v56 = vadd.f32 %v1679_v14, %v1678_v3 }
 0x39c   : > { %v1551_v36 = vadd.f32 %v1550_v40, %v1549_v18  ;;  %v1701_v9 = vadd.f32 %v1700_v59, %v1699_v15  ;;  %v3463_v46 = vpack.c.b16 %v3207_v11, %v3210_v33 }
 0x39d   : > { %1876 = vrot.lane.b32.xlu0 %v1871_v2, %s2253_s18  ;;  %1880 = vrot.lane.b32.xlu2 %v1873_v7, %s2253_s18  ;;  %v1580_v51 = vadd.f32 %v1579_v42, %v1578_v27  ;;  %v1730_v7 = vadd.f32 %v1729_v21, %v1728_v25 }
 0x39f   : > { %v1732_v48 = vsel %vm1731_vm2, %v1551_v36, %v1580_v51 }
 0x3a0   : > { %v1734_v20 = vsel %vm1733_vm3, %v1732_v48, %v1601_v60 }
 0x3a1   : > { %v1736_v44 = vsel %vm1735_vm4, %v1734_v20, %v1630_v12 }
 0x3a2   : > { %v1738_v41 = vsel %vm1737_vm5, %v1736_v44, %v1651_v8 }
 0x3a3   : > { %v1740_v6 = vsel %vm1739_vm6, %v1738_v41, %v1680_v56 }
 0x3a4   : > { %v1742_v24 = vsel %vm1741_vm7, %v1740_v6, %v1701_v9 }
 0x3a5   : > { %v1744_v31 = vsel %vm1743_vm8, %v1742_v24, %v1730_v7 }
 0x3a6   : > { %1745 = vst.msk [vmem:[%s282_s20] sm:$0xff] %vm1430_vm1, %v1744_v31 }
 0x3df   : > { %v1823_v45 = vpop.permute.xlu2 %1822 }
 0x3e0   : > { %v1890_v18 = vsel %vm1430_vm1, %v1796_v39, %v1823_v45 }
 0x3e7   : > { %v1849_v16 = vpop.permute.xlu2 %1848 }
 0x3ee   : > { %v1821_v5 = vpop.permute.xlu1 %1820 }
 0x3ef   : > { %v1875_v54 = vpop.permute.xlu2 %1874  ;;  %v1887_v0 = vsel %vm1430_vm1, %v3463_v46, %v1821_v5 }
 0x3f0   : > { %v1898_v40 = vsel %vm1894_vm9, %v1887_v0, %v1849_v16 }
 0x3f1   : > { %v1819_v47 = vpop.permute.xlu0 %1818 }
 0x3f2   : > { %v1884_v52 = vsel %vm1430_vm1, %v1794_v35, %v1819_v47 }
 0x3f6   : > { %v1847_v58 = vpop.permute.xlu1 %1846 }
 0x3f7   : > { %v1896_v22 = vsel %vm1894_vm9, %v1884_v52, %v1847_v58  ;;  %v1881_v29 = vpop.permute.xlu2 %1880 }
 0x3f8   : > { %v1904_v53 = vsel %vm340_vm0, %v1896_v22, %v1875_v54 }
 0x3f9   : > { %v1915_v26 = vunpack.c.l.b16 %v1904_v53  ;;  %v1916_v4 = vunpack.c.h.b16 %v1904_v53 }
 0x3fb   : > { %v1923_v23 = vpack.c.b16 %v1915_v26, %v1915_v26  ;;  %v1924_v49 = vpack.c.b16 %v1916_v4, %v1916_v4 }
 0x3fd   : > { %1940 = vst.msk [vmem:[%s3385_s26] sm:$0xf] %vm1939_vm10, %v1923_v23 }
 0x3fe   : > { %1941 = vst.msk [vmem:[%s3385_s26 + $0x4] sm:$0xf] %vm1939_vm10, %v1924_v49  ;;  %v1853_v35 = vpop.permute.xlu1 %1852 }
 0x3ff   : > { %v1825_v50 = vpop.permute.xlu0 %1824 }
 0x400   : > { %v1893_v10 = vsel %vm1430_vm1, %v1797_v19, %v1825_v50 }
 0x401   : > { %v1902_v28 = vsel %vm1894_vm9, %v1893_v10, %v1853_v35 }
 0x402   : > { %v1910_v17 = vsel %vm340_vm0, %v1902_v28, %v1881_v29 }
 0x403   : > { %v1921_v55 = vunpack.c.l.b16 %v1910_v17  ;;  %v1922_v62 = vunpack.c.h.b16 %v1910_v17 }
 0x405   : > { %v1929_v61 = vpack.c.b16 %v1921_v55, %v1921_v55  ;;  %v1930_v34 = vpack.c.b16 %v1922_v62, %v1922_v62 }
 0x406   : > { %v1879_v1 = vpop.permute.xlu1 %1878 }
 0x407   : > { %1946 = vst.msk [vmem:[%s3385_s26 + $0x18] sm:$0xf] %vm1939_vm10, %v1929_v61  ;;  %v1851_v30 = vpop.permute.xlu0 %1850 }
 0x408   : > { %1947 = vst.msk [vmem:[%s3385_s26 + $0x1c] sm:$0xf] %vm1939_vm10, %v1930_v34  ;;  %v1900_v37 = vsel %vm1894_vm9, %v1890_v18, %v1851_v30 }
 0x409   : > { %v1908_v19 = vsel %vm340_vm0, %v1900_v37, %v1879_v1 }
 0x40a   : > { %v1919_v32 = vunpack.c.l.b16 %v1908_v19  ;;  %v1920_v57 = vunpack.c.h.b16 %v1908_v19 }
 0x40c   : > { %v1927_v13 = vpack.c.b16 %v1919_v32, %v1919_v32  ;;  %v1928_v39 = vpack.c.b16 %v1920_v57, %v1920_v57 }
 0x40e   : > { %1944 = vst.msk [vmem:[%s3385_s26 + $0x10] sm:$0xf] %vm1939_vm10, %v1927_v13 }
 0x40f   : > { %1945 = vst.msk [vmem:[%s3385_s26 + $0x14] sm:$0xf] %vm1939_vm10, %v1928_v39  ;;  %v1877_v3 = vpop.permute.xlu0 %1876 }
 0x410   : > { %v1906_v27 = vsel %vm340_vm0, %v1898_v40, %v1877_v3 }
 0x411   : > { %v1917_v15 = vunpack.c.l.b16 %v1906_v27  ;;  %v1918_v43 = vunpack.c.h.b16 %v1906_v27 }
 0x413   : > { %v1925_v2 = vpack.c.b16 %v1917_v15, %v1917_v15  ;;  %v1926_v25 = vpack.c.b16 %v1918_v43, %v1918_v43 }
 0x415   : > { %1942 = vst.msk [vmem:[%s3385_s26 + $0x8] sm:$0xf] %vm1939_vm10, %v1925_v2 }
 0x416   : > { %1943 = vst.msk [vmem:[%s3385_s26 + $0xc] sm:$0xf] %vm1939_vm10, %v1926_v25 }
 0x417 PF: > { %s17_s21 = sadd.s32 1, %s2246_s21  }
 0x418   : > { %p14_p4 = scmp.ge.s32.totalorder %s17_s21, 4  }
 0x41a   :  { %16 = sbr.rel (!%p14_p4) target bundleno = 1 (0x1), region = 96 }

// kernel: search_reduction_cell_forward.13
= control target key start
LH: loop header
LB: loop body
LE: loop exit
PB: predicated region body
PF: predicated region fallthrough
CT: control target
= control target key end

     0   :  { %s797_s15 = smov 0   ;;  %s1076_s0 = inlined_call_operand.vmem [shape: bf16[2,64,64], index: 0, kind: input, shape index: {}]   ;;  %s1077_s1 = inlined_call_operand.vmem [shape: bf16[2,64,64], index: 1, kind: input, shape index: {}]   ;;  %s1078_s2 = inlined_call_operand.vmem [shape: f32[5,16], index: 2, kind: input, shape index: {}]   ;;  %s1079_s3 = inlined_call_operand.vmem [shape: f32[5,16], index: 3, kind: input, shape index: {}]   ;;  %s1080_s4 = inlined_call_operand.vmem [shape: f32[2,64,16], index: 4, kind: output, shape index: {}]  }
   0x1 LB: > { %s690_s16 = sadd.s32 4294967295, %s764_s15   ;;  %p694_p0 = scmp.ge.s32.totalorder %s764_s15, 1  ;;  %s764_s15 = sphi %s797_s15, %s14_s15  }
   0x2   : > { %p172_p1 = scmp.lt.s32.totalorder %s764_s15, 3 }
   0x4   : > { %p173_p2 = pnand %p694_p0, %p172_p1 }
   0x5   : > { %s766_s21 = smov (!%p173_p2), 16   ;;  %s767_s22 = smov (!%p173_p2), 32  }
   0x6   : > { %176 = sbr.rel (%p173_p2) target bundleno = 381 (0x17d), region = 36  ;;  %s768_s23 = smov (!%p173_p2), 48  }
   0x7   : > { %p203_p3 = scmp.lt.s32.totalorder (!%p173_p2), %s690_s16, 1  ;;  %s769_s28 = smov (!%p173_p2), 112  }
   0x8   : > { %s770_s29 = smov (!%p173_p2), 96   ;;  %s771_s30 = smov (!%p173_p2), 80  }
   0xb   : > { %v808_v0 = vld [vmem:[%s1078_s2] sm:$0x1f]  ;;  %s1082_s16 = smov (!%p203_p3, %s690_s16), 1  ;;  %vm614_vm0 = vcmask 130048  }
   0xc   : > { %v244_v1 = vperm.slane %v808_v0, 1  ;;  %v814_v2 = vld [vmem:[%s1079_s3] sm:$0x1f]  ;;  %v297_v5 = vperm.slane %v808_v0, 2  ;;  %v350_v6 = vperm.slane %v808_v0, 3  ;;  %s703_s24 = sshll.u32 %s1082_s16, 5 }
   0xd   : > { %v491_v3 = vperm.slane %v814_v2, 2  ;;  %v544_v4 = vperm.slane %v814_v2, 3  ;;  %v438_v7 = vperm.slane %v814_v2, 1  ;;  %s207_s27 = scalar_lea.vmem %s1076_s0, %s703_s24  ;;  %s880_s7 = scalar_lea.vmem %s1077_s1, %s703_s24  ;;  %v902_v50 = vperm.slane %v808_v0, 0 }
   0xe   : > { %246 = vrot.lane.b32.xlu0 %v244_v1, %s766_s21  ;;  %v738_v8 = vld [vmem:[%s207_s27 + $0x8] sm:$0xff]   ;;  %v707_v9 = vld [vmem:[%s207_s27] sm:$0xff]   ;;  %v739_v17 = vld [vmem:[%s207_s27 + $0x10] sm:$0xff]   ;;  %s705_s8 = sshll.u32 %s1082_s16, 6 }
   0xf   : > { %493 = vrot.lane.b32.xlu1 %v491_v3, %s767_s22  ;;  %546 = vrot.lane.b32.xlu2 %v544_v4, %s768_s23  ;;  %v829_v10 = vunpack.c.h.bf16 %v738_v8  ;;  %v831_v11 = vunpack.c.h.bf16 %v707_v9  ;;  %v833_v12 = vunpack.c.l.bf16 %v707_v9  ;;  %v841_v18 = vunpack.c.l.bf16 %v739_v17  ;;  %v740_v24 = vld [vmem:[%s207_s27 + $0x18] sm:$0xff]   ;;  %v723_v41 = vld [vmem:[%s880_s7] sm:$0xff]   ;;  %s1028_s11 = scalar_lea.vmem %s1080_s4, %s705_s8 }
  0x10   : > { %v843_v19 = vunpack.c.l.bf16 %v738_v8  ;;  %v845_v20 = vunpack.c.h.bf16 %v739_v17  ;;  %v853_v26 = vunpack.c.h.bf16 %v740_v24  ;;  %v855_v27 = vunpack.c.l.bf16 %v740_v24  ;;  %v741_v47 = vld [vmem:[%s880_s7 + $0x8] sm:$0xff]   ;;  %v743_v53 = vld [vmem:[%s880_s7 + $0x18] sm:$0xff]   ;;  %v742_v3 = vld [vmem:[%s880_s7 + $0x10] sm:$0xff]  }
  0x11   : > { %v889_v42 = vunpack.c.l.bf16 %v723_v41  ;;  %v898_v48 = vunpack.c.h.bf16 %v741_v47  ;;  %v910_v54 = vunpack.c.l.bf16 %v743_v53  ;;  %v239_v55 = vmul.f32 %v829_v10, %v902_v50 }
  0x12   : > { %v919_v59 = vunpack.c.l.bf16 %v741_v47  ;;  %v921_v60 = vunpack.c.h.bf16 %v723_v41  ;;  %v931_v4 = vunpack.c.h.bf16 %v742_v3  ;;  %v240_v24 = vmul.f32 %v841_v18, %v902_v50 }
  0x16   : > { %299 = vrot.lane.b32.xlu0 %v297_v5, %s767_s22  ;;  %v933_v5 = vunpack.c.l.bf16 %v742_v3 }
  0x1e   : > { %352 = vrot.lane.b32.xlu0 %v350_v6, %s768_s23 }
  0x26   : > { %440 = vrot.lane.b32.xlu0 %v438_v7, %s766_s21 }
  0x69   : > { %v547_v9 = vpop.permute.xlu2 %546 }
  0x80   : > { %v247_v13 = vpop.permute.xlu0 %246 }
  0x81   : > { %v252_v14 = vmul.f32 %v829_v10, %v247_v13  ;;  %v250_v15 = vmul.f32 %v831_v11, %v247_v13  ;;  %v249_v16 = vmul.f32 %v833_v12, %v247_v13  ;;  %v253_v21 = vmul.f32 %v841_v18, %v247_v13  ;;  %v494_v61 = vpop.permute.xlu1 %493 }
  0x82   : > { %v251_v22 = vmul.f32 %v843_v19, %v247_v13  ;;  %v254_v23 = vmul.f32 %v845_v20, %v247_v13  ;;  %v256_v29 = vmul.f32 %v853_v26, %v247_v13  ;;  %v255_v30 = vmul.f32 %v855_v27, %v247_v13 }
  0x83   : > { %271 = vrot.lane.b32.xlu2 %v252_v14, %s769_s28  ;;  %267 = vrot.lane.b32.xlu1 %v250_v15, %s769_s28  ;;  %v497_v1 = vmul.f32 %v921_v60, %v494_v61  ;;  %v500_v6 = vmul.f32 %v933_v5, %v494_v61  ;;  %v496_v13 = vmul.f32 %v889_v42, %v494_v61 }
  0x84   : > { %265 = vrot.lane.b32.xlu0 %v249_v16, %s769_s28 }
  0x88   : > { %v300_v25 = vpop.permute.xlu0 %299 }
  0x89   : > { %v304_v28 = vmul.f32 %v843_v19, %v300_v25  ;;  %v303_v31 = vmul.f32 %v831_v11, %v300_v25  ;;  %v302_v32 = vmul.f32 %v833_v12, %v300_v25  ;;  %v307_v33 = vmul.f32 %v845_v20, %v300_v25 }
  0x8a   : > { %v306_v36 = vmul.f32 %v841_v18, %v300_v25  ;;  %v305_v37 = vmul.f32 %v829_v10, %v300_v25  ;;  %v309_v39 = vmul.f32 %v853_v26, %v300_v25  ;;  %v308_v40 = vmul.f32 %v855_v27, %v300_v25 }
  0x8b   : > { %273 = vrot.lane.b32.xlu2 %v253_v21, %s769_s28  ;;  %269 = vrot.lane.b32.xlu1 %v251_v22, %s769_s28  ;;  %v499_v21 = vmul.f32 %v898_v48, %v494_v61  ;;  %v498_v22 = vmul.f32 %v919_v59, %v494_v61 }
  0x8c   : > { %275 = vrot.lane.b32.xlu0 %v254_v23, %s769_s28  ;;  %v551_v23 = vmul.f32 %v919_v59, %v547_v9 }
  0x90   : > { %v353_v34 = vpop.permute.xlu0 %352 }
  0x91   : > { %v357_v35 = vmul.f32 %v843_v19, %v353_v34  ;;  %v360_v38 = vmul.f32 %v845_v20, %v353_v34  ;;  %v356_v44 = vmul.f32 %v831_v11, %v353_v34  ;;  %v355_v45 = vmul.f32 %v833_v12, %v353_v34 }
  0x92   : > { %v359_v51 = vmul.f32 %v841_v18, %v353_v34  ;;  %v358_v52 = vmul.f32 %v829_v10, %v353_v34  ;;  %v362_v57 = vmul.f32 %v853_v26, %v353_v34  ;;  %v361_v58 = vmul.f32 %v855_v27, %v353_v34 }
  0x93   : > { %279 = vrot.lane.b32.xlu2 %v256_v29, %s769_s28  ;;  %277 = vrot.lane.b32.xlu1 %v255_v30, %s769_s28  ;;  %v941_v10 = vunpack.c.h.bf16 %v743_v53  ;;  %v554_v29 = vmul.f32 %v931_v4, %v547_v9  ;;  %v502_v30 = vmul.f32 %v910_v54, %v494_v61  ;;  %v550_v34 = vmul.f32 %v921_v60, %v547_v9 }
  0x94   : > { %322 = vrot.lane.b32.xlu0 %v304_v28, %s770_s29 }
  0x95   : > { %v503_v14 = vmul.f32 %v941_v10, %v494_v61 }
  0x98   : > { %v441_v43 = vpop.permute.xlu0 %440 }
  0x99   : > { %v443_v46 = vmul.f32 %v889_v42, %v441_v43  ;;  %v446_v49 = vmul.f32 %v898_v48, %v441_v43  ;;  %v449_v56 = vmul.f32 %v910_v54, %v441_v43  ;;  %v445_v62 = vmul.f32 %v919_v59, %v441_v43 }
  0x9a   : > { %v444_v63 = vmul.f32 %v921_v60, %v441_v43  ;;  %v448_v7 = vmul.f32 %v931_v4, %v441_v43  ;;  %v447_v8 = vmul.f32 %v933_v5, %v441_v43  ;;  %v450_v15 = vmul.f32 %v941_v10, %v441_v43 }
  0x9b   : > { %320 = vrot.lane.b32.xlu2 %v303_v31, %s770_s29  ;;  %318 = vrot.lane.b32.xlu1 %v302_v32, %s770_s29  ;;  %v501_v31 = vmul.f32 %v931_v4, %v494_v61  ;;  %v243_v32 = vmul.f32 %v853_v26, %v902_v50  ;;  %v236_v26 = vmul.f32 %v833_v12, %v902_v50 }
  0x9c   : > { %328 = vrot.lane.b32.xlu0 %v307_v33, %s770_s29  ;;  %v241_v12 = vmul.f32 %v845_v20, %v902_v50 }
  0xa3   : > { %326 = vrot.lane.b32.xlu2 %v306_v36, %s770_s29  ;;  %324 = vrot.lane.b32.xlu1 %v305_v37, %s770_s29  ;;  %v237_v36 = vmul.f32 %v831_v11, %v902_v50  ;;  %v238_v11 = vmul.f32 %v843_v19, %v902_v50  ;;  %v242_v19 = vmul.f32 %v855_v27, %v902_v50 }
  0xa4   : > { %375 = vrot.lane.b32.xlu0 %v357_v35, %s771_s30  ;;  %v549_v35 = vmul.f32 %v889_v42, %v547_v9 }
  0xab   : > { %332 = vrot.lane.b32.xlu2 %v309_v39, %s770_s29  ;;  %330 = vrot.lane.b32.xlu1 %v308_v40, %s770_s29 }
  0xac   : > { %381 = vrot.lane.b32.xlu0 %v360_v38, %s771_s30 }
  0xb3   : > { %373 = vrot.lane.b32.xlu2 %v356_v44, %s771_s30  ;;  %371 = vrot.lane.b32.xlu1 %v355_v45, %s771_s30  ;;  %v553_v44 = vmul.f32 %v933_v5, %v547_v9  ;;  %v552_v45 = vmul.f32 %v898_v48, %v547_v9 }
  0xb4   : > { %459 = vrot.lane.b32.xlu0 %v443_v46, %s769_s28 }
  0xbb   : > { %379 = vrot.lane.b32.xlu2 %v359_v51, %s771_s30  ;;  %377 = vrot.lane.b32.xlu1 %v358_v52, %s771_s30 }
  0xbc   : > { %465 = vrot.lane.b32.xlu0 %v446_v49, %s769_s28 }
  0xc3   : > { %385 = vrot.lane.b32.xlu2 %v362_v57, %s771_s30  ;;  %383 = vrot.lane.b32.xlu1 %v361_v58, %s771_s30 }
  0xc4   : > { %471 = vrot.lane.b32.xlu0 %v449_v56, %s769_s28  ;;  %v555_v56 = vmul.f32 %v910_v54, %v547_v9 }
  0xcb   : > { %463 = vrot.lane.b32.xlu2 %v445_v62, %s769_s28  ;;  %461 = vrot.lane.b32.xlu1 %v444_v63, %s769_s28 }
  0xcc   : > { %514 = vrot.lane.b32.xlu0 %v497_v1, %s770_s29  ;;  %v403_v1 = vperm.slane %v808_v0, 4 }
  0xd3   : > { %469 = vrot.lane.b32.xlu2 %v448_v7, %s769_s28  ;;  %467 = vrot.lane.b32.xlu1 %v447_v8, %s769_s28 }
  0xd4   : > { %520 = vrot.lane.b32.xlu0 %v500_v6, %s770_s29 }
  0xdb   : > { %512 = vrot.lane.b32.xlu2 %v496_v13, %s770_s29  ;;  %473 = vrot.lane.b32.xlu1 %v450_v15, %s769_s28 }
  0xdc   : > { %526 = vrot.lane.b32.xlu0 %v503_v14, %s770_s29 }
  0xdd   : > { %v272_v16 = vpop.permute.xlu2 %271 }
  0xde   : > { %v949_v17 = vadd.f32 %v272_v16, %v239_v55  ;;  %v556_v55 = vmul.f32 %v941_v10, %v547_v9 }
  0xe3   : > { %518 = vrot.lane.b32.xlu2 %v499_v21, %s770_s29  ;;  %516 = vrot.lane.b32.xlu1 %v498_v22, %s770_s29 }
  0xe4   : > { %569 = vrot.lane.b32.xlu0 %v551_v23, %s771_s30 }
  0xe5   : > { %v274_v25 = vpop.permute.xlu2 %273 }
  0xe6   : > { %v293_v28 = vadd.f32 %v274_v25, %v240_v24 }
  0xeb   : > { %524 = vrot.lane.b32.xlu2 %v502_v30, %s770_s29  ;;  %522 = vrot.lane.b32.xlu1 %v501_v31, %s770_s29 }
  0xec   : > { %575 = vrot.lane.b32.xlu0 %v554_v29, %s771_s30 }
  0xed   : > { %v280_v18 = vpop.permute.xlu2 %279 }
  0xee   : > { %v296_v33 = vadd.f32 %v280_v18, %v243_v32 }
  0xf3   : > { %567 = vrot.lane.b32.xlu2 %v550_v34, %s771_s30  ;;  %565 = vrot.lane.b32.xlu1 %v549_v35, %s771_s30 }
  0xf5   : > { %v321_v37 = vpop.permute.xlu2 %320  ;;  %v268_v38 = vpop.permute.xlu1 %267 }
  0xf6   : > { %v290_v39 = vadd.f32 %v268_v38, %v237_v36  ;;  %v266_v40 = vpop.permute.xlu0 %265 }
  0xf7   : > { %v289_v41 = vadd.f32 %v266_v40, %v236_v26 }
  0xf8   : > { %v343_v43 = vadd.f32 %v321_v37, %v290_v39 }
  0xfb   : > { %573 = vrot.lane.b32.xlu2 %v553_v44, %s771_s30  ;;  %571 = vrot.lane.b32.xlu1 %v552_v45, %s771_s30 }
  0xfd   : > { %v327_v46 = vpop.permute.xlu2 %326  ;;  %v270_v47 = vpop.permute.xlu1 %269 }
  0xfe   : > { %v346_v49 = vadd.f32 %v327_v46, %v293_v28  ;;  %v291_v51 = vadd.f32 %v270_v47, %v238_v11  ;;  %v276_v52 = vpop.permute.xlu0 %275 }
  0xff   : > { %v294_v53 = vadd.f32 %v276_v52, %v241_v12 }
 0x103   : > { %579 = vrot.lane.b32.xlu2 %v556_v55, %s771_s30  ;;  %577 = vrot.lane.b32.xlu1 %v555_v56, %s771_s30 }
 0x105   : > { %v333_v57 = vpop.permute.xlu2 %332  ;;  %v278_v58 = vpop.permute.xlu1 %277 }
 0x106   : > { %v349_v20 = vadd.f32 %v333_v57, %v296_v33  ;;  %v295_v61 = vadd.f32 %v278_v58, %v242_v19  ;;  %v323_v62 = vpop.permute.xlu0 %322  ;;  %v1017_v19 = vperm.slane %v814_v2, 4 }
 0x107   : > { %v344_v63 = vadd.f32 %v323_v62, %v291_v51 }
 0x10d   : > { %v374_v3 = vpop.permute.xlu2 %373  ;;  %v319_v6 = vpop.permute.xlu1 %318 }
 0x10e   : > { %v396_v7 = vadd.f32 %v374_v3, %v343_v43  ;;  %v342_v8 = vadd.f32 %v319_v6, %v289_v41  ;;  %v329_v9 = vpop.permute.xlu0 %328 }
 0x10f   : > { %v347_v13 = vadd.f32 %v329_v9, %v294_v53 }
 0x110   : > { %v405_v14 = vadd.f32 %v403_v1, %v396_v7 }
 0x115   : > { %v380_v27 = vpop.permute.xlu2 %379  ;;  %v325_v50 = vpop.permute.xlu1 %324 }
 0x116   : > { %v399_v15 = vadd.f32 %v380_v27, %v346_v49  ;;  %v345_v16 = vadd.f32 %v325_v50, %v949_v17  ;;  %v376_v21 = vpop.permute.xlu0 %375  ;;  %v1010_v49 = vperm.slane %v814_v2, 0 }
 0x117   : > { %v397_v22 = vadd.f32 %v376_v21, %v344_v63 }
 0x118   : > { %v408_v23 = vadd.f32 %v403_v1, %v399_v15  ;;  %v431_v51 = vmul.f32 %v921_v60, %v1010_v49  ;;  %v434_v58 = vmul.f32 %v933_v5, %v1010_v49  ;;  %v432_v60 = vmul.f32 %v919_v59, %v1010_v49 }
 0x119   : > { %v991_v24 = vadd.f32 %v403_v1, %v397_v22  ;;  %v437_v7 = vmul.f32 %v941_v10, %v1010_v49  ;;  %v435_v50 = vmul.f32 %v931_v4, %v1010_v49 }
 0x11d   : > { %v386_v25 = vpop.permute.xlu2 %385  ;;  %v331_v28 = vpop.permute.xlu1 %330 }
 0x11e   : > { %v402_v0 = vadd.f32 %v386_v25, %v349_v20  ;;  %v348_v29 = vadd.f32 %v331_v28, %v295_v61  ;;  %v382_v30 = vpop.permute.xlu0 %381  ;;  %v430_v25 = vmul.f32 %v889_v42, %v1010_v49 }
 0x11f   : > { %v400_v31 = vadd.f32 %v382_v30, %v347_v13 }
 0x120   : > { %v993_v32 = vadd.f32 %v403_v1, %v402_v0 }
 0x121   : > { %v995_v18 = vadd.f32 %v403_v1, %v400_v31 }
 0x125   : > { %v464_v33 = vpop.permute.xlu2 %463  ;;  %v372_v34 = vpop.permute.xlu1 %371 }
 0x126   : > { %v395_v35 = vadd.f32 %v372_v34, %v342_v8  ;;  %v460_v36 = vpop.permute.xlu0 %459  ;;  %v485_v5 = vadd.f32 %v464_v33, %v432_v60 }
 0x127   : > { %v483_v33 = vadd.f32 %v460_v36, %v430_v25 }
 0x128   : > { %v997_v17 = vadd.f32 %v403_v1, %v395_v35 }
 0x12d   : > { %v470_v26 = vpop.permute.xlu2 %469  ;;  %v378_v37 = vpop.permute.xlu1 %377 }
 0x12e   : > { %v398_v38 = vadd.f32 %v378_v37, %v345_v16  ;;  %v999_v39 = vpop.permute.xlu0 %465  ;;  %v488_v10 = vadd.f32 %v470_v26, %v435_v50 }
 0x130   : > { %v1001_v40 = vadd.f32 %v403_v1, %v398_v38 }
 0x135   : > { %v513_v41 = vpop.permute.xlu2 %512  ;;  %v384_v43 = vpop.permute.xlu1 %383 }
 0x136   : > { %v401_v44 = vadd.f32 %v384_v43, %v348_v29  ;;  %v1003_v45 = vpop.permute.xlu0 %471  ;;  %v536_v37 = vadd.f32 %v513_v41, %v483_v33 }
 0x138   : > { %v1005_v11 = vadd.f32 %v403_v1, %v401_v44 }
 0x13d   : > { %v1007_v12 = vpop.permute.xlu2 %518  ;;  %v462_v46 = vpop.permute.xlu1 %461 }
 0x13e   : > { %v515_v47 = vpop.permute.xlu0 %514  ;;  %v484_v56 = vadd.f32 %v462_v46, %v431_v51 }
 0x140   : > { %v537_v57 = vadd.f32 %v515_v47, %v484_v56 }
 0x145   : > { %v1014_v52 = vpop.permute.xlu2 %524  ;;  %v468_v53 = vpop.permute.xlu1 %467 }
 0x146   : > { %v521_v55 = vpop.permute.xlu0 %520  ;;  %v487_v1 = vadd.f32 %v468_v53, %v434_v58 }
 0x148   : > { %v540_v6 = vadd.f32 %v521_v55, %v487_v1 }
 0x14d   : > { %v568_v20 = vpop.permute.xlu2 %567  ;;  %v474_v61 = vpop.permute.xlu1 %473 }
 0x14e   : > { %v590_v62 = vadd.f32 %v568_v20, %v537_v57  ;;  %v527_v63 = vpop.permute.xlu0 %526  ;;  %v490_v15 = vadd.f32 %v474_v61, %v437_v7 }
 0x150   : > { %v599_v3 = vadd.f32 %v1017_v19, %v590_v62  ;;  %v543_v28 = vadd.f32 %v527_v63, %v490_v15 }
 0x152   : > { %v607_v2 = vadd.f32 %v599_v3, %v405_v14 }
 0x154   : > { %616 = vst.msk [vmem:[%s1028_s11 + $0x8] sm:$0xff] %vm614_vm0, %v607_v2 }
 0x155   : > { %v574_v59 = vpop.permute.xlu2 %573  ;;  %v517_v8 = vpop.permute.xlu1 %516 }
 0x156   : > { %v593_v9 = vadd.f32 %v574_v59, %v540_v6  ;;  %v538_v13 = vadd.f32 %v517_v8, %v485_v5  ;;  %v570_v27 = vpop.permute.xlu0 %569 }
 0x158   : > { %v602_v14 = vadd.f32 %v1017_v19, %v593_v9  ;;  %v591_v16 = vadd.f32 %v570_v27, %v538_v13 }
 0x15a   : > { %v610_v21 = vadd.f32 %v602_v14, %v408_v23  ;;  %v600_v22 = vadd.f32 %v1017_v19, %v591_v16 }
 0x15c   : > { %619 = vst.msk [vmem:[%s1028_s11 + $0x20] sm:$0xff] %vm614_vm0, %v610_v21  ;;  %v608_v0 = vadd.f32 %v600_v22, %v991_v24  ;;  %v433_v24 = vmul.f32 %v898_v48, %v1010_v49 }
 0x15d   : > { %v580_v29 = vpop.permute.xlu2 %579  ;;  %v523_v4 = vpop.permute.xlu1 %522 }
 0x15e   : > { %617 = vst.msk [vmem:[%s1028_s11 + $0x10] sm:$0xff] %vm614_vm0, %v608_v0  ;;  %v596_v30 = vadd.f32 %v580_v29, %v543_v28  ;;  %v541_v31 = vadd.f32 %v523_v4, %v488_v10  ;;  %v576_v23 = vpop.permute.xlu0 %575  ;;  %v486_v44 = vadd.f32 %v999_v39, %v433_v24 }
 0x160   : > { %v605_v34 = vadd.f32 %v1017_v19, %v596_v30  ;;  %v594_v42 = vadd.f32 %v576_v23, %v541_v31  ;;  %v539_v47 = vadd.f32 %v1007_v12, %v486_v44 }
 0x162   : > { %v613_v35 = vadd.f32 %v605_v34, %v993_v32  ;;  %v603_v26 = vadd.f32 %v1017_v19, %v594_v42 }
 0x164   : > { %622 = vst.msk [vmem:[%s1028_s11 + $0x38] sm:$0xff] %vm614_vm0, %v613_v35  ;;  %v611_v38 = vadd.f32 %v603_v26, %v995_v18  ;;  %v436_v18 = vmul.f32 %v910_v54, %v1010_v49 }
 0x165   : > { %v566_v43 = vpop.permute.xlu1 %565 }
 0x166   : > { %620 = vst.msk [vmem:[%s1028_s11 + $0x28] sm:$0xff] %vm614_vm0, %v611_v38  ;;  %v589_v36 = vadd.f32 %v566_v43, %v536_v37  ;;  %v489_v53 = vadd.f32 %v1003_v45, %v436_v18 }
 0x168   : > { %v598_v46 = vadd.f32 %v1017_v19, %v589_v36  ;;  %v542_v55 = vadd.f32 %v1014_v52, %v489_v53 }
 0x16a   : > { %v606_v32 = vadd.f32 %v598_v46, %v997_v17 }
 0x16c   : > { %615 = vst.msk [vmem:[%s1028_s11] sm:$0xff] %vm614_vm0, %v606_v32 }
 0x16d   : > { %v572_v48 = vpop.permute.xlu1 %571 }
 0x16e   : > { %v592_v41 = vadd.f32 %v572_v48, %v539_v47 }
 0x170   : > { %v601_v51 = vadd.f32 %v1017_v19, %v592_v41 }
 0x172   : > { %v609_v39 = vadd.f32 %v601_v51, %v1001_v40 }
 0x174   : > { %618 = vst.msk [vmem:[%s1028_s11 + $0x18] sm:$0xff] %vm614_vm0, %v609_v39 }
 0x175   : > { %v578_v17 = vpop.permute.xlu1 %577 }
 0x176   : > { %v595_v56 = vadd.f32 %v578_v17, %v542_v55 }
 0x178   : > { %v604_v12 = vadd.f32 %v1017_v19, %v595_v56 }
 0x17a   : > { %v612_v57 = vadd.f32 %v604_v12, %v1005_v11 }
 0x17c   : > { %621 = vst.msk [vmem:[%s1028_s11 + $0x30] sm:$0xff] %vm614_vm0, %v612_v57 }
 0x17d PF: > { %s14_s15 = sadd.s32 1, %s764_s15  }
 0x17e   : > { %p11_p4 = scmp.ge.s32.totalorder %s14_s15, 4  }
 0x180   :  { %13 = sbr.rel (!%p11_p4) target bundleno = 1 (0x1), region = 69 }

// kernel: search_reduction_cell_forward.15
= control target key start
LH: loop header
LB: loop body
LE: loop exit
PB: predicated region body
PF: predicated region fallthrough
CT: control target
= control target key end

     0   :  { %s2020_s15 = smov 0   ;;  %s3098_s0 = inlined_call_operand.vmem [shape: f32[2,80,48], index: 0, kind: input, shape index: {}]   ;;  %s3099_s1 = inlined_call_operand.vmem [shape: f32[9,64,1], index: 1, kind: input, shape index: {}]   ;;  %s3100_s2 = inlined_call_operand.vmem [shape: bf16[3,48,16], index: 2, kind: input, shape index: {}]   ;;  %s3101_s3 = inlined_call_operand.vmem [shape: bf16[2,64,64], index: 3, kind: output, shape index: {0}]   ;;  %s3102_s4 = inlined_call_operand.vmem [shape: f32[2,8,16], index: 4, kind: output, shape index: {1}]  }
   0x1 LB: > { %s1803_s16 = sadd.s32 4294967295, %s1988_s15   ;;  %p1807_p0 = scmp.ge.s32.totalorder %s1988_s15, 1  ;;  %s1988_s15 = sphi %s2020_s15, %s15_s15  }
   0x2   : > { %p165_p1 = scmp.lt.s32.totalorder %s1988_s15, 3 }
   0x4   : > { %p166_p2 = pnand %p1807_p0, %p165_p1 }
   0x5   : > { %p195_p3 = scmp.lt.s32.totalorder (!%p166_p2), %s1803_s16, 1  ;;  %s1991_s5 = smov (!%p166_p2), 112  }
   0x6   : > { %169 = sbr.rel (%p166_p2) target bundleno = 1034 (0x40a), region = 32  ;;  %s1992_s6 = smov (!%p166_p2), 96  }
   0xb   : > { %v430_v0 = vld [vmem:[%s3099_s1 + $0x20] sm:$0xff]  ;;  %v428_v1 = vld [vmem:[%s3099_s1 + $0x10] sm:$0xff]  ;;  %v1990_v3 = vmov 0   ;;  %v431_v4 = vld [vmem:[%s3099_s1 + $0x28] sm:$0xff]  ;;  %s3110_s16 = smov (!%p195_p3, %s1803_s16), 1  ;;  %vm259_vm0 = vcmask 392192  }
   0xc   : > { %v426_v2 = vld [vmem:[%s3099_s1] sm:$0xff]  ;;  %1973 = vset.pattern.permute.xlu2 %v1990_v3  ;;  %1972 = vset.pattern.permute.xlu1 %v1990_v3  ;;  %v429_v5 = vld [vmem:[%s3099_s1 + $0x18] sm:$0xff]  ;;  %v427_v6 = vld [vmem:[%s3099_s1 + $0x8] sm:$0xff]  ;;  %s1957_s27 = smul.u32 80, %s3110_s16  ;;  %vm1290_vm1 = vcmask 130048   ;;  %vm1441_vm2 = vcmask 261248  }
   0xd   : > { %1971 = vset.pattern.permute.xlu0 %v1990_v3  ;;  %456 = vperm.xlu2 %1973, %v430_v0   ;;  %v1872_v7 = vld [vmem:[%s3099_s1 + $0x40] sm:$0xff]  ;;  %v433_v8 = vld [vmem:[%s3099_s1 + $0x38] sm:$0xff]  ;;  %v432_v9 = vld [vmem:[%s3099_s1 + $0x30] sm:$0xff]  ;;  %vm1500_vm3 = vcmask 1040384   ;;  %vm1502_vm4 = vcmask 1041408   ;;  %vm1504_vm5 = vcmask 1042432  }
   0xe   : > { %446 = vperm.xlu1 %1972, %v428_v1   ;;  %436 = vperm.xlu0 %1971, %v426_v2   ;;  %v1875_v10 = vld [vmem:[%s3099_s1 + $0x58] sm:$0xff]  ;;  %v1874_v11 = vld [vmem:[%s3099_s1 + $0x50] sm:$0xff]  ;;  %v1873_v12 = vld [vmem:[%s3099_s1 + $0x48] sm:$0xff]  ;;  %s2129_s30 = scalar_lea.vmem %s3098_s0, %s1957_s27  ;;  %vm1506_vm6 = vcmask 1043456   ;;  %vm1508_vm7 = vcmask 1044480   ;;  %vm1663_vm8 = vcmask 261120  }
   0xf   : > { %v1878_v13 = vld [vmem:[%s3099_s1 + $0x70] sm:$0xff]  ;;  %v1877_v14 = vld [vmem:[%s3099_s1 + $0x68] sm:$0xff]  ;;  %v1876_v15 = vld [vmem:[%s3099_s1 + $0x60] sm:$0xff]  ;;  %s1938_s29 = sshll.u32 %s3110_s16, 5  ;;  %vm1708_vm9 = vcmask 519168   ;;  %s1811_s9 = sshll.u32 %s3110_s16, 3 }
  0x10   : > { %v1882_v16 = vld [vmem:[%s3099_s1 + $0x90] sm:$0xff]  ;;  %v1881_v17 = vld [vmem:[%s3099_s1 + $0x88] sm:$0xff]  ;;  %v1879_v18 = vld [vmem:[%s3099_s1 + $0x78] sm:$0xff]  ;;  %s3058_s8 = scalar_lea.vmem %s3101_s3, %s1938_s29  ;;  %vm1510_vm10 = vcmask 1045504   ;;  %vm1512_vm11 = vcmask 1046528   ;;  %s208_s12 = scalar_lea.vmem %s3102_s4, %s1811_s9 }
  0x11   : > { %v1885_v19 = vld [vmem:[%s3099_s1 + $0xa8] sm:$0xff]  ;;  %v1884_v20 = vld [vmem:[%s3099_s1 + $0xa0] sm:$0xff]  ;;  %v1887_v23 = vld [vmem:[%s3099_s1 + $0xb8] sm:$0xff] }
  0x12   : > { %v1880_v21 = vld [vmem:[%s3099_s1 + $0x80] sm:$0xff]  ;;  %v1889_v22 = vld [vmem:[%s3099_s1 + $0xc8] sm:$0xff]  ;;  %v1883_v24 = vld [vmem:[%s3099_s1 + $0x98] sm:$0xff] }
  0x13   : > { %v1892_v25 = vld [vmem:[%s3099_s1 + $0xe0] sm:$0xff]  ;;  %v1886_v27 = vld [vmem:[%s3099_s1 + $0xb0] sm:$0xff]  ;;  %v1891_v28 = vld [vmem:[%s3099_s1 + $0xd8] sm:$0xff] }
  0x14   : > { %v1888_v26 = vld [vmem:[%s3099_s1 + $0xc0] sm:$0xff]  ;;  %v1890_v29 = vld [vmem:[%s3099_s1 + $0xd0] sm:$0xff]  ;;  %v2137_v35 = vld [vmem:[%s2129_s30 + $0x18] sm:$0xff] }
  0x15   : > { %461 = vperm.xlu2 %1973, %v431_v4   ;;  %v2132_v32 = vld [vmem:[%s2129_s30] sm:$0xff]  ;;  %v2146_v40 = vld [vmem:[%s2129_s30 + $0x30] sm:$0xff]  ;;  %v2164_v50 = vld [vmem:[%s2129_s30 + $0x28] sm:$0xff] }
  0x16   : > { %451 = vperm.xlu1 %1972, %v429_v5   ;;  %441 = vperm.xlu0 %1971, %v427_v6   ;;  %v2155_v45 = vld [vmem:[%s2129_s30 + $0x10] sm:$0xff]  ;;  %v2167_v52 = vld [vmem:[%s2129_s30 + $0x8] sm:$0xff]  ;;  %v2179_v59 = vld [vmem:[%s2129_s30 + $0x20] sm:$0xff] }
  0x17   : > { %v1894_v58 = vld [vmem:[%s3099_s1 + $0xf0] sm:$0xff]  ;;  %v1897_v0 = vld [vmem:[%s3099_s1 + $0x108] sm:$0xff]  ;;  %v2189_v1 = vld [vmem:[%s2129_s30 + $0x38] sm:$0xff] }
  0x18   : > { %v1900_v6 = vld [vmem:[%s3099_s1 + $0x120] sm:$0xff] }
  0x1d   : > { %493 = vperm.xlu2 %1973, %v1872_v7  }
  0x1e   : > { %471 = vperm.xlu1 %1972, %v433_v8   ;;  %466 = vperm.xlu0 %1971, %v432_v9  }
  0x25   : > { %508 = vperm.xlu2 %1973, %v1875_v10  }
  0x26   : > { %503 = vperm.xlu1 %1972, %v1874_v11   ;;  %498 = vperm.xlu0 %1971, %v1873_v12   ;;  %v1903_v11 = vld [vmem:[%s3099_s1 + $0x138] sm:$0xff] }
  0x2d   : > { %523 = vperm.xlu2 %1973, %v1878_v13  }
  0x2e   : > { %518 = vperm.xlu1 %1972, %v1877_v14   ;;  %513 = vperm.xlu0 %1971, %v1876_v15  }
  0x35   : > { %600 = vperm.xlu2 %1973, %v1882_v16  }
  0x36   : > { %595 = vperm.xlu1 %1972, %v1881_v17   ;;  %528 = vperm.xlu0 %1971, %v1879_v18   ;;  %v1893_v17 = vld [vmem:[%s3099_s1 + $0xe8] sm:$0xff] }
  0x3d   : > { %615 = vperm.xlu2 %1973, %v1885_v19   ;;  %v1896_v19 = vld [vmem:[%s3099_s1 + $0x100] sm:$0xff] }
  0x3e   : > { %610 = vperm.xlu1 %1972, %v1884_v20   ;;  %590 = vperm.xlu0 %1971, %v1880_v21   ;;  %v1895_v20 = vld [vmem:[%s3099_s1 + $0xf8] sm:$0xff] }
  0x3f   : > { %v1899_v21 = vld [vmem:[%s3099_s1 + $0x118] sm:$0xff] }
  0x45   : > { %692 = vperm.xlu2 %1973, %v1889_v22   ;;  %v1898_v22 = vld [vmem:[%s3099_s1 + $0x110] sm:$0xff] }
  0x46   : > { %625 = vperm.xlu1 %1972, %v1887_v23   ;;  %605 = vperm.xlu0 %1971, %v1883_v24   ;;  %v1902_v23 = vld [vmem:[%s3099_s1 + $0x130] sm:$0xff]  ;;  %v1901_v24 = vld [vmem:[%s3099_s1 + $0x128] sm:$0xff] }
  0x4d   : > { %707 = vperm.xlu2 %1973, %v1892_v25  }
  0x4e   : > { %687 = vperm.xlu1 %1972, %v1888_v26   ;;  %620 = vperm.xlu0 %1971, %v1886_v27  }
  0x56   : > { %702 = vperm.xlu1 %1972, %v1891_v28   ;;  %697 = vperm.xlu0 %1971, %v1890_v29  }
  0x67   : > { %v2117_v30 = vpop.permute.xlu2 %456 }
  0x6f   : > { %v2124_v31 = vpop.permute.xlu2 %461 }
  0x77   : > { %v494_v33 = vpop.permute.xlu2 %493 }
  0x78   : > { %v531_v34 = vadd.f32 %v494_v33, %v2132_v32 }
  0x7a   : > { %547 = vrot.lane.b32.xlu1 %v531_v34, %s1991_s5 }
  0x7f   : > { %v509_v36 = vpop.permute.xlu2 %508 }
  0x80   : > { %v534_v37 = vadd.f32 %v509_v36, %v2137_v35  ;;  %v2140_v38 = vpop.permute.xlu1 %446  ;;  %v2142_v39 = vpop.permute.xlu0 %436 }
  0x82   : > { %553 = vrot.lane.b32.xlu1 %v534_v37, %s1991_s5 }
  0x87   : > { %v524_v41 = vpop.permute.xlu2 %523 }
  0x88   : > { %v537_v42 = vadd.f32 %v524_v41, %v2146_v40  ;;  %v2149_v43 = vpop.permute.xlu1 %451  ;;  %v2151_v44 = vpop.permute.xlu0 %441 }
  0x89   : > { %v477_v33 = vadd.f32 %v2149_v43, %v2137_v35  ;;  %v475_v34 = vadd.f32 %v2151_v44, %v2167_v52  ;;  %v474_v44 = vadd.f32 %v2142_v39, %v2132_v32  ;;  %v479_v39 = vadd.f32 %v2124_v31, %v2164_v50 }
  0x8a   : > { %559 = vrot.lane.b32.xlu1 %v537_v42, %s1991_s5 }
  0x8f   : > { %v601_v46 = vpop.permute.xlu2 %600 }
  0x90   : > { %v630_v47 = vadd.f32 %v601_v46, %v2155_v45  ;;  %v2158_v48 = vpop.permute.xlu1 %471  ;;  %v2160_v49 = vpop.permute.xlu0 %466 }
  0x91   : > { %v480_v46 = vadd.f32 %v2160_v49, %v2146_v40 }
  0x92   : > { %648 = vrot.lane.b32.xlu1 %v630_v47, %s1992_s6 }
  0x97   : > { %v616_v51 = vpop.permute.xlu2 %615 }
  0x98   : > { %v633_v53 = vadd.f32 %v616_v51, %v2164_v50  ;;  %v504_v54 = vpop.permute.xlu1 %503  ;;  %v499_v55 = vpop.permute.xlu0 %498 }
  0x99   : > { %v533_v56 = vadd.f32 %v504_v54, %v2155_v45  ;;  %v532_v57 = vadd.f32 %v499_v55, %v2167_v52  ;;  %v481_v54 = vadd.f32 %v2158_v48, %v2189_v1 }
  0x9a   : > { %654 = vrot.lane.b32.xlu1 %v633_v53, %s1992_s6 }
  0x9b   : > { %551 = vrot.lane.b32.xlu0 %v533_v56, %s1991_s5  ;;  %549 = vrot.lane.b32.xlu2 %v532_v57, %s1991_s5 }
  0x9f   : > { %v693_v26 = vpop.permute.xlu2 %692 }
  0xa0   : > { %v519_v60 = vpop.permute.xlu1 %518  ;;  %v514_v61 = vpop.permute.xlu0 %513  ;;  %v726_v31 = vadd.f32 %v693_v26, %v2155_v45 }
  0xa1   : > { %v536_v62 = vadd.f32 %v519_v60, %v2164_v50  ;;  %v535_v63 = vadd.f32 %v514_v61, %v2179_v59 }
  0xa2   : > { %717 = vperm.xlu1 %1972, %v1894_v58   ;;  %v476_v58 = vadd.f32 %v2140_v38, %v2155_v45 }
  0xa3   : > { %557 = vrot.lane.b32.xlu0 %v536_v62, %s1991_s5  ;;  %555 = vrot.lane.b32.xlu2 %v535_v63, %s1991_s5 }
  0xa7   : > { %v2232_v29 = vpop.permute.xlu2 %707 }
  0xa8   : > { %v596_v2 = vpop.permute.xlu1 %595  ;;  %v529_v3 = vpop.permute.xlu0 %528 }
  0xa9   : > { %v629_v4 = vadd.f32 %v596_v2, %v2167_v52  ;;  %v538_v5 = vadd.f32 %v529_v3, %v2189_v1 }
  0xaa   : > { %757 = vperm.xlu1 %1972, %v1897_v0  }
  0xab   : > { %646 = vrot.lane.b32.xlu0 %v629_v4, %s1992_s6  ;;  %561 = vrot.lane.b32.xlu2 %v538_v5, %s1991_s5 }
  0xb0   : > { %v611_v7 = vpop.permute.xlu1 %610  ;;  %v591_v8 = vpop.permute.xlu0 %590 }
  0xb1   : > { %v632_v9 = vadd.f32 %v611_v7, %v2179_v59  ;;  %v628_v10 = vadd.f32 %v591_v8, %v2132_v32 }
  0xb2   : > { %772 = vperm.xlu1 %1972, %v1900_v6  }
  0xb3   : > { %652 = vrot.lane.b32.xlu0 %v632_v9, %s1992_s6  ;;  %644 = vrot.lane.b32.xlu2 %v628_v10, %s1992_s6 }
  0xb8   : > { %v626_v12 = vpop.permute.xlu1 %625  ;;  %v606_v13 = vpop.permute.xlu0 %605 }
  0xb9   : > { %v635_v14 = vadd.f32 %v626_v12, %v2189_v1  ;;  %v631_v15 = vadd.f32 %v606_v13, %v2137_v35 }
  0xba   : > { %787 = vperm.xlu1 %1972, %v1903_v11  }
  0xbb   : > { %658 = vrot.lane.b32.xlu0 %v635_v14, %s1992_s6  ;;  %650 = vrot.lane.b32.xlu2 %v631_v15, %s1992_s6 }
  0xc0   : > { %v621_v16 = vpop.permute.xlu0 %620  ;;  %v688_v25 = vpop.permute.xlu1 %687 }
  0xc1   : > { %v634_v18 = vadd.f32 %v621_v16, %v2146_v40  ;;  %v2249_v63 = vadd.f32 %v688_v25, %v2167_v52 }
  0xc3   : > { %712 = vperm.xlu0 %1971, %v1893_v17   ;;  %656 = vrot.lane.b32.xlu2 %v634_v18, %s1992_s6 }
  0xc8   : > { %v703_v27 = vpop.permute.xlu1 %702  ;;  %v2242_v56 = vpop.permute.xlu0 %697 }
  0xc9   : > { %v2260_v6 = vadd.f32 %v703_v27, %v2179_v59  ;;  %v2283_v27 = vld [vmem:[%s2129_s30 + $0x40] sm:$0xff] }
  0xcb   : > { %752 = vperm.xlu0 %1971, %v1896_v19   ;;  %722 = vperm.xlu2 %1973, %v1895_v20   ;;  %v478_v20 = vadd.f32 %v2117_v30, %v2179_v59 }
  0xd3   : > { %767 = vperm.xlu0 %1971, %v1899_v21   ;;  %762 = vperm.xlu2 %1973, %v1898_v22  }
  0xdb   : > { %782 = vperm.xlu0 %1971, %v1902_v23   ;;  %777 = vperm.xlu2 %1973, %v1901_v24  }
  0xec   : > { %v548_v28 = vpop.permute.xlu1 %547 }
  0xed   : > { %v571_v60 = vmax.f32 %v474_v44, %v548_v28  ;;  %v1904_v44 = vld [vmem:[%s3099_s1 + $0x140] sm:$0xff] }
  0xf4   : > { %v554_v36 = vpop.permute.xlu1 %553 }
  0xf5   : > { %v550_v37 = vpop.permute.xlu2 %549  ;;  %v574_v41 = vmax.f32 %v477_v33, %v554_v36 }
  0xf6   : > { %v572_v42 = vmax.f32 %v475_v34, %v550_v37 }
  0xfc   : > { %v560_v47 = vpop.permute.xlu1 %559 }
  0xfd   : > { %v556_v51 = vpop.permute.xlu2 %555  ;;  %v577_v53 = vmax.f32 %v480_v46, %v560_v47  ;;  %v1906_v46 = vld [vmem:[%s3099_s1 + $0x150] sm:$0xff] }
  0xfe   : > { %v575_v21 = vmax.f32 %v478_v20, %v556_v51  ;;  %v727_v20 = vadd.f32 %v2242_v56, %v2137_v35 }
 0x104   : > { %v649_v55 = vpop.permute.xlu1 %648 }
 0x105   : > { %v562_v43 = vpop.permute.xlu2 %561 }
 0x106   : > { %v578_v57 = vmax.f32 %v481_v54, %v562_v43  ;;  %v1909_v43 = vld [vmem:[%s3099_s1 + $0x168] sm:$0xff] }
 0x10c   : > { %v655_v61 = vpop.permute.xlu1 %654 }
 0x10d   : > { %v552_v49 = vpop.permute.xlu0 %551  ;;  %v645_v62 = vpop.permute.xlu2 %644 }
 0x10e   : > { %v573_v0 = vmax.f32 %v476_v58, %v552_v49  ;;  %v2251_v48 = vmax.f32 %v571_v60, %v645_v62 }
 0x110   : > { %v2253_v2 = vmax.f32 %v573_v0, %v649_v55  ;;  %v733_v3 = vmax.f32 %v2251_v48, %v2249_v63  ;;  %v1910_v0 = vld [vmem:[%s3099_s1 + $0x170] sm:$0xff] }
 0x114   : > { %v718_v4 = vpop.permute.xlu1 %717 }
 0x115   : > { %v558_v38 = vpop.permute.xlu0 %557  ;;  %v651_v5 = vpop.permute.xlu2 %650  ;;  %v2271_v15 = vadd.f32 %v718_v4, %v2189_v1  ;;  %v1905_v4 = vld [vmem:[%s3099_s1 + $0x148] sm:$0xff] }
 0x116   : > { %v576_v7 = vmax.f32 %v479_v39, %v558_v38  ;;  %v2262_v8 = vmax.f32 %v574_v41, %v651_v5  ;;  %v1908_v38 = vld [vmem:[%s3099_s1 + $0x160] sm:$0xff]  ;;  %v1911_v5 = vld [vmem:[%s3099_s1 + $0x178] sm:$0xff] }
 0x118   : > { %v2264_v9 = vmax.f32 %v576_v7, %v655_v61  ;;  %v736_v10 = vmax.f32 %v2262_v8, %v2260_v6  ;;  %v1907_v61 = vld [vmem:[%s3099_s1 + $0x158] sm:$0xff] }
 0x11c   : > { %v758_v11 = vpop.permute.xlu1 %757 }
 0x11d   : > { %v647_v12 = vpop.permute.xlu0 %646  ;;  %v657_v13 = vpop.permute.xlu2 %656  ;;  %v791_v14 = vadd.f32 %v758_v11, %v2155_v45  ;;  %v729_v11 = vadd.f32 %v2232_v29, %v2164_v50 }
 0x11e   : > { %v669_v16 = vmax.f32 %v572_v42, %v647_v12  ;;  %v2273_v17 = vmax.f32 %v577_v53, %v657_v13 }
 0x11f   : > { %808 = vrot.lane.b32.xlu0 %v791_v14, %s1991_s5 }
 0x120   : > { %v734_v18 = vmax.f32 %v669_v16, %v726_v31  ;;  %v739_v19 = vmax.f32 %v2273_v17, %v2271_v15  ;;  %v1912_v15 = vld [vmem:[%s3099_s1 + $0x180] sm:$0xff] }
 0x124   : > { %v773_v22 = vpop.permute.xlu1 %772 }
 0x125   : > { %v653_v23 = vpop.permute.xlu0 %652  ;;  %v723_v24 = vpop.permute.xlu2 %722  ;;  %v794_v25 = vadd.f32 %v773_v22, %v2164_v50 }
 0x126   : > { %v672_v26 = vmax.f32 %v575_v21, %v653_v23  ;;  %v732_v37 = vadd.f32 %v723_v24, %v2283_v27 }
 0x127   : > { %814 = vrot.lane.b32.xlu0 %v794_v25, %s1991_s5 }
 0x128   : > { %v737_v12 = vmax.f32 %v672_v26, %v729_v11 }
 0x12c   : > { %v788_v28 = vpop.permute.xlu1 %787 }
 0x12d   : > { %v659_v33 = vpop.permute.xlu0 %658  ;;  %v763_v34 = vpop.permute.xlu2 %762  ;;  %v797_v36 = vadd.f32 %v788_v28, %v2283_v27 }
 0x12e   : > { %v675_v41 = vmax.f32 %v578_v57, %v659_v33  ;;  %v792_v30 = vadd.f32 %v763_v34, %v2137_v35 }
 0x12f   : > { %820 = vrot.lane.b32.xlu0 %v797_v36, %s1991_s5 }
 0x130   : > { %810 = vrot.lane.b32.xlu1 %v792_v30, %s1991_s5  ;;  %v740_v42 = vmax.f32 %v675_v41, %v732_v37  ;;  %v1915_v41 = vld [vmem:[%s3099_s1 + $0x198] sm:$0xff] }
 0x135   : > { %v713_v47 = vpop.permute.xlu0 %712  ;;  %v778_v51 = vpop.permute.xlu2 %777 }
 0x136   : > { %v730_v53 = vadd.f32 %v713_v47, %v2146_v40  ;;  %v795_v54 = vadd.f32 %v778_v51, %v2146_v40  ;;  %v1918_v51 = vld [vmem:[%s3099_s1 + $0x1b0] sm:$0xff] }
 0x137   : > { %859 = vperm.xlu0 %1971, %v1906_v46  }
 0x138   : > { %816 = vrot.lane.b32.xlu1 %v795_v54, %s1991_s5  ;;  %v738_v55 = vmax.f32 %v2264_v9, %v730_v53  ;;  %v1914_v53 = vld [vmem:[%s3099_s1 + $0x190] sm:$0xff]  ;;  %v1913_v54 = vld [vmem:[%s3099_s1 + $0x188] sm:$0xff] }
 0x13d   : > { %v753_v57 = vpop.permute.xlu0 %752 }
 0x13e   : > { %v790_v58 = vadd.f32 %v753_v57, %v2167_v52  ;;  %v1916_v57 = vld [vmem:[%s3099_s1 + $0x1a0] sm:$0xff] }
 0x13f   : > { %874 = vperm.xlu0 %1971, %v1909_v43   ;;  %v1917_v43 = vld [vmem:[%s3099_s1 + $0x1a8] sm:$0xff] }
 0x140   : > { %806 = vrot.lane.b32.xlu2 %v790_v58, %s1991_s5  ;;  %849 = vperm.xlu1 %1972, %v1904_v44   ;;  %v1924_v44 = vld [vmem:[%s3099_s1 + $0x1e0] sm:$0xff] }
 0x141   : > { %v1920_v58 = vld [vmem:[%s3099_s1 + $0x1c0] sm:$0xff] }
 0x145   : > { %v768_v60 = vpop.permute.xlu0 %767 }
 0x146   : > { %v793_v49 = vadd.f32 %v768_v60, %v2179_v59  ;;  %v1919_v60 = vld [vmem:[%s3099_s1 + $0x1b8] sm:$0xff] }
 0x148   : > { %812 = vrot.lane.b32.xlu2 %v793_v49, %s1991_s5  ;;  %864 = vperm.xlu1 %1972, %v1907_v61   ;;  %v1927_v61 = vld [vmem:[%s3099_s1 + $0x1f8] sm:$0xff] }
 0x149   : > { %v1923_v49 = vld [vmem:[%s3099_s1 + $0x1d8] sm:$0xff] }
 0x14d   : > { %v783_v62 = vpop.permute.xlu0 %782 }
 0x14e   : > { %v796_v39 = vadd.f32 %v783_v62, %v2189_v1  ;;  %v1922_v62 = vld [vmem:[%s3099_s1 + $0x1d0] sm:$0xff] }
 0x150   : > { %818 = vrot.lane.b32.xlu2 %v796_v39, %s1991_s5  ;;  %879 = vperm.xlu1 %1972, %v1910_v0   ;;  %v1926_v0 = vld [vmem:[%s3099_s1 + $0x1f0] sm:$0xff]  ;;  %v1925_v39 = vld [vmem:[%s3099_s1 + $0x1e8] sm:$0xff] }
 0x158   : > { %854 = vperm.xlu2 %1973, %v1905_v4  }
 0x160   : > { %869 = vperm.xlu2 %1973, %v1908_v38  }
 0x168   : > { %884 = vperm.xlu2 %1973, %v1911_v5  }
 0x191   : > { %v809_v7 = vpop.permute.xlu0 %808 }
 0x192   : > { %v2324_v9 = vmax.f32 %v734_v18, %v809_v7  ;;  %v735_v18 = vmax.f32 %v2253_v2, %v727_v20 }
 0x199   : > { %v815_v13 = vpop.permute.xlu0 %814 }
 0x19a   : > { %v807_v14 = vpop.permute.xlu2 %806  ;;  %v2328_v31 = vmax.f32 %v737_v12, %v815_v13 }
 0x19b   : > { %v2333_v16 = vmax.f32 %v733_v3, %v807_v14 }
 0x1a1   : > { %v821_v21 = vpop.permute.xlu0 %820 }
 0x1a2   : > { %v813_v22 = vpop.permute.xlu2 %812  ;;  %v2338_v23 = vmax.f32 %v740_v42, %v821_v21  ;;  %v811_v29 = vpop.permute.xlu1 %810 }
 0x1a3   : > { %v2343_v24 = vmax.f32 %v736_v10, %v813_v22  ;;  %v2345_v25 = vmax.f32 %v735_v18, %v811_v29 }
 0x1a9   : > { %v860_v63 = vpop.permute.xlu0 %859 }
 0x1aa   : > { %v819_v48 = vpop.permute.xlu2 %818  ;;  %v889_v3 = vadd.f32 %v860_v63, %v2137_v35  ;;  %v817_v26 = vpop.permute.xlu1 %816 }
 0x1ab   : > { %v2351_v56 = vmax.f32 %v739_v19, %v819_v48  ;;  %v2353_v2 = vmax.f32 %v738_v55, %v817_v26  ;;  %v1921_v55 = vld [vmem:[%s3099_s1 + $0x1c8] sm:$0xff] }
 0x1ac   : > { %907 = vrot.lane.b32.xlu2 %v889_v3, %s1992_s6 }
 0x1b1   : > { %v875_v28 = vpop.permute.xlu0 %874 }
 0x1b2   : > { %v855_v6 = vpop.permute.xlu2 %854  ;;  %v892_v8 = vadd.f32 %v875_v28, %v2146_v40  ;;  %v850_v10 = vpop.permute.xlu1 %849 }
 0x1b3   : > { %v888_v33 = vadd.f32 %v855_v6, %v2155_v45  ;;  %v887_v34 = vadd.f32 %v850_v10, %v2167_v52 }
 0x1b4   : > { %913 = vrot.lane.b32.xlu2 %v892_v8, %s1992_s6 }
 0x1b5   : > { %905 = vrot.lane.b32.xlu1 %v888_v33, %s1992_s6  ;;  %903 = vrot.lane.b32.xlu0 %v887_v34, %s1992_s6 }
 0x1ba   : > { %v870_v17 = vpop.permute.xlu2 %869  ;;  %v865_v19 = vpop.permute.xlu1 %864 }
 0x1bb   : > { %v891_v36 = vadd.f32 %v870_v17, %v2164_v50  ;;  %v890_v37 = vadd.f32 %v865_v19, %v2179_v59 }
 0x1bc   : > { %946 = vperm.xlu2 %1973, %v1912_v15  }
 0x1bd   : > { %911 = vrot.lane.b32.xlu1 %v891_v36, %s1992_s6  ;;  %909 = vrot.lane.b32.xlu0 %v890_v37, %s1992_s6 }
 0x1c2   : > { %v885_v30 = vpop.permute.xlu2 %884  ;;  %v880_v42 = vpop.permute.xlu1 %879 }
 0x1c3   : > { %v894_v46 = vadd.f32 %v885_v30, %v2283_v27  ;;  %v893_v47 = vadd.f32 %v880_v42, %v2189_v1  ;;  %v1930_v42 = vld [vmem:[%s3099_s1 + $0x210] sm:$0xff] }
 0x1c4   : > { %961 = vperm.xlu2 %1973, %v1915_v41  }
 0x1c5   : > { %917 = vrot.lane.b32.xlu1 %v894_v46, %s1992_s6  ;;  %915 = vrot.lane.b32.xlu0 %v893_v47, %s1992_s6 }
 0x1cc   : > { %976 = vperm.xlu2 %1973, %v1918_v51  }
 0x1cd   : > { %956 = vperm.xlu1 %1972, %v1914_v53   ;;  %951 = vperm.xlu0 %1971, %v1913_v54  }
 0x1d4   : > { %1016 = vperm.xlu2 %1973, %v1921_v55  }
 0x1d5   : > { %971 = vperm.xlu1 %1972, %v1917_v43   ;;  %966 = vperm.xlu0 %1971, %v1916_v57   ;;  %v1933_v43 = vld [vmem:[%s3099_s1 + $0x228] sm:$0xff] }
 0x1dc   : > { %1031 = vperm.xlu2 %1973, %v1924_v44  }
 0x1dd   : > { %1011 = vperm.xlu1 %1972, %v1920_v58   ;;  %981 = vperm.xlu0 %1971, %v1919_v60  }
 0x1e4   : > { %1046 = vperm.xlu2 %1973, %v1927_v61  }
 0x1e5   : > { %1026 = vperm.xlu1 %1972, %v1923_v49   ;;  %1021 = vperm.xlu0 %1971, %v1922_v62  }
 0x1ed   : > { %1041 = vperm.xlu1 %1972, %v1926_v0   ;;  %1036 = vperm.xlu0 %1971, %v1925_v39  }
 0x206   : > { %v908_v4 = vpop.permute.xlu2 %907 }
 0x207   : > { %v929_v38 = vmax.f32 %v2345_v25, %v908_v4 }
 0x20e   : > { %v914_v5 = vpop.permute.xlu2 %913 }
 0x20f   : > { %v932_v7 = vmax.f32 %v2353_v2, %v914_v5 }
 0x216   : > { %v947_v11 = vpop.permute.xlu2 %946 }
 0x217   : > { %v984_v21 = vadd.f32 %v947_v11, %v2155_v45  ;;  %v1928_v11 = vld [vmem:[%s3099_s1 + $0x200] sm:$0xff] }
 0x21e   : > { %v962_v12 = vpop.permute.xlu2 %961 }
 0x21f   : > { %v987_v26 = vadd.f32 %v962_v12, %v2164_v50  ;;  %v1929_v12 = vld [vmem:[%s3099_s1 + $0x208] sm:$0xff] }
 0x226   : > { %v977_v13 = vpop.permute.xlu2 %976 }
 0x227   : > { %v904_v14 = vpop.permute.xlu0 %903  ;;  %v906_v20 = vpop.permute.xlu1 %905  ;;  %v990_v33 = vadd.f32 %v977_v13, %v2283_v27  ;;  %v1931_v13 = vld [vmem:[%s3099_s1 + $0x218] sm:$0xff] }
 0x228   : > { %v927_v18 = vmax.f32 %v2333_v16, %v904_v14  ;;  %v928_v22 = vmax.f32 %v2324_v9, %v906_v20  ;;  %v1932_v14 = vld [vmem:[%s3099_s1 + $0x220] sm:$0xff]  ;;  %v1934_v20 = vld [vmem:[%s3099_s1 + $0x230] sm:$0xff] }
 0x22a   : > { %v2423_v29 = vmax.f32 %v927_v18, %v984_v21  ;;  %v1935_v21 = vld [vmem:[%s3099_s1 + $0x238] sm:$0xff]  ;;  %v1944_v18 = vld [vmem:[%s3100_s2 + $0x28] sm:$0xff] }
 0x22b   : > { %277 = vmatpush.bf16.msra.mxu0 %v1944_v18  ;;  %1948 = vmatpush.bf16.msra.mxu3 %v1944_v18 }
 0x22e   : > { %v1017_v63 = vpop.permute.xlu2 %1016 }
 0x22f   : > { %v1050_v48 = vadd.f32 %v1017_v63, %v2137_v35  ;;  %v910_v25 = vpop.permute.xlu0 %909  ;;  %v912_v3 = vpop.permute.xlu1 %911  ;;  %v1947_v63 = vld [vmem:[%s3100_s2 + $0x40] sm:$0xff] }
 0x230   : > { %v930_v2 = vmax.f32 %v2343_v24, %v910_v25  ;;  %v931_v28 = vmax.f32 %v2328_v31, %v912_v3  ;;  %v2440_v31 = vld [vmem:[%s2129_s30 + $0x48] sm:$0xff]  ;;  %v1942_v25 = vld [vmem:[%s3100_s2 + $0x18] sm:$0xff]  ;;  %1954 = vmatpush.bf16.msra.mxu2 %v1947_v63 }
 0x231   : > { %1067 = vrot.lane.b32.xlu1 %v1050_v48, %s1991_s5  ;;  %v1941_v48 = vld [vmem:[%s3100_s2 + $0x10] sm:$0xff]  ;;  %v1946_v3 = vld [vmem:[%s3100_s2 + $0x38] sm:$0xff] }
 0x232   : > { %v2430_v6 = vmax.f32 %v930_v2, %v987_v26  ;;  %1951 = vmatpush.bf16.msra.mxu1 %v1941_v48  ;;  %v230_v26 = vpack.c.bf16 %v2155_v45, %v2167_v52  ;;  %v1940_v2 = vld [vmem:[%s3100_s2 + $0x8] sm:$0xff] }
 0x234   : > { %1955 = vmatpush.bf16.msra.mxu2 %v1946_v3 }
 0x236   : > { %v1032_v16 = vpop.permute.xlu2 %1031  ;;  %1952 = vmatpush.bf16.msra.mxu1 %v1940_v2 }
 0x237   : > { %v1053_v9 = vadd.f32 %v1032_v16, %v2146_v40  ;;  %v916_v8 = vpop.permute.xlu0 %915  ;;  %v918_v10 = vpop.permute.xlu1 %917  ;;  %v231_v16 = vpack.c.bf16 %v2179_v59, %v2137_v35 }
 0x238   : > { %v933_v34 = vmax.f32 %v2351_v56, %v916_v8  ;;  %v934_v15 = vmax.f32 %v2338_v23, %v918_v10  ;;  %v1939_v8 = vld [vmem:[%s3100_s2] sm:$0xff]  ;;  %v221_v10 = vpack.c.bf16 %v2137_v35, %v2155_v45 }
 0x239   : > { %1073 = vrot.lane.b32.xlu1 %v1053_v9, %s1991_s5  ;;  %v222_v9 = vpack.c.bf16 %v2164_v50, %v2179_v59 }
 0x23a   : > { %v2437_v24 = vmax.f32 %v933_v34, %v990_v33  ;;  %1953 = vmatpush.bf16.msra.mxu1 %v1939_v8  ;;  %v220_v33 = vpack.c.bf16 %v2167_v52, %v2132_v32 }
 0x23d   : > { %1847 = vmatmul.msk.bf16.vlgmr.msra.gmra.mxu1 %vm259_vm0, %v221_v10 }
 0x23e   : > { %v1047_v17 = vpop.permute.xlu2 %1046 }
 0x23f   : > { %v1056_v19 = vadd.f32 %v1047_v17, %v2440_v31  ;;  %v952_v36 = vpop.permute.xlu0 %951  ;;  %v957_v37 = vpop.permute.xlu1 %956  ;;  %v232_v17 = vpack.c.bf16 %v2146_v40, %v2164_v50 }
 0x240   : > { %v985_v41 = vadd.f32 %v952_v36, %v2137_v35  ;;  %v986_v30 = vadd.f32 %v957_v37, %v2179_v59 }
 0x241   : > { %1079 = vrot.lane.b32.xlu1 %v1056_v19, %s1991_s5  ;;  %v223_v19 = vpack.c.bf16 %v2189_v1, %v2146_v40 }
 0x242   : > { %v2446_v56 = vmax.f32 %v928_v22, %v985_v41  ;;  %v2448_v23 = vmax.f32 %v929_v38, %v986_v30  ;;  %v1943_v22 = vld [vmem:[%s3100_s2 + $0x20] sm:$0xff] }
 0x243   : > { %278 = vmatpush.bf16.msra.mxu0 %v1943_v22  ;;  %1949 = vmatpush.bf16.msra.mxu3 %v1943_v22 }
 0x247   : > { %v967_v46 = vpop.permute.xlu0 %966  ;;  %v972_v47 = vpop.permute.xlu1 %971  ;;  %279 = vmatpush.bf16.msra.mxu0 %v1942_v25  ;;  %1950 = vmatpush.bf16.msra.mxu3 %v1942_v25 }
 0x248   : > { %v988_v51 = vadd.f32 %v967_v46, %v2146_v40  ;;  %v989_v53 = vadd.f32 %v972_v47, %v2189_v1  ;;  %v233_v47 = vpack.c.bf16 %v2283_v27, %v2189_v1 }
 0x249   : > { %1118 = vperm.xlu1 %1972, %v1930_v42  }
 0x24a   : > { %v2455_v54 = vmax.f32 %v931_v28, %v988_v51  ;;  %v2457_v55 = vmax.f32 %v932_v7, %v989_v53  ;;  %1830 = vmatmul.msk.bf16.vlgmr.msra.gmra.mxu0 %vm259_vm0, %v230_v26  ;;  %v1945_v28 = vld [vmem:[%s3100_s2 + $0x30] sm:$0xff]  ;;  %1831 = vmatmul.msk.bf16.vlgmr.msra.gmra.mxu3 %vm259_vm0, %v231_v16  ;;  %v360_v51 = vpack.c.bf16 %v2440_v31, %v2283_v27 }
 0x24b   : > { %336 = vmatpush.bf16.msrb.mxu0 %v1941_v48  ;;  %1956 = vmatpush.bf16.msra.mxu2 %v1945_v28  ;;  %v1195_v16 = vadd.f32 %v2155_v45, %v2167_v52 }
 0x24d   : > { %1848 = vmatmul.msk.bf16.gmra.mxu1 %vm259_vm0, %v222_v9 }
 0x24e   : > { %1869 = vmatmul.msk.bf16.vlgmr.msra.gmra.mxu2 %vm259_vm0, %v222_v9  ;;  %v2636_v9 = vadd.f32 %v1195_v16, %v2137_v35 }
 0x24f   : > { %v982_v57 = vpop.permute.xlu0 %981  ;;  %v1012_v44 = vpop.permute.xlu1 %1011  ;;  %337 = vmatpush.bf16.msrb.mxu0 %v1940_v2 }
 0x250   : > { %v991_v58 = vadd.f32 %v982_v57, %v2440_v31  ;;  %v1049_v60 = vadd.f32 %v1012_v44, %v2155_v45 }
 0x251   : > { %1133 = vperm.xlu1 %1972, %v1933_v43  }
 0x252   : > { %1065 = vrot.lane.b32.xlu0 %v1049_v60, %s1991_s5  ;;  %v2465_v61 = vmax.f32 %v934_v15, %v991_v58 }
 0x253   : > { %338 = vmatpush.bf16.msrb.mxu0 %v1939_v8  ;;  %v1198_v8 = vadd.f32 %v2164_v50, %v2179_v59 }
 0x257   : > { %v1022_v49 = vpop.permute.xlu0 %1021  ;;  %v1027_v62 = vpop.permute.xlu1 %1026  ;;  %394 = vmatpush.bf16.msra.mxu0 %v1947_v63 }
 0x258   : > { %v1051_v0 = vadd.f32 %v1022_v49, %v2179_v59  ;;  %v1052_v39 = vadd.f32 %v1027_v62, %v2164_v50 }
 0x25a   : > { %1069 = vrot.lane.b32.xlu2 %v1051_v0, %s1991_s5  ;;  %1071 = vrot.lane.b32.xlu0 %v1052_v39, %s1991_s5 }
 0x25b   : > { %395 = vmatpush.bf16.msra.mxu0 %v1946_v3  ;;  %1832 = vmatmul.msk.bf16.gmra.mxu3 %vm259_vm0, %v232_v17  ;;  %v1200_v3 = vadd.f32 %v2189_v1, %v2146_v40 }
 0x25c   : > { %1846 = vmatmul.msk.bf16.vlgmr.msrb.gmra.mxu0 %vm259_vm0, %v220_v33  ;;  %v2647_v33 = vadd.f32 %v1198_v8, %v2146_v40 }
 0x25d   : > { %1849 = vmatmul.msk.bf16.gmra.mxu1 %vm259_vm0, %v223_v19  ;;  %v2625_v26 = vadd.f32 %v1200_v3, %v2283_v27 }
 0x25e   : > { %1870 = vmatmul.msk.bf16.gmra.mxu2 %vm259_vm0, %v223_v19 }
 0x25f   : > { %v1037_v4 = vpop.permute.xlu0 %1036  ;;  %v1042_v38 = vpop.permute.xlu1 %1041  ;;  %396 = vmatpush.bf16.msra.mxu0 %v1945_v28 }
 0x260   : > { %v1054_v5 = vadd.f32 %v1037_v4, %v2189_v1  ;;  %v1055_v7 = vadd.f32 %v1042_v38, %v2283_v27  ;;  %v1196_v4 = vadd.f32 %v2137_v35, %v2155_v45 }
 0x262   : > { %1075 = vrot.lane.b32.xlu2 %v1054_v5, %s1991_s5  ;;  %1077 = vrot.lane.b32.xlu0 %v1055_v7, %s1991_s5  ;;  %v2583_v38 = vadd.f32 %v1196_v4, %v2179_v59 }
 0x26a   : > { %1108 = vperm.xlu2 %1973, %v1928_v11   ;;  %1113 = vperm.xlu0 %1971, %v1929_v12  }
 0x26b   : > { %1833 = vmatmul.msk.bf16.gmra.mxu3 %vm259_vm0, %v233_v47 }
 0x26c   : > { %1868 = vmatmul.msk.bf16.vlgmr.msra.gmra.mxu0 %vm259_vm0, %v221_v10 }
 0x26e   : > { %1871 = vmatmul.msk.bf16.gmra.mxu2 %vm259_vm0, %v360_v51 }
 0x272   : > { %1123 = vperm.xlu2 %1973, %v1931_v13   ;;  %1128 = vperm.xlu0 %1971, %v1932_v14   ;;  %v1199_v13 = vadd.f32 %v2146_v40, %v2164_v50  ;;  %v1194_v14 = vadd.f32 %v2167_v52, %v2132_v32  ;;  %v1197_v32 = vadd.f32 %v2179_v59, %v2137_v35 }
 0x274   : > { %v2614_v63 = vadd.f32 %v1197_v32, %v2164_v50 }
 0x27a   : > { %1138 = vperm.xlu2 %1973, %v1934_v20   ;;  %1143 = vperm.xlu0 %1971, %v1935_v21   ;;  %v2598_v20 = vadd.f32 %v1199_v13, %v2189_v1  ;;  %v2601_v21 = vadd.f32 %v1194_v14, %v2155_v45 }
 0x2a3   : > { %v2534_v34 = vpop.permute.xlu1 %1067 }
 0x2a4   : > { %v1090_v15 = vmax.f32 %v2446_v56, %v2534_v34 }
 0x2ab   : > { %v2545_v36 = vpop.permute.xlu1 %1073 }
 0x2ac   : > { %v1093_v37 = vmax.f32 %v2455_v54, %v2545_v36 }
 0x2b3   : > { %v2550_v41 = vpop.permute.xlu1 %1079 }
 0x2b4   : > { %v2552_v30 = vpop.permute.xlu2 %1069  ;;  %v1096_v42 = vmax.f32 %v2465_v61, %v2550_v41 }
 0x2b5   : > { %v1091_v46 = vmax.f32 %v2448_v23, %v2552_v30 }
 0x2ba   : > { %v345_v17 = vpop.f32.mrf.mxu1 }
 0x2bb   : > { %v1119_v53 = vpop.permute.xlu1 %1118 }
 0x2bc   : > { %v2565_v43 = vpop.permute.xlu2 %1075  ;;  %v1148_v57 = vadd.f32 %v1119_v53, %v2179_v59 }
 0x2bd   : > { %v1094_v44 = vmax.f32 %v2457_v55, %v2565_v43 }
 0x2be   : > { %1166 = vrot.lane.b32.xlu0 %v1148_v57, %s1992_s6 }
 0x2c2   : > { %v347_v53 = vpop.f32.mrf.mxu1 }
 0x2c3   : > { %v1134_v58 = vpop.permute.xlu1 %1133 }
 0x2c4   : > { %v1109_v60 = vpop.permute.xlu2 %1108  ;;  %v2572_v49 = vpop.permute.xlu0 %1065  ;;  %v1151_v62 = vadd.f32 %v1134_v58, %v2189_v1 }
 0x2c5   : > { %v1146_v0 = vadd.f32 %v1109_v60, %v2155_v45  ;;  %v1089_v39 = vmax.f32 %v2423_v29, %v2572_v49 }
 0x2c6   : > { %1172 = vrot.lane.b32.xlu0 %v1151_v62, %s1992_s6 }
 0x2c7   : > { %1162 = vrot.lane.b32.xlu1 %v1146_v0, %s1992_s6 }
 0x2ca   : > { %v350_v0 = vpop.f32.mrf.mxu1 }
 0x2cc   : > { %v1124_v5 = vpop.permute.xlu2 %1123  ;;  %v2585_v7 = vpop.permute.xlu0 %1071 }
 0x2cd   : > { %v1149_v11 = vadd.f32 %v1124_v5, %v2164_v50  ;;  %v1092_v12 = vmax.f32 %v2430_v6, %v2585_v7 }
 0x2ce   : > { %1222 = vrot.lane.b32.xlu0 %v2583_v38, %s1991_s5 }
 0x2cf   : > { %1168 = vrot.lane.b32.xlu1 %v1149_v11, %s1992_s6 }
 0x2d1   : > { %v403_v19 = vpop.f32.mrf.mxu2 }
 0x2d4   : > { %v2603_v18 = vpop.permute.xlu0 %1077  ;;  %v1139_v50 = vpop.permute.xlu2 %1138 }
 0x2d5   : > { %v1095_v22 = vmax.f32 %v2437_v24, %v2603_v18  ;;  %v1152_v59 = vadd.f32 %v1139_v50, %v2283_v27 }
 0x2d6   : > { %1228 = vrot.lane.b32.xlu0 %v2598_v20, %s1991_s5 }
 0x2d7   : > { %1218 = vrot.lane.b32.xlu1 %v2601_v21, %s1991_s5 }
 0x2d9   : > { %v405_v57 = vpop.f32.mrf.mxu2 }
 0x2dc   : > { %v1114_v48 = vpop.permute.xlu0 %1113 }
 0x2dd   : > { %v1147_v25 = vadd.f32 %v1114_v48, %v2137_v35  ;;  %v1201_v35 = vadd.f32 %v2283_v27, %v2189_v1 }
 0x2de   : > { %1250 = vrot.lane.b32.xlu0 %v2601_v21, %s1992_s6 }
 0x2df   : > { %1224 = vrot.lane.b32.xlu1 %v2614_v63, %s1991_s5  ;;  %1164 = vrot.lane.b32.xlu2 %v1147_v25, %s1992_s6  ;;  %v2658_v52 = vadd.f32 %v1201_v35, %v2440_v31 }
 0x2e1   : > { %v408_v5 = vpop.f32.mrf.mxu2 }
 0x2e4   : > { %v1129_v2 = vpop.permute.xlu0 %1128 }
 0x2e5   : > { %v1150_v28 = vadd.f32 %v1129_v2, %v2146_v40  ;;  %v281_v40 = vpop.f32.mrf.mxu0  ;;  %v352_v2 = vpop.f32.mrf.mxu1 }
 0x2e6   : > { %1256 = vrot.lane.b32.xlu0 %v2614_v63, %s1992_s6 }
 0x2e7   : > { %1230 = vrot.lane.b32.xlu1 %v2625_v26, %s1991_s5  ;;  %1170 = vrot.lane.b32.xlu2 %v1150_v28, %s1992_s6 }
 0x2ec   : > { %v1144_v10 = vpop.permute.xlu0 %1143 }
 0x2ed   : > { %v1153_v45 = vadd.f32 %v1144_v10, %v2440_v31  ;;  %v283_v1 = vpop.f32.mrf.mxu0  ;;  %v286_v31 = vpop.f32.mrf.mxu3 }
 0x2ee   : > { %1262 = vrot.lane.b32.xlu0 %v2625_v26, %s1992_s6  ;;  %v346_v60 = vadd.f32 %v345_v17, %v286_v31  ;;  %v410_v10 = vpop.f32.mrf.mxu2 }
 0x2ef   : > { %1252 = vrot.lane.b32.xlu1 %v2636_v9, %s1992_s6  ;;  %1220 = vrot.lane.b32.xlu2 %v2636_v9, %s1991_s5 }
 0x2f0   : > { %v2673_v13 = vadd.f32 %v403_v19, %v346_v60  ;;  %v355_v60 = vpop.f32.mrf.mxu1 }
 0x2f2   : > { %v1414_v25 = vmul.f32 %v2673_v13, %v2673_v13  ;;  %v2688_v35 = vsel %vm1290_vm1, %v2673_v13, 0.0 }
 0x2f5   : > { %v340_v47 = vpop.f32.mrf.mxu0  ;;  %v288_v51 = vpop.f32.mrf.mxu3 }
 0x2f6   : > { %1176 = vrot.lane.b32.xlu0 %v1153_v45, %s1992_s6  ;;  %v348_v4 = vadd.f32 %v347_v53, %v288_v51  ;;  %v341_v28 = vadd.f32 %v340_v47, %v281_v40  ;;  %v2691_v40 = vsel %vm1290_vm1, %v1414_v25, 0.0 }
 0x2f7   : > { %1258 = vrot.lane.b32.xlu1 %v2647_v33, %s1992_s6  ;;  %1226 = vrot.lane.b32.xlu2 %v2647_v33, %s1991_s5 }
 0x2f8   : > { %v2675_v32 = vadd.f32 %v405_v57, %v348_v4 }
 0x2fa   : > { %v1415_v8 = vmul.f32 %v2675_v32, %v2675_v32  ;;  %v2707_v31 = vsel %vm1290_vm1, %v2675_v32, 0.0 }
 0x2fc   : > { %v2710_v17 = vsel %vm1290_vm1, %v1415_v8, 0.0 }
 0x2fd   : > { %v342_v58 = vpop.f32.mrf.mxu0  ;;  %v291_v62 = vpop.f32.mrf.mxu3 }
 0x2fe   : > { %v351_v14 = vadd.f32 %v350_v0, %v291_v62  ;;  %v343_v56 = vadd.f32 %v342_v58, %v283_v1 }
 0x2ff   : > { %1264 = vrot.lane.b32.xlu1 %v2658_v52, %s1992_s6  ;;  %1232 = vrot.lane.b32.xlu2 %v2658_v52, %s1991_s5 }
 0x300   : > { %v2679_v16 = vadd.f32 %v408_v5, %v351_v14 }
 0x302   : > { %v1416_v55 = vmul.f32 %v2679_v16, %v2679_v16  ;;  %v2717_v49 = vsel %vm1290_vm1, %v2679_v16, 0.0 }
 0x304   : > { %v2724_v62 = vsel %vm1290_vm1, %v1416_v55, 0.0 }
 0x305   : > { %v398_v48 = vpop.f32.mrf.mxu0  ;;  %v293_v3 = vpop.f32.mrf.mxu3 }
 0x306   : > { %v2703_v43 = vadd.f32 %v398_v48, %v341_v28  ;;  %v353_v53 = vadd.f32 %v352_v2, %v293_v3  ;;  %v413_v48 = vpop.f32.mrf.mxu2 }
 0x307   : > { %1254 = vrot.lane.b32.xlu2 %v2583_v38, %s1992_s6 }
 0x308   : > { %v1412_v0 = vmul.f32 %v2703_v43, %v2703_v43  ;;  %v1391_v55 = vsel %vm1290_vm1, %v2703_v43, 0.0 }
 0x30d   : > { %v296_v57 = vpop.f32.mrf.mxu3 }
 0x30f   : > { %1260 = vrot.lane.b32.xlu2 %v2598_v20, %s1992_s6 }
 0x317   : > { %1174 = vrot.lane.b32.xlu2 %v1152_v59, %s1992_s6  ;;  %s1993_s6 = smov 16  }
 0x330   : > { %v1167_v11 = vpop.permute.xlu0 %1166 }
 0x331   : > { %v1188_v27 = vmax.f32 %v1091_v46, %v1167_v11 }
 0x333   : > { %v1517_v19 = vpack.c.bf16 %v1188_v27, %v1188_v27  ;;  %v1294_v1 = vsel %vm1290_vm1, %v1188_v27, 0.0 }
 0x335   : > { %v2734_v8 = vunpack.c.l.b16 %v1517_v19 }
 0x338   : > { %v1173_v23 = vpop.permute.xlu0 %1172 }
 0x339   : > { %v1165_v30 = vpop.permute.xlu2 %1164  ;;  %v1191_v46 = vmax.f32 %v1094_v44, %v1173_v23  ;;  %v1163_v45 = vpop.permute.xlu1 %1162  ;;  %v1314_v44 = vmul.f32 %v1188_v27, %v1188_v27 }
 0x33a   : > { %v1187_v50 = vmax.f32 %v1090_v15, %v1165_v30  ;;  %v2699_v59 = vmax.f32 %v1089_v39, %v1163_v45  ;;  %v400_v39 = vpop.f32.mrf.mxu0 }
 0x33b   : > { %v1323_v4 = vsel %vm1290_vm1, %v1314_v44, 0.0  ;;  %v1317_v5 = vmul.f32 %v1191_v46, %v1191_v46  ;;  %v1520_v3 = vpack.c.bf16 %v1191_v46, %v1191_v46  ;;  %v2732_v27 = vadd.f32 %v400_v39, %v343_v56 }
 0x33c   : > { %v1292_v34 = vsel %vm1290_vm1, %v1187_v50, 0.0  ;;  %v1313_v15 = vmul.f32 %v1187_v50, %v1187_v50  ;;  %v1291_v29 = vsel %vm1290_vm1, %v2699_v59, 0.0  ;;  %v1312_v51 = vmul.f32 %v2699_v59, %v2699_v59 }
 0x33d   : > { %v1293_v47 = vadd.f32 %v1292_v34, %v1291_v29  ;;  %v1516_v25 = vpack.c.bf16 %v1187_v50, %v1187_v50  ;;  %v1300_v23 = vsel %vm1290_vm1, %v1191_v46, 0.0  ;;  %v2739_v44 = vadd.f32 %v410_v10, %v353_v53 }
 0x33e   : > { %v1321_v58 = vsel %vm1290_vm1, %v1313_v15, 0.0  ;;  %v1320_v11 = vsel %vm1290_vm1, %v1312_v51, 0.0  ;;  %v1420_v15 = vsel %vm1290_vm1, %v1412_v0, 0.0  ;;  %v1329_v46 = vsel %vm1290_vm1, %v1317_v5, 0.0 }
 0x33f   : > { %v1295_v14 = vadd.f32 %v1294_v1, %v1293_v47  ;;  %v1322_v2 = vadd.f32 %v1321_v58, %v1320_v11  ;;  %v1392_v29 = vsel %vm1290_vm1, %v2732_v27, 0.0  ;;  %v1413_v10 = vmul.f32 %v2732_v27, %v2732_v27 }
 0x340   : > { %v2730_v28 = vpop.permute.xlu0 %1222  ;;  %v356_v39 = vadd.f32 %v355_v60, %v296_v57  ;;  %v2753_v19 = vunpack.c.l.b16 %v1516_v25  ;;  %v2755_v54 = vunpack.c.l.b16 %v1520_v3  ;;  %v1393_v47 = vadd.f32 %v1392_v29, %v1391_v55  ;;  %v298_v57 = vpop.f32.mrf.mxu3 }
 0x341   : > { %v1171_v30 = vpop.permute.xlu2 %1170  ;;  %v1169_v45 = vpop.permute.xlu1 %1168  ;;  %v1324_v34 = vadd.f32 %v1323_v4, %v1322_v2  ;;  %v1515_v51 = vpack.c.bf16 %v2699_v59, %v2699_v59  ;;  %v1421_v58 = vsel %vm1290_vm1, %v1413_v10, 0.0  ;;  %v1400_v59 = vsel %vm1290_vm1, %v2739_v44, 0.0 }
 0x342   : > { %v1190_v50 = vmax.f32 %v1093_v37, %v1171_v30  ;;  %v1189_v56 = vmax.f32 %v1092_v12, %v1169_v45  ;;  %v357_v60 = vpop.f32.mrf.mxu1  ;;  %v1395_v5 = vadd.f32 %v2688_v35, %v1393_v47  ;;  %v2764_v11 = vadd.f32 %v413_v48, %v356_v39  ;;  %v415_v30 = vpop.f32.mrf.mxu2 }
 0x343   : > { %v1422_v2 = vadd.f32 %v1421_v58, %v1420_v15  ;;  %v358_v48 = vadd.f32 %v357_v60, %v298_v57 }
 0x344   : > { %v1316_v36 = vmul.f32 %v1190_v50, %v1190_v50  ;;  %v1296_v6 = vsel %vm1290_vm1, %v1189_v56, 0.0  ;;  %v1315_v7 = vmul.f32 %v1189_v56, %v1189_v56  ;;  %v1518_v12 = vpack.c.bf16 %v1189_v56, %v1189_v56 }
 0x345   : > { %v1297_v37 = vadd.f32 %v1296_v6, %v1295_v14  ;;  %v1298_v53 = vsel %vm1290_vm1, %v1190_v50, 0.0  ;;  %v1519_v1 = vpack.c.bf16 %v1190_v50, %v1190_v50  ;;  %v1417_v56 = vmul.f32 %v2739_v44, %v2739_v44 }
 0x346   : > { %v1325_v4 = vsel %vm1290_vm1, %v1315_v7, 0.0  ;;  %v2766_v25 = vunpack.c.l.b16 %v1518_v12  ;;  %v1327_v45 = vsel %vm1290_vm1, %v1316_v36, 0.0  ;;  %v1397_v35 = vadd.f32 %v2707_v31, %v1395_v5 }
 0x347   : > { %v1299_v0 = vadd.f32 %v1298_v53, %v1297_v37  ;;  %v1326_v14 = vadd.f32 %v1325_v4, %v1324_v34  ;;  %v2776_v34 = vunpack.c.l.b16 %v1515_v51  ;;  %v2778_v29 = vunpack.c.l.b16 %v1519_v1 }
 0x348   : > { %v2768_v3 = vpop.permute.xlu0 %1228  ;;  %v1424_v39 = vadd.f32 %v2691_v40, %v1422_v2  ;;  %v1399_v15 = vadd.f32 %v2717_v49, %v1397_v35  ;;  %v1402_v36 = vsel %vm1290_vm1, %v2764_v11, 0.0  ;;  %v1418_v6 = vmul.f32 %v2764_v11, %v2764_v11 }
 0x349   : > { %v1221_v55 = vpop.permute.xlu2 %1220  ;;  %v1219_v50 = vpop.permute.xlu1 %1218  ;;  %v1328_v10 = vadd.f32 %v1327_v45, %v1326_v14  ;;  %v425_v37 = vadd.f32 %v415_v30, %v358_v48  ;;  %v2787_v31 = vadd.f32 %v1300_v23, %v1299_v0  ;;  %v1429_v40 = vsel %vm1290_vm1, %v1417_v56, 0.0 }
 0x34a   : > { %v1426_v7 = vadd.f32 %v2710_v17, %v1424_v39  ;;  %v1401_v51 = vadd.f32 %v1400_v59, %v1399_v15  ;;  %v1533_v2 = vpack.c.bf16 %v2673_v13, %v2673_v13  ;;  %v1534_v30 = vpack.c.bf16 %v2675_v32, %v2675_v32 }
 0x34b   : > { %v2789_v12 = vadd.f32 %v1329_v46, %v1328_v10  ;;  %v1419_v49 = vmul.f32 %v425_v37, %v425_v37  ;;  %v1404_v1 = vsel %vm1290_vm1, %v425_v37, 0.0  ;;  %v1431_v46 = vsel %vm1290_vm1, %v1418_v6, 0.0 }
 0x34c   : > { %v1428_v53 = vadd.f32 %v2724_v62, %v1426_v7  ;;  %v1403_v23 = vadd.f32 %v1402_v36, %v1401_v51  ;;  %v1242_v62 = vadd.f32 %v1219_v50, %v2601_v21  ;;  %v1535_v35 = vpack.c.bf16 %v2679_v16, %v2679_v16 }
 0x34d   : > { %v1433_v14 = vsel %vm1290_vm1, %v1419_v49, 0.0  ;;  %v1531_v48 = vpack.c.bf16 %v2703_v43, %v2703_v43  ;;  %v1536_v10 = vpack.c.bf16 %v2739_v44, %v2739_v44  ;;  %v1532_v21 = vpack.c.bf16 %v2732_v27, %v2732_v27 }
 0x34e   : > { %v1430_v60 = vadd.f32 %v1429_v40, %v1428_v53  ;;  %v1405_v5 = vadd.f32 %v1404_v1, %v1403_v23  ;;  %v2816_v39 = vunpack.c.l.b16 %v1533_v2  ;;  %v2818_v32 = vunpack.c.l.b16 %v1534_v30 }
 0x34f   : > { %v2820_v6 = vunpack.c.l.b16 %v1535_v35  ;;  %v1537_v44 = vpack.c.bf16 %v2764_v11, %v2764_v11  ;;  %v1538_v27 = vpack.c.bf16 %v425_v37, %v425_v37  ;;  %v2826_v40 = vunpack.c.l.b16 %v1531_v48 }
 0x350   : > { %v1251_v57 = vpop.permute.xlu0 %1250  ;;  %v1432_v59 = vadd.f32 %v1431_v46, %v1430_v60  ;;  %v1406_v13 = vrot.slane %v1405_v5, 4  ;;  %v2828_v51 = vunpack.c.l.b16 %v1536_v10  ;;  %v2830_v49 = vunpack.c.l.b16 %v1532_v21  ;;  %v2838_v46 = vld [vmem:[%s2129_s30 + $0x8] sm:$0xff]  ;;  %v2867_v10 = vld [vmem:[%s2129_s30 + $0x20] sm:$0xff] }
 0x351   : > { %v1227_v0 = vpop.permute.xlu2 %1226  ;;  %v1225_v4 = vpop.permute.xlu1 %1224  ;;  %v1274_v45 = vadd.f32 %v1251_v57, %v1242_v62  ;;  %v2834_v53 = vadd.f32 %v2768_v3, %v2598_v20  ;;  %v1243_v11 = vadd.f32 %v1221_v55, %v2636_v9  ;;  %v2847_v20 = vunpack.c.l.b16 %v1537_v44 }
 0x352   : > { %v1434_v56 = vadd.f32 %v1433_v14, %v1432_v59  ;;  %v1245_v50 = vadd.f32 %v1225_v4, %v2614_v63  ;;  %v1244_v63 = vadd.f32 %v2730_v28, %v2583_v38  ;;  %v1407_v1 = vadd.f32 %v1406_v13, %v1405_v5  ;;  %v2843_v28 = vld [vmem:[%s2129_s30 + $0x10] sm:$0xff]  ;;  %v2857_v14 = vld [vmem:[%s2129_s30 + $0x18] sm:$0xff] }
 0x353   : > { %v1282_v15 = vmul.f32 0.11111111, %v1274_v45  ;;  %v1442_v38 = vsel %vm1441_vm2, %v2838_v46, 0.0  ;;  %v1443_v57 = vsel %vm1441_vm2, %v2843_v28, 0.0  ;;  %v2849_v3 = vunpack.c.l.b16 %v1538_v27 }
 0x354   : > { %v1435_v23 = vrot.slane %v1434_v56, 4  ;;  %v1612_v9 = vpack.c.b16 %v2818_v32, %v2816_v39  ;;  %v1246_v55 = vadd.f32 %v1227_v0, %v2647_v33  ;;  %v1611_v4 = vpack.c.b16 %v2830_v49, %v2826_v40 }
 0x355   : > { %v1362_v37 = vmul.f32 %v1282_v15, %v1282_v15  ;;  %v1444_v5 = vadd.f32 %v1443_v57, %v1442_v38  ;;  %v1445_v62 = vsel %vm1441_vm2, %v2857_v14, 0.0  ;;  %v1523_v59 = vpack.c.bf16 %v1282_v15, %v1282_v15  ;;  %v2879_v57 = vld [vmem:[%s2129_s30 + $0x28] sm:$0xff] }
 0x356   : > { %v1408_v30 = vrot.slane %v1407_v1, 2  ;;  %v2862_v45 = vadd.f32 %v1435_v23, %v1434_v56  ;;  %v1341_v35 = vsel %vm1290_vm1, %v1282_v15, 0.0  ;;  %v1447_v21 = vsel %vm1441_vm2, %v2867_v10, 0.0 }
 0x357   : > { %v1370_v48 = vsel %vm1290_vm1, %v1362_v37, 0.0  ;;  %v1446_v0 = vadd.f32 %v1445_v62, %v1444_v5  ;;  %v1539_v56 = vpack.c.bf16 %v2838_v46, %v2838_v46  ;;  %v1540_v44 = vpack.c.bf16 %v2843_v28, %v2843_v28 }
 0x358   : > { %v1257_v36 = vpop.permute.xlu0 %1256  ;;  %v2875_v23 = vadd.f32 %v1408_v30, %v1407_v1  ;;  %v1575_v38 = vunpack.c.l.b16 %v1523_v59  ;;  %v1449_v5 = vsel %vm1441_vm2, %v2879_v57, 0.0  ;;  %v1463_v39 = vmul.f32 %v2838_v46, %v2838_v46 }
 0x359   : > { %v1233_v16 = vpop.permute.xlu2 %1232  ;;  %v1277_v43 = vadd.f32 %v1257_v36, %v1245_v50  ;;  %v1231_v7 = vpop.permute.xlu1 %1230  ;;  %v1448_v27 = vadd.f32 %v1447_v21, %v1446_v0  ;;  %v2888_v30 = vunpack.c.l.b16 %v1539_v56  ;;  %v1464_v32 = vmul.f32 %v2843_v28, %v2843_v28 }
 0x35a   : > { %v1248_v2 = vadd.f32 %v1231_v7, %v2625_v26  ;;  %v2884_v62 = vadd.f32 %v1233_v16, %v2658_v52  ;;  %v1613_v46 = vpack.c.b16 %v2828_v51, %v2820_v6 }
 0x35b   : > { %v1285_v60 = vmul.f32 0.11111111, %v1277_v43 }
 0x35d   : > { %v1365_v50 = vmul.f32 %v1285_v60, %v1285_v60  ;;  %v1526_v13 = vpack.c.bf16 %v1285_v60, %v1285_v60 }
 0x35f   : > { %v1375_v0 = vsel %vm1290_vm1, %v1365_v50, 0.0  ;;  %v1578_v1 = vunpack.c.l.b16 %v1526_v13 }
 0x360   : > { %v1263_v33 = vpop.permute.xlu0 %1262 }
 0x361   : > { %v1255_v36 = vpop.permute.xlu2 %1254  ;;  %v1280_v43 = vadd.f32 %v1263_v33, %v1248_v2  ;;  %v1253_v26 = vpop.permute.xlu1 %1252  ;;  %v1346_v33 = vsel %vm1290_vm1, %v1285_v60, 0.0 }
 0x362   : > { %v1276_v7 = vadd.f32 %v1255_v36, %v1244_v63  ;;  %v1275_v15 = vadd.f32 %v1253_v26, %v1243_v11  ;;  %v2891_v36 = vunpack.c.l.b16 %v1540_v44  ;;  %v2893_v26 = vadd.f32 %v1449_v5, %v1448_v27 }
 0x363   : > { %v1288_v63 = vmul.f32 0.11111111, %v1280_v43 }
 0x364   : > { %v1284_v2 = vmul.f32 0.11111111, %v1276_v7  ;;  %v1283_v11 = vmul.f32 0.11111111, %v1275_v15  ;;  %v3104_v51 = vpack.c.b16 %v2891_v36, %v2888_v30 }
 0x365   : > { %v1368_v15 = vmul.f32 %v1288_v63, %v1288_v63  ;;  %v1529_v60 = vpack.c.bf16 %v1288_v63, %v1288_v63 }
 0x366   : > { %v1525_v21 = vpack.c.bf16 %v1284_v2, %v1284_v2  ;;  %v1342_v59 = vsel %vm1290_vm1, %v1283_v11, 0.0  ;;  %v1364_v47 = vmul.f32 %v1284_v2, %v1284_v2  ;;  %v1363_v16 = vmul.f32 %v1283_v11, %v1283_v11 }
 0x367   : > { %v1343_v52 = vadd.f32 %v1342_v59, %v1341_v35  ;;  %v1524_v7 = vpack.c.bf16 %v1283_v11, %v1283_v11  ;;  %v1344_v43 = vsel %vm1290_vm1, %v1284_v2, 0.0 }
 0x368   : > { %v1177_v50 = vpop.permute.xlu0 %1176  ;;  %v1577_v13 = vunpack.c.l.b16 %v1525_v21  ;;  %v1371_v17 = vsel %vm1290_vm1, %v1363_v16, 0.0  ;;  %v1373_v37 = vsel %vm1290_vm1, %v1364_v47, 0.0  ;;  %v1352_v21 = vsel %vm1290_vm1, %v1288_v63, 0.0  ;;  %v2906_v16 = vld [vmem:[%s2129_s30 + $0x30] sm:$0xff] }
 0x369   : > { %v1345_v56 = vadd.f32 %v1344_v43, %v1343_v52  ;;  %v1261_v58 = vpop.permute.xlu2 %1260  ;;  %v2900_v44 = vmax.f32 %v1096_v42, %v1177_v50  ;;  %v1259_v27 = vpop.permute.xlu1 %1258  ;;  %v1576_v35 = vunpack.c.l.b16 %v1524_v7  ;;  %v1372_v5 = vadd.f32 %v1371_v17, %v1370_v48 }
 0x36a   : > { %v1279_v11 = vadd.f32 %v1261_v58, %v2834_v53  ;;  %v1278_v2 = vadd.f32 %v1259_v27, %v1246_v55  ;;  %v1584_v59 = vpack.c.b16 %v1578_v1, %v1577_v13  ;;  %v1451_v61 = vsel %vm1441_vm2, %v2906_v16, 0.0 }
 0x36b   : > { %v1347_v52 = vadd.f32 %v1346_v33, %v1345_v56  ;;  %v1374_v41 = vadd.f32 %v1373_v37, %v1372_v5  ;;  %v1583_v58 = vpack.c.b16 %v1576_v35, %v1575_v38  ;;  %v1381_v17 = vsel %vm1290_vm1, %v1368_v15, 0.0  ;;  %v2920_v37 = vld [vmem:[%s2129_s30 + $0x38] sm:$0xff]  ;;  %v2925_v38 = vld [vmem:[%s2129_s30 + $0x40] sm:$0xff]  ;;  %s1994_s30 = smov 32  }
 0x36c   : > { %v1287_v42 = vmul.f32 0.11111111, %v1279_v11  ;;  %v1286_v7 = vmul.f32 0.11111111, %v1278_v2  ;;  %1589 = vrot.lane.b32.xlu2 %v1584_v59, %s1993_s6  ;;  %v1319_v47 = vmul.f32 %v2900_v44, %v2900_v44  ;;  %v2914_v53 = vunpack.c.l.b16 %v1529_v60 }
 0x36d   : > { %v1376_v63 = vadd.f32 %v1375_v0, %v1374_v41  ;;  %1587 = vrot.lane.b32.xlu1 %v1583_v58, %s1993_s6  ;;  %v1545_v33 = vpack.c.bf16 %v2920_v37, %v2920_v37  ;;  %v1546_v1 = vpack.c.bf16 %v2925_v38, %v2925_v38  ;;  %v1304_v0 = vsel %vm1290_vm1, %v2900_v44, 0.0 }
 0x36e   : > { %v1528_v48 = vpack.c.bf16 %v1287_v42, %v1287_v42  ;;  %v1367_v43 = vmul.f32 %v1287_v42, %v1287_v42  ;;  %v1348_v15 = vsel %vm1290_vm1, %v1286_v7, 0.0  ;;  %v1366_v60 = vmul.f32 %v1286_v7, %v1286_v7 }
 0x36f   : > { %v1527_v50 = vpack.c.bf16 %v1286_v7, %v1286_v7  ;;  %v1349_v56 = vadd.f32 %v1348_v15, %v1347_v52  ;;  %v1350_v35 = vsel %vm1290_vm1, %v1287_v42, 0.0  ;;  %v1333_v5 = vsel %vm1290_vm1, %v1319_v47, 0.0 }
 0x370   : > { %v1580_v27 = vunpack.c.l.b16 %v1528_v48  ;;  %v1377_v11 = vsel %vm1290_vm1, %v1366_v60, 0.0  ;;  %v1379_v52 = vsel %vm1290_vm1, %v1367_v43, 0.0  ;;  %v2944_v42 = vunpack.c.l.b16 %v1545_v33 }
 0x371   : > { %v1175_v2 = vpop.permute.xlu2 %1174  ;;  %v1265_v59 = vpop.permute.xlu1 %1264  ;;  %v1579_v41 = vunpack.c.l.b16 %v1527_v50  ;;  %v1351_v58 = vadd.f32 %v1350_v35, %v1349_v56  ;;  %v1378_v55 = vadd.f32 %v1377_v11, %v1376_v63  ;;  %v2946_v47 = vunpack.c.l.b16 %v1546_v1 }
 0x372   : > { %v2940_v7 = vmax.f32 %v1095_v22, %v1175_v2  ;;  %v1281_v13 = vadd.f32 %v1265_v59, %v2884_v62  ;;  %v1452_v24 = vadd.f32 %v1451_v61, %v2893_v26  ;;  %v1542_v43 = vpack.c.bf16 %v2867_v10, %v2867_v10 }
 0x373   : > { %v1585_v48 = vpack.c.b16 %v1580_v27, %v1579_v41  ;;  %v1380_v15 = vadd.f32 %v1379_v52, %v1378_v55  ;;  %v1353_v22 = vadd.f32 %v1352_v21, %v1351_v58  ;;  %v1541_v55 = vpack.c.bf16 %v2857_v14, %v2857_v14 }
 0x374   : > { %v1302_v60 = vsel %vm1290_vm1, %v2940_v7, 0.0  ;;  %v1318_v63 = vmul.f32 %v2940_v7, %v2940_v7  ;;  %1615 = vrot.lane.b32.xlu2 %v1611_v4, %s1994_s30  ;;  %v1289_v62 = vmul.f32 0.11111111, %v1281_v13  ;;  %v1453_v40 = vsel %vm1441_vm2, %v2920_v37, 0.0 }
 0x375   : > { %v1303_v18 = vadd.f32 %v1302_v60, %v2787_v31  ;;  %1591 = vrot.lane.b32.xlu0 %v1585_v48, %s1993_s6  ;;  %v1382_v1 = vadd.f32 %v1381_v17, %v1380_v15  ;;  %v1454_v50 = vadd.f32 %v1453_v40, %v1452_v24  ;;  %v1455_v13 = vsel %vm1441_vm2, %v2925_v38, 0.0 }
 0x376   : > { %v1331_v33 = vsel %vm1290_vm1, %v1318_v63, 0.0  ;;  %v1354_v31 = vsel %vm1290_vm1, %v1289_v62, 0.0  ;;  %v1369_v26 = vmul.f32 %v1289_v62, %v1289_v62  ;;  %v1530_v61 = vpack.c.bf16 %v1289_v62, %v1289_v62 }
 0x377   : > { %v1305_v49 = vadd.f32 %v1304_v0, %v1303_v18  ;;  %v1332_v4 = vadd.f32 %v1331_v33, %v2789_v12  ;;  %v1355_v21 = vadd.f32 %v1354_v31, %v1353_v22  ;;  %v1614_v35 = vpack.c.b16 %v2849_v3, %v2847_v20 }
 0x378   : > { %v1383_v27 = vsel %vm1290_vm1, %v1369_v26, 0.0  ;;  %v1582_v2 = vunpack.c.l.b16 %v1530_v61  ;;  %v1456_v12 = vadd.f32 %v1455_v13, %v1454_v50  ;;  %v1543_v58 = vpack.c.bf16 %v2879_v57, %v2879_v57 }
 0x379   : > { %v1306_v56 = vrot.slane %v1305_v49, 4  ;;  %v1334_v17 = vadd.f32 %v1333_v5, %v1332_v4  ;;  %v1356_v11 = vrot.slane %v1355_v21, 4  ;;  %v1384_v0 = vadd.f32 %v1383_v27, %v1382_v1 }
 0x37a   : > { %v1544_v52 = vpack.c.bf16 %v2906_v16, %v2906_v16  ;;  %v1586_v5 = vpack.c.b16 %v1582_v2, %v2914_v53  ;;  %v1457_v60 = vrot.slane %v1456_v12, 4  ;;  %v1635_v63 = vunpack.c.l.b16 %v1543_v58 }
 0x37b   : > { %v1307_v59 = vadd.f32 %v1306_v56, %v1305_v49  ;;  %v1335_v41 = vrot.slane %v1334_v17, 4  ;;  %v1357_v48 = vadd.f32 %v1356_v11, %v1355_v21  ;;  %v1385_v15 = vrot.slane %v1384_v0, 4 }
 0x37c   : > { %1621 = vrot.lane.b32.xlu2 %v1614_v35, %s1994_s30  ;;  %v1636_v24 = vunpack.c.l.b16 %v1544_v52  ;;  %1593 = vrot.lane.b32.xlu1 %v1586_v5, %s1993_s6  ;;  %v2984_v62 = vunpack.c.l.b16 %v1541_v55  ;;  %v1458_v33 = vadd.f32 %v1457_v60, %v1456_v12  ;;  %v1521_v40 = vpack.c.bf16 %v2940_v7, %v2940_v7 }
 0x37d   : > { %v1308_v20 = vrot.slane %v1307_v59, 2  ;;  %v1336_v3 = vadd.f32 %v1335_v41, %v1334_v17  ;;  %1617 = vrot.lane.b32.xlu0 %v1612_v9, %s1994_s30  ;;  %v1358_v18 = vrot.slane %v1357_v48, 2  ;;  %v1386_v22 = vadd.f32 %v1385_v15, %v1384_v0 }
 0x37e   : > { %v1634_v49 = vunpack.c.l.b16 %v1542_v43  ;;  %v1641_v31 = vpack.c.b16 %v1636_v24, %v1635_v63  ;;  %v1459_v21 = vrot.slane %v1458_v33, 2  ;;  %v1465_v55 = vmul.f32 %v2857_v14, %v2857_v14 }
 0x37f   : > { %v1309_v53 = vadd.f32 %v1308_v20, %v1307_v59  ;;  %v1337_v1 = vrot.slane %v1336_v3, 2  ;;  %v1387_v4 = vrot.slane %v1386_v22, 2  ;;  %v1359_v26 = vadd.f32 %v1358_v18, %v1357_v48 }
 0x380   : > { %v1410_v61 = vrot.slane %v2875_v23, 1  ;;  %v3103_v7 = vpack.c.bf16 %v2900_v44, %v2900_v44  ;;  %v3002_v28 = vunpack.c.l.b16 %v1521_v40  ;;  %v1466_v17 = vmul.f32 %v2867_v10, %v2867_v10 }
 0x381   : > { %v1338_v9 = vadd.f32 %v1337_v1, %v1336_v3  ;;  %v1388_v50 = vadd.f32 %v1387_v4, %v1386_v22  ;;  %v1310_v13 = vrot.slane %v1309_v53, 1  ;;  %v1642_v14 = vpack.c.b16 %v2946_v47, %v2944_v42 }
 0x382   : > { %v2998_v43 = vunpack.c.l.b16 %v3103_v7  ;;  %v1640_v27 = vpack.c.b16 %v1634_v49, %v2984_v62  ;;  %v1467_v44 = vmul.f32 %v2879_v57, %v2879_v57  ;;  %v1471_v35 = vsel %vm1441_vm2, %v1463_v39, 0.0 }
 0x383   : > { %v1339_v56 = vrot.slane %v1338_v9, 1  ;;  %v1360_v6 = vrot.slane %v1359_v26, 1  ;;  %v1460_v11 = vadd.f32 %v1459_v21, %v1458_v33  ;;  %v1472_v10 = vsel %vm1441_vm2, %v1464_v32, 0.0 }
 0x384   : > { %1647 = vrot.lane.b32.xlu2 %v1641_v31, %s1994_s30  ;;  %v1474_v42 = vsel %vm1441_vm2, %v1465_v55, 0.0  ;;  %v1389_v0 = vrot.slane %v1388_v50, 1  ;;  %1619 = vrot.lane.b32.xlu1 %v1613_v46, %s1994_s30  ;;  %v1468_v57 = vmul.f32 %v2906_v16, %v2906_v16  ;;  %v1473_v2 = vadd.f32 %v1472_v10, %v1471_v35 }
 0x385   : > { %1643 = vrot.lane.b32.xlu0 %v3104_v51, %s1994_s30  ;;  %v1340_v47 = vadd.f32 %v1339_v56, %v1338_v9  ;;  %v1311_v12 = vadd.f32 %v1310_v13, %v1309_v53  ;;  %v1469_v59 = vmul.f32 %v2920_v37, %v2920_v37  ;;  %v1476_v30 = vsel %vm1441_vm2, %v1466_v17, 0.0 }
 0x386   : > { %v1566_v36 = vpack.c.b16 %v2998_v43, %v3002_v28  ;;  %v1470_v41 = vmul.f32 %v2925_v38, %v2925_v38  ;;  %v1475_v58 = vadd.f32 %v1474_v42, %v1473_v2  ;;  %v1361_v52 = vadd.f32 %v1360_v6, %v1359_v26 }
 0x387   : > { %v1478_v48 = vsel %vm1441_vm2, %v1467_v44, 0.0  ;;  %v3105_v16 = vrot.slane %v2862_v45, 2  ;;  %v1390_v5 = vadd.f32 %v1389_v0, %v1388_v50  ;;  %v1501_v60 = vsel %vm1500_vm3, %v1311_v12, %v1340_v47 }
 0x388   : > { %v1477_v37 = vadd.f32 %v1476_v30, %v1475_v58  ;;  %v1480_v20 = vsel %vm1441_vm2, %v1468_v57, 0.0  ;;  %v1411_v3 = vadd.f32 %v1410_v61, %v2875_v23  ;;  %v1503_v63 = vsel %vm1502_vm4, %v1501_v60, %v1361_v52 }
 0x389   : > { %v1438_v15 = vadd.f32 %v3105_v16, %v2862_v45  ;;  %v1505_v18 = vsel %vm1504_vm5, %v1503_v63, %v1390_v5  ;;  %v1482_v22 = vsel %vm1441_vm2, %v1469_v59, 0.0  ;;  %v1461_v45 = vrot.slane %v1460_v11, 1 }
 0x38a   : > { %v1479_v24 = vadd.f32 %v1478_v48, %v1477_v37  ;;  %v1507_v33 = vsel %vm1506_vm6, %v1505_v18, %v1411_v3  ;;  %v1484_v1 = vsel %vm1441_vm2, %v1470_v41, 0.0  ;;  %v3106_v17 = vpack.c.b16 %v2753_v19, %v2776_v34 }
 0x38b   : > { %v1439_v38 = vrot.slane %v1438_v15, 1  ;;  %v1462_v49 = vadd.f32 %v1461_v45, %v1460_v11  ;;  %v3107_v6 = vpack.c.b16 %v2755_v54, %v2778_v29  ;;  %v3108_v30 = vpack.c.b16 %v2766_v25, %v2734_v8 }
 0x38c   : > { %1645 = vrot.lane.b32.xlu1 %v1640_v27, %s1994_s30  ;;  %v1481_v53 = vadd.f32 %v1480_v20, %v1479_v24 }
 0x38d   : > { %1649 = vrot.lane.b32.xlu0 %v1642_v14, %s1994_s30  ;;  %v1440_v62 = vadd.f32 %v1439_v38, %v1438_v15 }
 0x38e   : > { %v1483_v23 = vadd.f32 %v1482_v22, %v1481_v53 }
 0x38f   : > { %v3039_v40 = vsel %vm1508_vm7, %v1507_v33, %v1440_v62 }
 0x390   : > { %v1485_v4 = vadd.f32 %v1484_v1, %v1483_v23 }
 0x392   : > { %v1486_v31 = vrot.slane %v1485_v4, 4 }
 0x394   : > { %1493 = vrot.lane.b32.xlu1 %v1462_v49, %s1991_s5  ;;  %v1487_v39 = vadd.f32 %v1486_v31, %v1485_v4 }
 0x396   : > { %v1488_v32 = vrot.slane %v1487_v39, 2 }
 0x398   : > { %v1489_v9 = vadd.f32 %v1488_v32, %v1487_v39 }
 0x39a   : > { %v1490_v26 = vrot.slane %v1489_v9, 1 }
 0x39c   : > { %v1491_v21 = vadd.f32 %v1490_v26, %v1489_v9 }
 0x39e   : > { %1497 = vrot.lane.b32.xlu2 %v1491_v21, %s1991_s5 }
 0x3c6   : > { %v1590_v55 = vpop.permute.xlu2 %1589 }
 0x3c7   : > { %v1656_v41 = vsel %vm1290_vm1, %v3108_v30, %v1590_v55 }
 0x3ce   : > { %v1616_v61 = vpop.permute.xlu2 %1615 }
 0x3d6   : > { %v1622_v46 = vpop.permute.xlu2 %1621 }
 0x3de   : > { %v1648_v35 = vpop.permute.xlu2 %1647 }
 0x3df   : > { %v1588_v50 = vpop.permute.xlu1 %1587 }
 0x3e0   : > { %v1653_v14 = vsel %vm1290_vm1, %v3106_v17, %v1588_v50 }
 0x3e1   : > { %v1665_v44 = vsel %vm1663_vm8, %v1653_v14, %v1616_v61 }
 0x3e7   : > { %v1592_v7 = vpop.permute.xlu0 %1591 }
 0x3e8   : > { %v1659_v51 = vsel %vm1290_vm1, %v3107_v6, %v1592_v7 }
 0x3ee   : > { %v1594_v56 = vpop.permute.xlu1 %1593 }
 0x3ef   : > { %v1618_v13 = vpop.permute.xlu0 %1617  ;;  %v1662_v2 = vsel %vm1290_vm1, %v1566_v36, %v1594_v56 }
 0x3f0   : > { %v1671_v58 = vsel %vm1663_vm8, %v1662_v2, %v1622_v46  ;;  %v1667_v28 = vsel %vm1663_vm8, %v1656_v41, %v1618_v13 }
 0x3f6   : > { %v1620_v10 = vpop.permute.xlu1 %1619 }
 0x3f7   : > { %v1644_v27 = vpop.permute.xlu0 %1643  ;;  %v1669_v19 = vsel %vm1663_vm8, %v1659_v51, %v1620_v10 }
 0x3f8   : > { %v1673_v11 = vsel %vm259_vm0, %v1665_v44, %v1644_v27  ;;  %v1677_v54 = vsel %vm259_vm0, %v1669_v19, %v1648_v35  ;;  %v1498_v3 = vpop.permute.xlu2 %1497 }
 0x3f9   : > { %v1684_v42 = vunpack.c.l.b16 %v1673_v11  ;;  %v1685_v47 = vunpack.c.h.b16 %v1673_v11  ;;  %v1688_v0 = vunpack.c.l.b16 %v1677_v54  ;;  %v1689_v57 = vunpack.c.h.b16 %v1677_v54 }
 0x3fb   : > { %v1692_v34 = vpack.c.b16 %v1684_v42, %v1684_v42  ;;  %v1693_v29 = vpack.c.b16 %v1685_v47, %v1685_v47  ;;  %v1696_v12 = vpack.c.b16 %v1688_v0, %v1688_v0  ;;  %v1697_v59 = vpack.c.b16 %v1689_v57, %v1689_v57 }
 0x3fd   : > { %1709 = vst.msk [vmem:[%s3058_s8] sm:$0xf] %vm1708_vm9, %v1692_v34 }
 0x3fe   : > { %1710 = vst.msk [vmem:[%s3058_s8 + $0x4] sm:$0xf] %vm1708_vm9, %v1693_v29  ;;  %v1646_v52 = vpop.permute.xlu1 %1645 }
 0x3ff   : > { %1713 = vst.msk [vmem:[%s3058_s8 + $0x10] sm:$0xf] %vm1708_vm9, %v1696_v12  ;;  %v1650_v43 = vpop.permute.xlu0 %1649  ;;  %v1675_v25 = vsel %vm259_vm0, %v1667_v28, %v1646_v52 }
 0x400   : > { %1714 = vst.msk [vmem:[%s3058_s8 + $0x14] sm:$0xf] %vm1708_vm9, %v1697_v59  ;;  %v1679_v36 = vsel %vm259_vm0, %v1671_v58, %v1650_v43  ;;  %v1686_v16 = vunpack.c.l.b16 %v1675_v25  ;;  %v1687_v15 = vunpack.c.h.b16 %v1675_v25 }
 0x401   : > { %v1690_v48 = vunpack.c.l.b16 %v1679_v36  ;;  %v1691_v8 = vunpack.c.h.b16 %v1679_v36 }
 0x402   : > { %v1694_v60 = vpack.c.b16 %v1686_v16, %v1686_v16  ;;  %v1695_v20 = vpack.c.b16 %v1687_v15, %v1687_v15 }
 0x403   : > { %v1698_v37 = vpack.c.b16 %v1690_v48, %v1690_v48  ;;  %v1699_v5 = vpack.c.b16 %v1691_v8, %v1691_v8 }
 0x404   : > { %1711 = vst.msk [vmem:[%s3058_s8 + $0x8] sm:$0xf] %vm1708_vm9, %v1694_v60 }
 0x405   : > { %1715 = vst.msk [vmem:[%s3058_s8 + $0x18] sm:$0xf] %vm1708_vm9, %v1698_v37 }
 0x406   : > { %1716 = vst.msk [vmem:[%s3058_s8 + $0x1c] sm:$0xf] %vm1708_vm9, %v1699_v5  ;;  %v1494_v38 = vpop.permute.xlu1 %1493 }
 0x407   : > { %1712 = vst.msk [vmem:[%s3058_s8 + $0xc] sm:$0xf] %vm1708_vm9, %v1695_v20  ;;  %v1511_v63 = vsel %vm1510_vm10, %v3039_v40, %v1494_v38 }
 0x408   : > { %v1513_v24 = vsel %vm1512_vm11, %v1511_v63, %v1498_v3 }
 0x409   : > { %1514 = vst.msk [vmem:[%s208_s12] sm:$0xff] %vm1290_vm1, %v1513_v24 }
 0x40a PF: > { %s15_s15 = sadd.s32 1, %s1988_s15  }
 0x40b   : > { %p12_p4 = scmp.ge.s32.totalorder %s15_s15, 4  }
 0x40d   :  { %14 = sbr.rel (!%p12_p4) target bundleno = 1 (0x1), region = 84 }

// kernel: search_reduction_cell_forward.17
= control target key start
LH: loop header
LB: loop body
LE: loop exit
PB: predicated region body
PF: predicated region fallthrough
CT: control target
= control target key end

     0   :  { %11 = vsyncpa [#allocation3], 0  ;;  %s1780_s0 = inlined_call_operand.vmem [shape: bf16[2,64,64], index: 0, kind: input, shape index: {}]   ;;  %s1781_s1 = inlined_call_operand.vmem [shape: bf16[2,64,64], index: 1, kind: input, shape index: {}]   ;;  %s1782_s2 = inlined_call_operand.vmem [shape: bf16[2,64,64], index: 2, kind: input, shape index: {}]   ;;  %s1783_s3 = inlined_call_operand.vmem [shape: f32[5,16], index: 3, kind: input, shape index: {}]   ;;  %s1784_s4 = inlined_call_operand.vmem [shape: f32[5,16], index: 4, kind: input, shape index: {}]   ;;  %s1785_s5 = inlined_call_operand.vmem [shape: f32[5,16], index: 5, kind: input, shape index: {}]   ;;  %s1786_s6 = inlined_call_operand.hbm [shape: f32[2,64,48], index: 6, kind: output, shape index: {}]  }
   0x1   :  { %13 = vsyncpa [#allocation3 + $0x1], 0  ;;  %s1296_s21 = smov 0   ;;  %s1298_s22 = smov 0  }
   0x2   :  { %s1300_s23 = smov 0   ;;  %s1302_s24 = smov 0  }
   0x3 LB: > { %s1317_s25 = sadd.s32 4294967295, %s1251_s24   ;;  %s1065_s26 = sadd.s32 4294967294, %s1251_s24   ;;  %s1251_s24 = sphi %s1302_s24, %s1792_s24   ;;  %s1247_s23 = sphi %s1300_s23, %s1791_s23   ;;  %s1243_s22 = sphi %s1298_s22, %s1790_s22   ;;  %s1239_s21 = sphi %s1296_s21, %s1789_s21  }
   0x4   : > { %s1321_s27 = sadd.s32 1, %s1251_s24   ;;  %s167_s28 = sadd.s32 1, %s1247_s23 }
   0x5   : > { %s164_s29 = ssub.s32 %s1251_s24, %s1321_s27  ;;  %p177_p0 = scmp.ne.s32.totalorder %s1247_s23, %s1243_s22 }
   0x6   : > { %p165_p1 = scmp.eq.s32.totalorder %s164_s29, 0  ;;  %p178_p2 = scmp.eq.s32.totalorder %s1317_s25, 1 }
   0x7   : > { %p183_p3 = scmp.ne.s32.totalorder %s1243_s22, %s1239_s21  ;;  %p184_p4 = scmp.eq.s32.totalorder %s1065_s26, 1 }
   0x8   : > { %s1332_s30 = scalar_select %p165_p1, %s1247_s23, %s167_s28  }
   0x9   : > { %p1334_p5 = por %p178_p2, %p177_p0  ;;  %p1338_p6 = por %p184_p4, %p183_p3 }
   0xa   : > { %p1068_p7 = scmp.ge.s32.totalorder %s1251_s24, 1  ;;  %p235_p8 = scmp.lt.s32.totalorder %s1251_s24, 3 }
   0xc   : > { %p236_p9 = pnand %p1068_p7, %p235_p8 }
   0xd   : > { %s1253_s11 = smov (!%p236_p9), 16   ;;  %s1254_s12 = smov (!%p236_p9), 32  }
   0xe   : > { %239 = sbr.rel (%p236_p9) target bundleno = 672 (0x2a0), region = 44  ;;  %s1255_s13 = smov (!%p236_p9), 48  }
   0xf   : > { %p275_p10 = scmp.lt.s32.totalorder (!%p236_p9), %s1317_s25, 1  ;;  %s1256_s26 = smov (!%p236_p9), 112  }
  0x10   : > { %s1257_s28 = smov (!%p236_p9), 96   ;;  %s1258_s29 = smov (!%p236_p9), 80  }
  0x11   : > { %s1209_s18 = scalar_lea.hbm (!%p236_p9), %s1786_s6, 128 }
  0x13   : > { %v1347_v0 = vld [vmem:[%s1783_s3] sm:$0x1f]  ;;  %s276_s16 = scalar_select %p275_p10, %s1317_s25, 1  ;;  %vm945_vm0 = vcmask 261120   ;;  %vm936_vm1 = vcmask 130048   ;;  %vm954_vm2 = vcmask 392192  }
  0x14   : > { %v316_v1 = vperm.slane %v1347_v0, 1  ;;  %v369_v2 = vperm.slane %v1347_v0, 2  ;;  %v422_v3 = vperm.slane %v1347_v0, 3  ;;  %v1358_v4 = vld [vmem:[%s1784_s4] sm:$0x1f]  ;;  %v1446_v50 = vperm.slane %v1347_v0, 0 }
  0x15   : > { %v510_v5 = vperm.slane %v1358_v4, 1  ;;  %v563_v6 = vperm.slane %v1358_v4, 2  ;;  %v616_v7 = vperm.slane %v1358_v4, 3  ;;  %s1368_s17 = sshll.u32 %s276_s16, 5 }
  0x16   : > { %318 = vrot.lane.b32.xlu0 %v316_v1, %s1253_s11  ;;  %s279_s20 = scalar_lea.vmem %s1780_s0, %s1368_s17  ;;  %s1424_s14 = scalar_lea.vmem %s1781_s1, %s1368_s17 }
  0x17   : > { %v1133_v8 = vld [vmem:[%s279_s20 + $0x8] sm:$0xff]   ;;  %v1086_v9 = vld [vmem:[%s279_s20] sm:$0xff]   ;;  %v1134_v17 = vld [vmem:[%s279_s20 + $0x10] sm:$0xff]   ;;  %s1591_s19 = scalar_lea.vmem %s1782_s2, %s1368_s17 }
  0x18   : > { %v1374_v10 = vunpack.c.h.bf16 %v1133_v8  ;;  %v1376_v11 = vunpack.c.h.bf16 %v1086_v9  ;;  %v1378_v12 = vunpack.c.l.bf16 %v1086_v9  ;;  %v1386_v18 = vunpack.c.l.bf16 %v1133_v8  ;;  %v1135_v24 = vld [vmem:[%s279_s20 + $0x18] sm:$0xff]   ;;  %v1136_v41 = vld [vmem:[%s1424_s14 + $0x8] sm:$0xff]   ;;  %v1137_v47 = vld [vmem:[%s1424_s14 + $0x10] sm:$0xff]  }
  0x19   : > { %v1388_v19 = vunpack.c.l.bf16 %v1134_v17  ;;  %v1390_v20 = vunpack.c.h.bf16 %v1134_v17  ;;  %v1398_v26 = vunpack.c.h.bf16 %v1135_v24  ;;  %v1400_v27 = vunpack.c.l.bf16 %v1135_v24  ;;  %v1102_v56 = vld [vmem:[%s1424_s14] sm:$0xff]   ;;  %v1138_v8 = vld [vmem:[%s1424_s14 + $0x18] sm:$0xff]  }
  0x1a   : > { %v1433_v42 = vunpack.c.l.bf16 %v1136_v41  ;;  %v1442_v48 = vunpack.c.h.bf16 %v1137_v47  ;;  %v311_v54 = vmul.f32 %v1374_v10, %v1446_v50  ;;  %v1461_v59 = vunpack.c.h.bf16 %v1102_v56  ;;  %v1500_v17 = vld [vmem:[%s1785_s5] sm:$0x1f] }
  0x1b   : > { %v1463_v60 = vunpack.c.l.bf16 %v1102_v56  ;;  %v1486_v9 = vunpack.c.h.bf16 %v1138_v8 }
  0x1e   : > { %371 = vrot.lane.b32.xlu0 %v369_v2, %s1254_s12  ;;  %v1474_v2 = vunpack.c.l.bf16 %v1137_v47 }
  0x26   : > { %424 = vrot.lane.b32.xlu0 %v422_v3, %s1255_s13  ;;  %v1476_v3 = vunpack.c.h.bf16 %v1136_v41 }
  0x2e   : > { %512 = vrot.lane.b32.xlu0 %v510_v5, %s1253_s11 }
  0x36   : > { %565 = vrot.lane.b32.xlu0 %v563_v6, %s1254_s12 }
  0x3e   : > { %618 = vrot.lane.b32.xlu0 %v616_v7, %s1255_s13 }
  0x88   : > { %v319_v13 = vpop.permute.xlu0 %318 }
  0x89   : > { %v324_v14 = vmul.f32 %v1374_v10, %v319_v13  ;;  %v322_v15 = vmul.f32 %v1376_v11, %v319_v13  ;;  %v321_v16 = vmul.f32 %v1378_v12, %v319_v13  ;;  %v325_v21 = vmul.f32 %v1388_v19, %v319_v13 }
  0x8a   : > { %v323_v22 = vmul.f32 %v1386_v18, %v319_v13  ;;  %v326_v23 = vmul.f32 %v1390_v20, %v319_v13  ;;  %v328_v29 = vmul.f32 %v1398_v26, %v319_v13  ;;  %v327_v30 = vmul.f32 %v1400_v27, %v319_v13 }
  0x8b   : > { %343 = vrot.lane.b32.xlu2 %v324_v14, %s1256_s26  ;;  %339 = vrot.lane.b32.xlu1 %v322_v15, %s1256_s26 }
  0x8c   : > { %337 = vrot.lane.b32.xlu0 %v321_v16, %s1256_s26 }
  0x90   : > { %v372_v25 = vpop.permute.xlu0 %371 }
  0x91   : > { %v376_v28 = vmul.f32 %v1386_v18, %v372_v25  ;;  %v375_v31 = vmul.f32 %v1376_v11, %v372_v25  ;;  %v374_v32 = vmul.f32 %v1378_v12, %v372_v25  ;;  %v379_v33 = vmul.f32 %v1390_v20, %v372_v25 }
  0x92   : > { %v378_v36 = vmul.f32 %v1388_v19, %v372_v25  ;;  %v377_v37 = vmul.f32 %v1374_v10, %v372_v25  ;;  %v381_v39 = vmul.f32 %v1398_v26, %v372_v25  ;;  %v380_v40 = vmul.f32 %v1400_v27, %v372_v25 }
  0x93   : > { %345 = vrot.lane.b32.xlu2 %v325_v21, %s1256_s26  ;;  %341 = vrot.lane.b32.xlu1 %v323_v22, %s1256_s26  ;;  %v704_v22 = vperm.slane %v1500_v17, 1  ;;  %v312_v25 = vmul.f32 %v1388_v19, %v1446_v50 }
  0x94   : > { %347 = vrot.lane.b32.xlu0 %v326_v23, %s1256_s26 }
  0x98   : > { %v425_v34 = vpop.permute.xlu0 %424 }
  0x99   : > { %v429_v35 = vmul.f32 %v1386_v18, %v425_v34  ;;  %v432_v38 = vmul.f32 %v1390_v20, %v425_v34  ;;  %v428_v44 = vmul.f32 %v1376_v11, %v425_v34  ;;  %v427_v45 = vmul.f32 %v1378_v12, %v425_v34 }
  0x9a   : > { %v431_v51 = vmul.f32 %v1388_v19, %v425_v34  ;;  %v430_v52 = vmul.f32 %v1374_v10, %v425_v34  ;;  %v434_v57 = vmul.f32 %v1398_v26, %v425_v34  ;;  %v433_v58 = vmul.f32 %v1400_v27, %v425_v34 }
  0x9b   : > { %351 = vrot.lane.b32.xlu2 %v328_v29, %s1256_s26  ;;  %349 = vrot.lane.b32.xlu1 %v327_v30, %s1256_s26  ;;  %v1488_v10 = vunpack.c.l.bf16 %v1138_v8 }
  0x9c   : > { %394 = vrot.lane.b32.xlu0 %v376_v28, %s1257_s28 }
  0xa0   : > { %v513_v43 = vpop.permute.xlu0 %512 }
  0xa1   : > { %v517_v46 = vmul.f32 %v1433_v42, %v513_v43  ;;  %v520_v49 = vmul.f32 %v1442_v48, %v513_v43  ;;  %v516_v61 = vmul.f32 %v1461_v59, %v513_v43  ;;  %v515_v62 = vmul.f32 %v1463_v60, %v513_v43 }
  0xa2   : > { %v519_v6 = vmul.f32 %v1474_v2, %v513_v43  ;;  %v518_v7 = vmul.f32 %v1476_v3, %v513_v43  ;;  %v522_v14 = vmul.f32 %v1486_v9, %v513_v43  ;;  %v521_v15 = vmul.f32 %v1488_v10, %v513_v43 }
  0xa3   : > { %392 = vrot.lane.b32.xlu2 %v375_v31, %s1257_s28  ;;  %390 = vrot.lane.b32.xlu1 %v374_v32, %s1257_s28  ;;  %v315_v32 = vmul.f32 %v1398_v26, %v1446_v50  ;;  %v308_v26 = vmul.f32 %v1378_v12, %v1446_v50  ;;  %v313_v12 = vmul.f32 %v1390_v20, %v1446_v50 }
  0xa4   : > { %400 = vrot.lane.b32.xlu0 %v379_v33, %s1257_s28 }
  0xa8   : > { %v566_v53 = vpop.permute.xlu0 %565 }
  0xa9   : > { %v570_v55 = vmul.f32 %v1433_v42, %v566_v53  ;;  %v573_v63 = vmul.f32 %v1442_v48, %v566_v53  ;;  %v569_v23 = vmul.f32 %v1461_v59, %v566_v53  ;;  %v568_v24 = vmul.f32 %v1463_v60, %v566_v53 }
  0xaa   : > { %v572_v30 = vmul.f32 %v1474_v2, %v566_v53  ;;  %v571_v31 = vmul.f32 %v1476_v3, %v566_v53  ;;  %v575_v34 = vmul.f32 %v1486_v9, %v566_v53 }
  0xab   : > { %398 = vrot.lane.b32.xlu2 %v378_v36, %s1257_s28  ;;  %396 = vrot.lane.b32.xlu1 %v377_v37, %s1257_s28  ;;  %v309_v36 = vmul.f32 %v1376_v11, %v1446_v50  ;;  %v310_v11 = vmul.f32 %v1386_v18, %v1446_v50  ;;  %v314_v18 = vmul.f32 %v1400_v27, %v1446_v50  ;;  %v475_v27 = vperm.slane %v1347_v0, 4 }
  0xac   : > { %447 = vrot.lane.b32.xlu0 %v429_v35, %s1258_s29  ;;  %v574_v35 = vmul.f32 %v1488_v10, %v566_v53 }
  0xb0   : > { %v1472_v1 = vpop.permute.xlu0 %618 }
  0xb1   : > { %v623_v5 = vmul.f32 %v1433_v42, %v1472_v1  ;;  %v626_v13 = vmul.f32 %v1442_v48, %v1472_v1 }
  0xb3   : > { %404 = vrot.lane.b32.xlu2 %v381_v39, %s1257_s28  ;;  %402 = vrot.lane.b32.xlu1 %v380_v40, %s1257_s28 }
  0xb4   : > { %453 = vrot.lane.b32.xlu0 %v432_v38, %s1258_s29 }
  0xbb   : > { %445 = vrot.lane.b32.xlu2 %v428_v44, %s1258_s29  ;;  %443 = vrot.lane.b32.xlu1 %v427_v45, %s1258_s29  ;;  %v622_v44 = vmul.f32 %v1461_v59, %v1472_v1  ;;  %v621_v45 = vmul.f32 %v1463_v60, %v1472_v1 }
  0xbc   : > { %535 = vrot.lane.b32.xlu0 %v517_v46, %s1256_s26 }
  0xc3   : > { %451 = vrot.lane.b32.xlu2 %v431_v51, %s1258_s29  ;;  %449 = vrot.lane.b32.xlu1 %v430_v52, %s1258_s29 }
  0xc4   : > { %541 = vrot.lane.b32.xlu0 %v520_v49, %s1256_s26 }
  0xcb   : > { %457 = vrot.lane.b32.xlu2 %v434_v57, %s1258_s29  ;;  %455 = vrot.lane.b32.xlu1 %v433_v58, %s1258_s29 }
  0xcc   : > { %588 = vrot.lane.b32.xlu0 %v570_v55, %s1257_s28  ;;  %v624_v55 = vmul.f32 %v1476_v3, %v1472_v1 }
  0xd3   : > { %533 = vrot.lane.b32.xlu2 %v516_v61, %s1256_s26  ;;  %531 = vrot.lane.b32.xlu1 %v515_v62, %s1256_s26 }
  0xd4   : > { %594 = vrot.lane.b32.xlu0 %v573_v63, %s1257_s28  ;;  %v628_v63 = vmul.f32 %v1486_v9, %v1472_v1 }
  0xdb   : > { %539 = vrot.lane.b32.xlu2 %v519_v6, %s1256_s26  ;;  %537 = vrot.lane.b32.xlu1 %v518_v7, %s1256_s26 }
  0xdc   : > { %641 = vrot.lane.b32.xlu0 %v623_v5, %s1258_s29  ;;  %v627_v5 = vmul.f32 %v1488_v10, %v1472_v1 }
  0xe3   : > { %545 = vrot.lane.b32.xlu2 %v522_v14, %s1256_s26  ;;  %543 = vrot.lane.b32.xlu1 %v521_v15, %s1256_s26  ;;  %v757_v15 = vperm.slane %v1500_v17, 2 }
  0xe4   : > { %647 = vrot.lane.b32.xlu0 %v626_v13, %s1258_s29 }
  0xe5   : > { %v344_v16 = vpop.permute.xlu2 %343 }
  0xe6   : > { %v1502_v21 = vadd.f32 %v344_v16, %v311_v54  ;;  %v625_v54 = vmul.f32 %v1474_v2, %v1472_v1 }
  0xeb   : > { %586 = vrot.lane.b32.xlu2 %v569_v23, %s1257_s28  ;;  %584 = vrot.lane.b32.xlu1 %v568_v24, %s1257_s28 }
  0xec   : > { %706 = vrot.lane.b32.xlu0 %v704_v22, %s1253_s11 }
  0xed   : > { %v346_v28 = vpop.permute.xlu2 %345 }
  0xee   : > { %v365_v29 = vadd.f32 %v346_v28, %v312_v25 }
  0xf3   : > { %592 = vrot.lane.b32.xlu2 %v572_v30, %s1257_s28  ;;  %590 = vrot.lane.b32.xlu1 %v571_v31, %s1257_s28 }
  0xf5   : > { %v352_v19 = vpop.permute.xlu2 %351 }
  0xf6   : > { %v368_v33 = vadd.f32 %v352_v19, %v315_v32  ;;  %v501_v19 = vperm.slane %v1358_v4, 0 }
  0xfb   : > { %598 = vrot.lane.b32.xlu2 %v575_v34, %s1257_s28  ;;  %596 = vrot.lane.b32.xlu1 %v574_v35, %s1257_s28 }
  0xfd   : > { %v393_v37 = vpop.permute.xlu2 %392  ;;  %v340_v38 = vpop.permute.xlu1 %339 }
  0xfe   : > { %v362_v39 = vadd.f32 %v340_v38, %v309_v36  ;;  %v338_v40 = vpop.permute.xlu0 %337  ;;  %v504_v38 = vmul.f32 %v1433_v42, %v501_v19  ;;  %v509_v42 = vmul.f32 %v1486_v9, %v501_v19  ;;  %v1581_v9 = vperm.slane %v1358_v4, 4 }
  0xff   : > { %v361_v41 = vadd.f32 %v338_v40, %v308_v26 }
 0x100   : > { %v415_v43 = vadd.f32 %v393_v37, %v362_v39  ;;  %v503_v37 = vmul.f32 %v1461_v59, %v501_v19 }
 0x103   : > { %639 = vrot.lane.b32.xlu2 %v622_v44, %s1258_s29  ;;  %637 = vrot.lane.b32.xlu1 %v621_v45, %s1258_s29 }
 0x105   : > { %v399_v46 = vpop.permute.xlu2 %398  ;;  %v342_v47 = vpop.permute.xlu1 %341 }
 0x106   : > { %v418_v49 = vadd.f32 %v399_v46, %v365_v29  ;;  %v363_v51 = vadd.f32 %v342_v47, %v310_v11  ;;  %v348_v52 = vpop.permute.xlu0 %347  ;;  %v810_v29 = vperm.slane %v1500_v17, 3  ;;  %v507_v46 = vmul.f32 %v1442_v48, %v501_v19 }
 0x107   : > { %v366_v53 = vadd.f32 %v348_v52, %v313_v12  ;;  %v506_v12 = vmul.f32 %v1474_v2, %v501_v19  ;;  %v502_v48 = vmul.f32 %v1463_v60, %v501_v19 }
 0x10b   : > { %645 = vrot.lane.b32.xlu2 %v625_v54, %s1258_s29  ;;  %643 = vrot.lane.b32.xlu1 %v624_v55, %s1258_s29 }
 0x10d   : > { %v405_v20 = vpop.permute.xlu2 %404  ;;  %v350_v56 = vpop.permute.xlu1 %349 }
 0x10e   : > { %v421_v57 = vadd.f32 %v405_v20, %v368_v33  ;;  %v367_v58 = vadd.f32 %v350_v56, %v314_v18  ;;  %v395_v61 = vpop.permute.xlu0 %394 }
 0x10f   : > { %v416_v62 = vadd.f32 %v395_v61, %v363_v51 }
 0x113   : > { %651 = vrot.lane.b32.xlu2 %v628_v63, %s1258_s29  ;;  %649 = vrot.lane.b32.xlu1 %v627_v5, %s1258_s29 }
 0x115   : > { %v446_v50 = vpop.permute.xlu2 %445  ;;  %v391_v6 = vpop.permute.xlu1 %390 }
 0x116   : > { %v468_v7 = vadd.f32 %v446_v50, %v415_v43  ;;  %v414_v8 = vadd.f32 %v391_v6, %v361_v41  ;;  %v401_v13 = vpop.permute.xlu0 %400 }
 0x117   : > { %v419_v14 = vadd.f32 %v401_v13, %v366_v53 }
 0x118   : > { %v1552_v16 = vadd.f32 %v475_v27, %v468_v7  ;;  %v505_v7 = vmul.f32 %v1476_v3, %v501_v19 }
 0x11b   : > { %759 = vrot.lane.b32.xlu1 %v757_v15, %s1254_s12  ;;  %812 = vrot.lane.b32.xlu2 %v810_v29, %s1255_s13  ;;  %v1118_v29 = vld [vmem:[%s1591_s19] sm:$0xff]  }
 0x11d   : > { %v452_v22 = vpop.permute.xlu2 %451  ;;  %v397_v1 = vpop.permute.xlu1 %396 }
 0x11e   : > { %v471_v23 = vadd.f32 %v452_v22, %v418_v49  ;;  %v417_v24 = vadd.f32 %v397_v1, %v1502_v21  ;;  %v448_v25 = vpop.permute.xlu0 %447  ;;  %v508_v1 = vmul.f32 %v1488_v10, %v501_v19  ;;  %v1598_v10 = vunpack.c.h.bf16 %v1118_v29 }
 0x11f   : > { %v469_v28 = vadd.f32 %v448_v25, %v416_v62  ;;  %v1600_v19 = vunpack.c.l.bf16 %v1118_v29 }
 0x120   : > { %v1556_v0 = vadd.f32 %v475_v27, %v471_v23 }
 0x121   : > { %v1559_v30 = vadd.f32 %v475_v27, %v469_v28 }
 0x125   : > { %v458_v31 = vpop.permute.xlu2 %457  ;;  %v403_v32 = vpop.permute.xlu1 %402 }
 0x126   : > { %v474_v33 = vadd.f32 %v458_v31, %v421_v57  ;;  %v420_v34 = vadd.f32 %v403_v32, %v367_v58  ;;  %v454_v35 = vpop.permute.xlu0 %453  ;;  %v1139_v31 = vld [vmem:[%s1591_s19 + $0x8] sm:$0xff]  }
 0x127   : > { %v472_v36 = vadd.f32 %v454_v35, %v419_v14 }
 0x128   : > { %v1563_v26 = vadd.f32 %v475_v27, %v474_v33  ;;  %v1602_v33 = vunpack.c.l.bf16 %v1139_v31 }
 0x129   : > { %v1565_v21 = vadd.f32 %v475_v27, %v472_v36 }
 0x12d   : > { %v534_v39 = vpop.permute.xlu2 %533  ;;  %v444_v40 = vpop.permute.xlu1 %443 }
 0x12e   : > { %v556_v41 = vadd.f32 %v534_v39, %v503_v37  ;;  %v467_v43 = vadd.f32 %v444_v40, %v414_v8  ;;  %v536_v44 = vpop.permute.xlu0 %535  ;;  %v1140_v39 = vld [vmem:[%s1591_s19 + $0x10] sm:$0xff]  }
 0x12f   : > { %v557_v45 = vadd.f32 %v536_v44, %v504_v38 }
 0x130   : > { %v1569_v11 = vadd.f32 %v475_v27, %v467_v43 }
 0x135   : > { %v540_v47 = vpop.permute.xlu2 %539  ;;  %v450_v49 = vpop.permute.xlu1 %449 }
 0x136   : > { %v559_v51 = vadd.f32 %v540_v47, %v506_v12  ;;  %v470_v52 = vadd.f32 %v450_v49, %v417_v24  ;;  %v542_v53 = vpop.permute.xlu0 %541  ;;  %v1615_v12 = vunpack.c.h.bf16 %v1139_v31 }
 0x137   : > { %v560_v59 = vadd.f32 %v542_v53, %v507_v46  ;;  %v1618_v46 = vunpack.c.h.bf16 %v1140_v39 }
 0x138   : > { %v1573_v54 = vadd.f32 %v475_v27, %v470_v52 }
 0x13d   : > { %v546_v55 = vpop.permute.xlu2 %545  ;;  %v456_v18 = vpop.permute.xlu1 %455 }
 0x13e   : > { %v562_v20 = vadd.f32 %v546_v55, %v509_v42  ;;  %v473_v56 = vadd.f32 %v456_v18, %v420_v34  ;;  %v589_v57 = vpop.permute.xlu0 %588  ;;  %v1141_v55 = vld [vmem:[%s1591_s19 + $0x18] sm:$0xff]  }
 0x13f   : > { %v610_v58 = vadd.f32 %v589_v57, %v557_v45  ;;  %v1613_v45 = vunpack.c.l.bf16 %v1140_v39 }
 0x140   : > { %v1576_v61 = vadd.f32 %v475_v27, %v473_v56  ;;  %v1629_v56 = vunpack.c.l.bf16 %v1141_v55 }
 0x145   : > { %v587_v2 = vpop.permute.xlu2 %586  ;;  %v532_v62 = vpop.permute.xlu1 %531 }
 0x146   : > { %v609_v63 = vadd.f32 %v587_v2, %v556_v41  ;;  %v555_v5 = vadd.f32 %v532_v62, %v502_v48  ;;  %v595_v50 = vpop.permute.xlu0 %594 }
 0x147   : > { %v613_v6 = vadd.f32 %v595_v50, %v560_v59 }
 0x14d   : > { %v593_v8 = vpop.permute.xlu2 %592  ;;  %v538_v13 = vpop.permute.xlu1 %537 }
 0x14e   : > { %v612_v14 = vadd.f32 %v593_v8, %v559_v51  ;;  %v558_v15 = vadd.f32 %v538_v13, %v505_v7  ;;  %v642_v27 = vpop.permute.xlu0 %641 }
 0x14f   : > { %v663_v22 = vadd.f32 %v642_v27, %v610_v58 }
 0x151   : > { %v1584_v60 = vadd.f32 %v1581_v9, %v663_v22 }
 0x155   : > { %v599_v23 = vpop.permute.xlu2 %598  ;;  %v544_v24 = vpop.permute.xlu1 %543 }
 0x156   : > { %v615_v4 = vadd.f32 %v599_v23, %v562_v20  ;;  %v561_v3 = vadd.f32 %v544_v24, %v508_v1  ;;  %v648_v25 = vpop.permute.xlu0 %647  ;;  %v1627_v20 = vunpack.c.h.bf16 %v1141_v55 }
 0x157   : > { %v666_v28 = vadd.f32 %v648_v25, %v613_v6 }
 0x159   : > { %v1596_v32 = vadd.f32 %v1581_v9, %v666_v28 }
 0x15d   : > { %v640_v34 = vpop.permute.xlu2 %639  ;;  %v585_v35 = vpop.permute.xlu1 %584 }
 0x15e   : > { %v662_v36 = vadd.f32 %v640_v34, %v609_v63  ;;  %v608_v37 = vadd.f32 %v585_v35, %v555_v5  ;;  %v707_v38 = vpop.permute.xlu0 %706 }
 0x15f   : > { %v710_v40 = vmul.f32 %v1598_v10, %v707_v38  ;;  %v709_v41 = vmul.f32 %v1600_v19, %v707_v38  ;;  %v711_v43 = vmul.f32 %v1602_v33, %v707_v38  ;;  %v713_v51 = vmul.f32 %v1613_v45, %v707_v38 }
 0x160   : > { %v1609_v44 = vadd.f32 %v1581_v9, %v662_v36  ;;  %v712_v52 = vmul.f32 %v1615_v12, %v707_v38  ;;  %v714_v42 = vmul.f32 %v1618_v46, %v707_v38  ;;  %v716_v48 = vmul.f32 %v1627_v20, %v707_v38 }
 0x161   : > { %727 = vrot.lane.b32.xlu1 %v710_v40, %s1256_s26  ;;  %725 = vrot.lane.b32.xlu0 %v709_v41, %s1256_s26  ;;  %v715_v2 = vmul.f32 %v1629_v56, %v707_v38 }
 0x162   : > { %729 = vrot.lane.b32.xlu2 %v711_v43, %s1256_s26 }
 0x165   : > { %v646_v47 = vpop.permute.xlu2 %645  ;;  %v591_v49 = vpop.permute.xlu1 %590 }
 0x166   : > { %v665_v53 = vadd.f32 %v646_v47, %v612_v14  ;;  %v611_v59 = vadd.f32 %v591_v49, %v558_v15 }
 0x168   : > { %v674_v18 = vadd.f32 %v1581_v9, %v665_v53 }
 0x169   : > { %733 = vrot.lane.b32.xlu1 %v713_v51, %s1256_s26  ;;  %731 = vrot.lane.b32.xlu0 %v712_v52, %s1256_s26 }
 0x16a   : > { %735 = vrot.lane.b32.xlu2 %v714_v42, %s1256_s26 }
 0x16d   : > { %v652_v57 = vpop.permute.xlu2 %651  ;;  %v597_v58 = vpop.permute.xlu1 %596 }
 0x16e   : > { %v668_v62 = vadd.f32 %v652_v57, %v615_v4  ;;  %v614_v63 = vadd.f32 %v597_v58, %v561_v3 }
 0x170   : > { %v677_v5 = vadd.f32 %v1581_v9, %v668_v62  ;;  %v863_v62 = vperm.slane %v1500_v17, 4 }
 0x171   : > { %739 = vrot.lane.b32.xlu1 %v716_v48, %s1256_s26  ;;  %737 = vrot.lane.b32.xlu0 %v715_v2, %s1256_s26 }
 0x175   : > { %v638_v50 = vpop.permute.xlu1 %637 }
 0x176   : > { %v661_v6 = vadd.f32 %v638_v50, %v608_v37 }
 0x178   : > { %v670_v7 = vadd.f32 %v1581_v9, %v661_v6 }
 0x17d   : > { %v644_v8 = vpop.permute.xlu1 %643 }
 0x17e   : > { %v664_v13 = vadd.f32 %v644_v8, %v611_v59 }
 0x180   : > { %v673_v14 = vadd.f32 %v1581_v9, %v664_v13 }
 0x185   : > { %v650_v15 = vpop.permute.xlu1 %649 }
 0x186   : > { %v667_v27 = vadd.f32 %v650_v15, %v614_v63 }
 0x188   : > { %v676_v22 = vadd.f32 %v1581_v9, %v667_v27  ;;  %v813_v9 = vpop.permute.xlu2 %812 }
 0x189   : > { %v815_v29 = vmul.f32 %v1600_v19, %v813_v9  ;;  %v816_v35 = vmul.f32 %v1598_v10, %v813_v9  ;;  %v818_v36 = vmul.f32 %v1615_v12, %v813_v9  ;;  %v817_v37 = vmul.f32 %v1602_v33, %v813_v9 }
 0x18a   : > { %v819_v38 = vmul.f32 %v1613_v45, %v813_v9  ;;  %v821_v39 = vmul.f32 %v1629_v56, %v813_v9  ;;  %v820_v40 = vmul.f32 %v1618_v46, %v813_v9  ;;  %v822_v41 = vmul.f32 %v1627_v20, %v813_v9 }
 0x18d   : > { %v760_v1 = vpop.permute.xlu1 %759 }
 0x18e   : > { %v762_v23 = vmul.f32 %v1600_v19, %v760_v1  ;;  %v764_v24 = vmul.f32 %v1602_v33, %v760_v1  ;;  %v763_v4 = vmul.f32 %v1598_v10, %v760_v1  ;;  %v765_v3 = vmul.f32 %v1615_v12, %v760_v1 }
 0x18f   : > { %v767_v25 = vmul.f32 %v1618_v46, %v760_v1  ;;  %v766_v28 = vmul.f32 %v1613_v45, %v760_v1  ;;  %v768_v31 = vmul.f32 %v1629_v56, %v760_v1  ;;  %v769_v34 = vmul.f32 %v1627_v20, %v760_v1 }
 0x190   : > { %778 = vrot.lane.b32.xlu2 %v762_v23, %s1257_s28  ;;  %782 = vrot.lane.b32.xlu1 %v764_v24, %s1257_s28 }
 0x191   : > { %780 = vrot.lane.b32.xlu0 %v763_v4, %s1257_s28 }
 0x198   : > { %784 = vrot.lane.b32.xlu2 %v765_v3, %s1257_s28  ;;  %788 = vrot.lane.b32.xlu1 %v767_v25, %s1257_s28 }
 0x199   : > { %786 = vrot.lane.b32.xlu0 %v766_v28, %s1257_s28 }
 0x1a0   : > { %790 = vrot.lane.b32.xlu2 %v768_v31, %s1257_s28  ;;  %831 = vrot.lane.b32.xlu1 %v815_v29, %s1258_s29 }
 0x1a1   : > { %792 = vrot.lane.b32.xlu0 %v769_v34, %s1257_s28 }
 0x1a8   : > { %833 = vrot.lane.b32.xlu2 %v816_v35, %s1258_s29  ;;  %837 = vrot.lane.b32.xlu1 %v818_v36, %s1258_s29 }
 0x1a9   : > { %835 = vrot.lane.b32.xlu0 %v817_v37, %s1258_s29 }
 0x1b0   : > { %839 = vrot.lane.b32.xlu2 %v819_v38, %s1258_s29  ;;  %843 = vrot.lane.b32.xlu1 %v821_v39, %s1258_s29 }
 0x1b1   : > { %841 = vrot.lane.b32.xlu0 %v820_v40, %s1258_s29 }
 0x1b8   : > { %845 = vrot.lane.b32.xlu2 %v822_v41, %s1258_s29  ;;  %882 = vrot.lane.b32.xlu1 %v1609_v44, %s1253_s11 }
 0x1b9   : > { %880 = vrot.lane.b32.xlu0 %v670_v7, %s1253_s11 }
 0x1bc   : > { %v730_v43 = vpop.permute.xlu2 %729 }
 0x1c0   : > { %884 = vrot.lane.b32.xlu2 %v1584_v60, %s1253_s11  ;;  %888 = vrot.lane.b32.xlu1 %v674_v18, %s1253_s11  ;;  %v695_v18 = vperm.slane %v1500_v17, 0 }
 0x1c1   : > { %886 = vrot.lane.b32.xlu0 %v673_v14, %s1253_s11 }
 0x1c2   : > { %v697_v57 = vmul.f32 %v1598_v10, %v695_v18  ;;  %v696_v7 = vmul.f32 %v1600_v19, %v695_v18  ;;  %v699_v4 = vmul.f32 %v1615_v12, %v695_v18  ;;  %v698_v25 = vmul.f32 %v1602_v33, %v695_v18 }
 0x1c3   : > { %v702_v12 = vmul.f32 %v1629_v56, %v695_v18  ;;  %v701_v33 = vmul.f32 %v1618_v46, %v695_v18 }
 0x1c4   : > { %v736_v47 = vpop.permute.xlu2 %735 }
 0x1c8   : > { %890 = vrot.lane.b32.xlu2 %v1596_v32, %s1253_s11  ;;  %894 = vrot.lane.b32.xlu1 %v677_v5, %s1253_s11  ;;  %v700_v5 = vmul.f32 %v1613_v45, %v695_v18 }
 0x1c9   : > { %892 = vrot.lane.b32.xlu0 %v676_v22, %s1253_s11  ;;  %v703_v22 = vmul.f32 %v1627_v20, %v695_v18  ;;  %v751_v20 = vadd.f32 %v730_v43, %v698_v25  ;;  %s272_s11 = sand.u32 1, %s1243_s22  }
 0x1ca   : > { %s1069_s17 = sshll.u32 %s272_s11, 6 }
 0x1cb   : > { %s1707_s20 = scalar_lea.vmem [#allocation2], %s1069_s17 }
 0x1cc   : > { %s976_s9 = sshll.u32 %s1707_s20, 4  ;;  %s977_s9 = int_to_ptr.vmem [resolvable:$true] %s976_s9 }
 0x1d3   : > { %v728_v49 = vpop.permute.xlu1 %727  ;;  %v726_v44 = vpop.permute.xlu0 %725 }
 0x1d4   : > { %v750_v32 = vadd.f32 %v728_v49, %v697_v57  ;;  %v749_v27 = vadd.f32 %v726_v44, %v696_v7 }
 0x1db   : > { %v734_v52 = vpop.permute.xlu1 %733  ;;  %v732_v53 = vpop.permute.xlu0 %731 }
 0x1dc   : > { %v753_v8 = vadd.f32 %v734_v52, %v700_v5  ;;  %v752_v34 = vadd.f32 %v732_v53, %v699_v4  ;;  %v754_v52 = vadd.f32 %v736_v47, %v701_v33 }
 0x1e3   : > { %v740_v60 = vpop.permute.xlu1 %739  ;;  %v738_v55 = vpop.permute.xlu0 %737 }
 0x1e4   : > { %v756_v24 = vadd.f32 %v740_v60, %v703_v22 }
 0x1ea   : > { %v779_v51 = vpop.permute.xlu2 %778 }
 0x1eb   : > { %v802_v17 = vadd.f32 %v779_v51, %v749_v27  ;;  %v755_v51 = vadd.f32 %v738_v55, %v702_v12 }
 0x1f2   : > { %v785_v59 = vpop.permute.xlu2 %784 }
 0x1f3   : > { %v805_v36 = vadd.f32 %v785_v59, %v752_v34 }
 0x1fa   : > { %v791_v42 = vpop.permute.xlu2 %790 }
 0x1fb   : > { %v808_v43 = vadd.f32 %v791_v42, %v755_v51 }
 0x202   : > { %v834_v58 = vpop.permute.xlu2 %833  ;;  %v783_v48 = vpop.permute.xlu1 %782 }
 0x203   : > { %v781_v2 = vpop.permute.xlu0 %780  ;;  %v804_v37 = vadd.f32 %v783_v48, %v751_v20 }
 0x204   : > { %v803_v63 = vadd.f32 %v781_v2, %v750_v32 }
 0x206   : > { %v856_v50 = vadd.f32 %v834_v58, %v803_v63 }
 0x208   : > { %v865_v6 = vadd.f32 %v863_v62, %v856_v50 }
 0x20a   : > { %914 = vrot.lane.b32.xlu0 %v865_v6, %s1254_s12  ;;  %v789_v13 = vpop.permute.xlu1 %788  ;;  %v840_v14 = vpop.permute.xlu2 %839 }
 0x20b   : > { %v787_v15 = vpop.permute.xlu0 %786  ;;  %v807_v53 = vadd.f32 %v789_v13, %v754_v52 }
 0x20c   : > { %v806_v10 = vadd.f32 %v787_v15, %v753_v8 }
 0x20e   : > { %v859_v1 = vadd.f32 %v840_v14, %v806_v10 }
 0x210   : > { %v868_v23 = vadd.f32 %v863_v62, %v859_v1 }
 0x212   : > { %920 = vrot.lane.b32.xlu0 %v868_v23, %s1254_s12  ;;  %v832_v45 = vpop.permute.xlu1 %831  ;;  %v846_v9 = vpop.permute.xlu2 %845 }
 0x213   : > { %v855_v19 = vadd.f32 %v832_v45, %v802_v17  ;;  %v793_v3 = vpop.permute.xlu0 %792 }
 0x214   : > { %v809_v28 = vadd.f32 %v793_v3, %v756_v24 }
 0x215   : > { %v864_v29 = vadd.f32 %v863_v62, %v855_v19 }
 0x216   : > { %v862_v31 = vadd.f32 %v846_v9, %v809_v28 }
 0x217   : > { %912 = vrot.lane.b32.xlu2 %v864_v29, %s1254_s12 }
 0x218   : > { %v871_v35 = vadd.f32 %v863_v62, %v862_v31 }
 0x21a   : > { %926 = vrot.lane.b32.xlu0 %v871_v35, %s1254_s12  ;;  %v838_v38 = vpop.permute.xlu1 %837  ;;  %v885_v46 = vpop.permute.xlu2 %884 }
 0x21b   : > { %v858_v39 = vadd.f32 %v838_v38, %v805_v36  ;;  %v836_v40 = vpop.permute.xlu0 %835 }
 0x21c   : > { %v857_v41 = vadd.f32 %v836_v40, %v804_v37 }
 0x21d   : > { %v867_v49 = vadd.f32 %v863_v62, %v858_v39 }
 0x21e   : > { %v866_v44 = vadd.f32 %v863_v62, %v857_v41 }
 0x21f   : > { %918 = vrot.lane.b32.xlu2 %v867_v49, %s1254_s12 }
 0x220   : > { %916 = vrot.lane.b32.xlu1 %v866_v44, %s1254_s12 }
 0x222   : > { %v844_v59 = vpop.permute.xlu1 %843  ;;  %v891_v18 = vpop.permute.xlu2 %890 }
 0x223   : > { %v861_v60 = vadd.f32 %v844_v59, %v808_v43  ;;  %v842_v56 = vpop.permute.xlu0 %841 }
 0x224   : > { %v860_v57 = vadd.f32 %v842_v56, %v807_v53 }
 0x225   : > { %v870_v32 = vadd.f32 %v863_v62, %v861_v60 }
 0x226   : > { %v869_v58 = vadd.f32 %v863_v62, %v860_v57 }
 0x227   : > { %924 = vrot.lane.b32.xlu2 %v870_v32, %s1254_s12 }
 0x228   : > { %922 = vrot.lane.b32.xlu1 %v869_v58, %s1254_s12  ;;  %s1084_s12 = sshll.u32 %s1317_s25, 6  ;;  %s964_s25 = scalar_lea.sflag [#allocation3], %s272_s11 }
 0x229   : > { %s975_s29 = scalar_lea.hbm %s1786_s6, %s1084_s12 }
 0x22a   : > { %v883_v63 = vpop.permute.xlu1 %882  ;;  %s978_s10 = sshll.u32 %s975_s29, 4  ;;  %s979_s10 = int_to_ptr.hbm [resolvable:$true] %s978_s10 }
 0x22b   : > { %v881_v55 = vpop.permute.xlu0 %880  ;;  %v938_v6 = vsel %vm936_vm1, %v1552_v16, %v883_v63  ;;  %s1203_s14 = sshra.s32 %s979_s10, 4  ;;  %s1204_s14 = int_to_ptr.hbm [resolvable:$true] %s1203_s14 }
 0x22c   : > { %v937_v42 = vsel %vm936_vm1, %v1569_v11, %v881_v55  ;;  %s1205_s15 = scalar_lea.hbm %s1204_s14, 64  ;;  %p1210_p0 = scmp.lt.s32.totalorder %s1204_s14, %s1786_s6 }
 0x22d   : > { %p1206_p11 = scmp.ne.s32.totalorder %s1204_s14, %s1205_s15  ;;  %p1211_p1 = scmp.lt.s32.totalorder %s1209_s18, %s1205_s15 }
 0x22f   : > { %p1207_p12 = pnand %p1206_p11, %p1334_p5  ;;  %p1212_p2 = por %p1211_p1, %p1210_p0 }
 0x231   : > { %p1208_p13 = pneg %p1207_p12 }
 0x232   : > { %v889_v13 = vpop.permute.xlu1 %888 }
 0x233   : > { %v887_v47 = vpop.permute.xlu0 %886  ;;  %v941_v16 = vsel %vm936_vm1, %v1556_v0, %v889_v13  ;;  %v939_v0 = vsel %vm936_vm1, %v1559_v30, %v885_v46  ;;  %p1213_p3 = pnand %p1212_p2, %p1208_p13 }
 0x234   : > { %v940_v5 = vsel %vm936_vm1, %v1573_v54, %v887_v47 }
 0x23a   : > { %v895_v22 = vpop.permute.xlu1 %894 }
 0x23b   : > { %v893_v62 = vpop.permute.xlu0 %892  ;;  %v944_v1 = vsel %vm936_vm1, %v1563_v26, %v895_v22  ;;  %v942_v26 = vsel %vm936_vm1, %v1565_v21, %v891_v18 }
 0x23c   : > { %v943_v54 = vsel %vm936_vm1, %v1576_v61, %v893_v62 }
 0x271   : > { %v913_v48 = vpop.permute.xlu2 %912 }
 0x272   : > { %v946_v2 = vsel %vm945_vm0, %v937_v42, %v913_v48 }
 0x273   : > { %955 = vst.msk [vmem:[%s1707_s20] sm:$0xff] %vm954_vm2, %v946_v2 }
 0x279   : > { %v919_v50 = vpop.permute.xlu2 %918 }
 0x27a   : > { %v949_v11 = vsel %vm945_vm0, %v940_v5, %v919_v50 }
 0x27b   : > { %958 = vst.msk [vmem:[%s1707_s20 + $0x18] sm:$0xff] %vm954_vm2, %v949_v11 }
 0x27c   : > { %v915_v7 = vpop.permute.xlu0 %914 }
 0x27d   : > { %v947_v8 = vsel %vm945_vm0, %v938_v6, %v915_v7 }
 0x27e   : > { %956 = vst.msk [vmem:[%s1707_s20 + $0x8] sm:$0xff] %vm954_vm2, %v947_v8 }
 0x281   : > { %v925_v14 = vpop.permute.xlu2 %924 }
 0x282   : > { %v952_v15 = vsel %vm945_vm0, %v943_v54, %v925_v14 }
 0x283   : > { %961 = vst.msk [vmem:[%s1707_s20 + $0x30] sm:$0xff] %vm954_vm2, %v952_v15 }
 0x284   : > { %v921_v10 = vpop.permute.xlu0 %920 }
 0x285   : > { %v950_v27 = vsel %vm945_vm0, %v941_v16, %v921_v10 }
 0x286   : > { %959 = vst.msk [vmem:[%s1707_s20 + $0x20] sm:$0xff] %vm954_vm2, %v950_v27 }
 0x28c   : > { %v927_v61 = vpop.permute.xlu0 %926 }
 0x28d   : > { %v953_v23 = vsel %vm945_vm0, %v944_v1, %v927_v61 }
 0x28e   : > { %962 = vst.msk [vmem:[%s1707_s20 + $0x38] sm:$0xff] %vm954_vm2, %v953_v23 }
 0x292   : > { %v917_v17 = vpop.permute.xlu1 %916 }
 0x293   : > { %v948_v24 = vsel %vm945_vm0, %v939_v0, %v917_v17 }
 0x294   : > { %957 = vst.msk [vmem:[%s1707_s20 + $0x10] sm:$0xff] %vm954_vm2, %v948_v24 }
 0x29a   : > { %v923_v45 = vpop.permute.xlu1 %922 }
 0x29b   : > { %v951_v30 = vsel %vm945_vm0, %v942_v26, %v923_v45 }
 0x29c   : > { %960 = vst.msk [vmem:[%s1707_s20 + $0x28] sm:$0xff] %vm954_vm2, %v951_v30 }
 0x29d   : > { %1216 = shalt.err (!%p1213_p3)
}
 0x29e   : > { %s1259_s11 = smov 128   ;;  %s1260_s20 = smov 8  }
 0x29f   : > { %1142 = dma.vmem_to_hbm [thread:$0]  (%p1334_p5), %s977_s9, 1024, %s979_s10, %s964_s25, %s1259_s11, %s1259_s11, %s1260_s20  }
 0x2a0 PF: > { %p1148_p4 = scmp.ge.s32.totalorder %s1251_s24, 2  ;;  %s993_s12 = sand.u32 1, %s1239_s21  }
 0x2a1   : > { %s994_s26 = scalar_lea.sflag [#allocation3], %s993_s12 }
 0x2a2   : > { %p1145_p7 = pnand %p1148_p4, %p1338_p6 }
 0x2a4   : > { %p1146_p8 = pneg %p1145_p7 }
 0x2a6   : > { %1234 = dma.done.wait (%p1146_p8), %s994_s26, 1024  }
 0x2a7   : > { %1236 = vsyncadd (%p1146_p8), %s994_s26, 4294966272  ;;  %p16_p9 = scmp.ge.s32.totalorder %s1321_s27, 4   ;;  %s1789_s21 = smov %s1243_s22 }
 0x2a8   : > { %s1790_s22 = smov %s1247_s23  ;;  %s1791_s23 = smov %s1332_s30 }
 0x2a9   : > { %s1792_s24 = smov %s1321_s27  ;;  %18 = sbr.rel (!%p16_p9) target bundleno = 3 (0x3), region = 85 }
 0x2ae   :  { %1000 = vsyncpa [#allocation3], 1 }
 0x2af   :  { %1002 = vsyncpa [#allocation3 + $0x1], 1 }

</bundles_post_ra>
